<compile_context>
chip_gen: v5e
topology: v5e:2x2
jax: 0.10.0
libtpu: 0.0.40
codegen_flags: <defaults>
</compile_context>

<pallas_src>
import functools

import jax
import jax.numpy as jnp
from jax.experimental import pallas as pl
from jax.experimental.pallas import tpu as pltpu


# ----------------------------------------------------------------------------
# In-kernel building blocks
# ----------------------------------------------------------------------------
def _pool_rows(y_ref, half):
    # MaxPool1d(kernel_size=2, stride=2) over time.  y_ref rows are ordered
    # (batch, time); even/odd members of each pair are read back with a
    # stride-2 pl.ds and reduced with an elementwise max.
    even = y_ref[pl.ds(0, half, stride=2), :]
    odd = y_ref[pl.ds(1, half, stride=2), :]
    return jnp.maximum(even, odd)                       # (half, C) f32


def _conv_relu(pooled3, cols_ref, w_ref, b_ref, K):
    # 'same' Conv1d + bias + ReLU as a single im2col matmul.
    # pooled3: (Bt, Lc, Cin) f32 channels-last.  The K shifted copies are
    # written into the VMEM scratch cols_ref (the untouched zero halo IS the
    # 'same' padding, done in-kernel), then one
    # (Bt*Lc, K*Cin) @ (K*Cin, Cout) bf16 matmul hits the MXU.
    Bt, Lc, Cin = pooled3.shape
    pad = K // 2
    cols_ref[...] = jnp.zeros_like(cols_ref)
    for k in range(K):
        d = k - pad                                     # time shift of tap k
        lo_dst, hi_dst = max(0, -d), Lc - max(0, d)
        lo_src, hi_src = max(0, d), Lc - max(0, -d)
        cols_ref[:, lo_dst:hi_dst, k * Cin:(k + 1) * Cin] = (
            pooled3[:, lo_src:hi_src, :])
    cols = cols_ref[...].reshape(Bt * Lc, K * Cin).astype(jnp.bfloat16)
    y = jnp.dot(cols, w_ref[...], preferred_element_type=jnp.float32) + b_ref[...]
    return jnp.maximum(y, 0.0)                          # (Bt*Lc, Cout) f32


# ----------------------------------------------------------------------------
# Fused encoder kernel: CNN (3x conv+relu+pool) + BiLSTM + Linear + ReLU
# ----------------------------------------------------------------------------
def _encoder_kernel(x1_ref, w1, b1, w2, b2, w3, b3,
                    wih_f, whh_f, b_lf, wih_b, b_lb, wp, bp,
                    o_ref,
                    y1_ref, cols2_ref, y2_ref, cols3_ref, y3_ref,
                    *, Bt, L, T, H):
    f32, bf16 = jnp.float32, jnp.bfloat16

    # ---- conv1 (1->32, k=7) + ReLU + pool ---------------------------------
    cols1 = x1_ref[...].reshape(Bt * L, 7).astype(bf16)       # pre-built taps
    y1_ref[...] = jnp.maximum(
        jnp.dot(cols1, w1[...], preferred_element_type=f32) + b1[...], 0.0)
    p1 = _pool_rows(y1_ref, Bt * L // 2).reshape(Bt, L // 2, 32)

    # ---- conv2 (32->64, k=5) + ReLU + pool --------------------------------
    y2_ref[...] = _conv_relu(p1, cols2_ref, w2, b2, K=5)
    p2 = _pool_rows(y2_ref, Bt * L // 4).reshape(Bt, L // 4, 64)

    # ---- conv3 (64->128, k=3) + ReLU + pool -------------------------------
    y3_ref[...] = _conv_relu(p2, cols3_ref, w3, b3, K=3)
    feats = _pool_rows(y3_ref, Bt * T)                        # (Bt*T, 128) f32

    # ---- BiLSTM(H) -> last timestep -> Linear(2H->out) -> ReLU ------------
    xg = feats.astype(bf16)
    # Input projection hoisted out of the recurrence: one big MXU matmul.
    gx = jnp.dot(xg, wih_f[...], preferred_element_type=f32) + b_lf[...]
    gx = gx.reshape(Bt, T, 4 * H)

    whh = whh_f[...]                                          # (H, 4H) bf16
    h = jnp.zeros((Bt, H), f32)
    c = jnp.zeros((Bt, H), f32)
    # TODO(synk): switch to lax.fori_loop over a VMEM gates scratch for very
    # long T; static unroll is fine at T = L/8 used here.
    for t in range(T):
        g = gx[:, t, :] + jnp.dot(h.astype(bf16), whh,
                                  preferred_element_type=f32)
        i_g = jax.nn.sigmoid(g[:, 0:H])                       # PyTorch order
        f_g = jax.nn.sigmoid(g[:, H:2 * H])                   # (i, f, g, o)
        g_g = jnp.tanh(g[:, 2 * H:3 * H])
        o_g = jax.nn.sigmoid(g[:, 3 * H:4 * H])
        c = f_g * c + i_g * g_g
        h = o_g * jnp.tanh(c)
    h_fwd = h

    # Backward direction: only out[:, -1, :] is consumed; for the reversed cell
    # that position is its FIRST step from the zero initial state, so a single
    # cell evaluation on x[:, T-1, :] is exact (whh_b @ 0 == 0, f_gate*c0 == 0).
    x_last = xg.reshape(Bt, T, -1)[:, T - 1, :]               # (Bt, 128) bf16
    gb = jnp.dot(x_last, wih_b[...], preferred_element_type=f32) + b_lb[...]
    i_b = jax.nn.sigmoid(gb[:, 0:H])
    g_b = jnp.tanh(gb[:, 2 * H:3 * H])
    o_b = jax.nn.sigmoid(gb[:, 3 * H:4 * H])
    h_bwd = o_b * jnp.tanh(i_b * g_b)

    # Linear(2H -> out) + ReLU; concat avoided by splitting the weight rows.
    out = (jnp.dot(h_fwd.astype(bf16), wp[0:H, :], preferred_element_type=f32)
           + jnp.dot(h_bwd.astype(bf16), wp[H:2 * H, :],
                     preferred_element_type=f32)
           + bp[...])
    o_ref[...] = jnp.maximum(out, 0.0)


# ----------------------------------------------------------------------------
# Wrapper
# ----------------------------------------------------------------------------
def _replicated_spec(shape):
    n = len(shape)
    return pl.BlockSpec(shape, lambda b, _n=n: (0,) * _n)


def _pick_batch_block(B):
    # The output block's second-minor dim must be a multiple of 8 or the full
    # batch; use 8-row batch tiles when the batch allows it.
    return 8 if B % 8 == 0 else B


def cnn_bilstm_encoder(x, p):
    # x: (B, L) raw 1-D signal.  Matches CNN_BiLSTM_Encoder.forward (eval mode).
    B, L = x.shape
    assert L % 8 == 0, "L must be divisible by 8 (three MaxPool1d(2) stages)"
    H = p["whh_f"].shape[0]
    out_dim = p["wp"].shape[1]
    T = L // 8
    bt = _pick_batch_block(B)

    # Layer-1 im2col on the raw 1-channel signal (7 taps, 'same' padding).
    # This array is tiny (7x the raw signal); all the wide feature maps stay
    # inside the fused kernel and never touch HBM.
    xp = jnp.pad(x, ((0, 0), (3, 3)))
    cols1 = jnp.stack([xp[:, k:k + L] for k in range(7)], axis=-1)   # (B, L, 7)

    weights = (p["w1"], p["b1"], p["w2"], p["b2"], p["w3"], p["b3"],
               p["wih_f"], p["whh_f"], p["bf"], p["wih_b"], p["bb"],
               p["wp"], p["bp"])

    kern = functools.partial(_encoder_kernel, Bt=bt, L=L, T=T, H=H)
    return pl.pallas_call(
        kern,
        grid=(B // bt,),
        in_specs=[pl.BlockSpec((bt, L, 7), lambda b: (b, 0, 0))]
                 + [_replicated_spec(w.shape) for w in weights],
        out_specs=pl.BlockSpec((bt, out_dim), lambda b: (b, 0)),
        out_shape=jax.ShapeDtypeStruct((B, out_dim), jnp.float32),
        scratch_shapes=[
            pltpu.VMEM((bt * L, 32), jnp.float32),            # y1 (pre-pool)
            pltpu.VMEM((bt, L // 2, 5 * 32), jnp.float32),    # cols2 (im2col)
            pltpu.VMEM((bt * L // 2, 64), jnp.float32),       # y2 (pre-pool)
            pltpu.VMEM((bt, L // 4, 3 * 64), jnp.float32),    # cols3 (im2col)
            pltpu.VMEM((bt * L // 4, 128), jnp.float32),      # y3 (pre-pool)
        ],
        # Scratch + blocks stay well under the default scoped-VMEM limit on
        # v5e/v6e/v7x at these shapes; for very long L, tile time and/or raise
        # vmem_limit_bytes here.
        compiler_params=pltpu.CompilerParams(
            dimension_semantics=("parallel",)),
    )(cols1, *weights)


# ----------------------------------------------------------------------------
# Deterministic parameter construction (shapes from the PyTorch __init__).
# Conv weights stored im2col-style as (K*Cin, Cout): row k*Cin + cin maps to
# PyTorch conv.weight[cout, cin, k].  LSTM weights stored transposed as
# (in_features, 4H) in PyTorch gate order (i, f, g, o); b_ih + b_hh pre-summed.
# MXU operands are bf16; biases stay f32.
# ----------------------------------------------------------------------------
def init_params(key, lstm_hidden=64, lstm_out=64):
    keys = jax.random.split(key, 16)

    def u(k, shape, fan):
        s = fan ** -0.5
        return jax.random.uniform(k, shape, jnp.float32, -s, s)

    H = lstm_hidden
    p = {
        "w1": u(keys[0], (7 * 1, 32), 7 * 1).astype(jnp.bfloat16),
        "b1": u(keys[1], (1, 32), 7 * 1),
        "w2": u(keys[2], (5 * 32, 64), 5 * 32).astype(jnp.bfloat16),
        "b2": u(keys[3], (1, 64), 5 * 32),
        "w3": u(keys[4], (3 * 64, 128), 3 * 64).astype(jnp.bfloat16),
        "b3": u(keys[5], (1, 128), 3 * 64),
        "wih_f": u(keys[6], (128, 4 * H), H).astype(jnp.bfloat16),
        "whh_f": u(keys[7], (H, 4 * H), H).astype(jnp.bfloat16),
        "bf": u(keys[8], (1, 4 * H), H) + u(keys[9], (1, 4 * H), H),
        "wih_b": u(keys[10], (128, 4 * H), H).astype(jnp.bfloat16),
        # weight_hh_l0_reverse is provably unused: only out[:, -1, :] is read
        # and the reverse cell's step there starts from the zero state.
        "bb": u(keys[11], (1, 4 * H), H) + u(keys[12], (1, 4 * H), H),
        "wp": u(keys[13], (2 * H, lstm_out), 2 * H).astype(jnp.bfloat16),
        "bp": u(keys[14], (1, lstm_out), 2 * H),
    }
    return p


if __name__ == "__main__":
    key = jax.random.PRNGKey(0)
    pkey, xkey = jax.random.split(key)
    params = init_params(pkey)

    B, L = 2, 64                      # -> LSTM sequence length 8, feature dim 128
    x = jax.random.normal(xkey, (B, L), jnp.float32)

    fn = jax.jit(lambda a: cnn_bilstm_encoder(a, params))
    out = fn(x)
    jax.block_until_ready(out)
    assert out.shape == (B, 64) and out.dtype == jnp.float32
    print("KERNEL_OK")
</pallas_src>

<mosaic_0001>
module attributes {stable_mosaic.version = 11 : i64} {
  func.func @_encoder_kernel(%arg0: i32, %arg1: memref<2x64x7xf32, #tpu.memory_space<vmem>>, %arg2: memref<7x32xbf16, #tpu.memory_space<vmem>>, %arg3: memref<1x32xf32, #tpu.memory_space<vmem>>, %arg4: memref<160x64xbf16, #tpu.memory_space<vmem>>, %arg5: memref<1x64xf32, #tpu.memory_space<vmem>>, %arg6: memref<192x128xbf16, #tpu.memory_space<vmem>>, %arg7: memref<1x128xf32, #tpu.memory_space<vmem>>, %arg8: memref<128x256xbf16, #tpu.memory_space<vmem>>, %arg9: memref<64x256xbf16, #tpu.memory_space<vmem>>, %arg10: memref<1x256xf32, #tpu.memory_space<vmem>>, %arg11: memref<128x256xbf16, #tpu.memory_space<vmem>>, %arg12: memref<1x256xf32, #tpu.memory_space<vmem>>, %arg13: memref<128x64xbf16, #tpu.memory_space<vmem>>, %arg14: memref<1x64xf32, #tpu.memory_space<vmem>>, %arg15: memref<2x64xf32, #tpu.memory_space<vmem>>, %arg16: memref<128x32xf32, #tpu.memory_space<vmem>>, %arg17: memref<2x32x160xf32, #tpu.memory_space<vmem>>, %arg18: memref<64x64xf32, #tpu.memory_space<vmem>>, %arg19: memref<2x16x192xf32, #tpu.memory_space<vmem>>, %arg20: memref<32x128xf32, #tpu.memory_space<vmem>>) attributes {dimension_semantics = [#tpu.dimension_semantics<parallel>], iteration_bounds = array<i64: 1>, scalar_prefetch = 0 : i64, scratch_operands = 5 : i64, tpu.core_type = #tpu.core_type<tc>, window_params = [{transform_indices = @transform_0, window_bounds = array<i64: 2, 64, 7>}, {pipeline_mode = #tpu.pipeline_mode<synchronous>, transform_indices = @transform_1, window_bounds = array<i64: 7, 32>}, {pipeline_mode = #tpu.pipeline_mode<synchronous>, transform_indices = @transform_2, window_bounds = array<i64: 1, 32>}, {pipeline_mode = #tpu.pipeline_mode<synchronous>, transform_indices = @transform_3, window_bounds = array<i64: 160, 64>}, {pipeline_mode = #tpu.pipeline_mode<synchronous>, transform_indices = @transform_4, window_bounds = array<i64: 1, 64>}, {pipeline_mode = #tpu.pipeline_mode<synchronous>, transform_indices = @transform_5, window_bounds = array<i64: 192, 128>}, {pipeline_mode = #tpu.pipeline_mode<synchronous>, transform_indices = @transform_6, window_bounds = array<i64: 1, 128>}, {pipeline_mode = #tpu.pipeline_mode<synchronous>, transform_indices = @transform_7, window_bounds = array<i64: 128, 256>}, {pipeline_mode = #tpu.pipeline_mode<synchronous>, transform_indices = @transform_8, window_bounds = array<i64: 64, 256>}, {pipeline_mode = #tpu.pipeline_mode<synchronous>, transform_indices = @transform_9, window_bounds = array<i64: 1, 256>}, {pipeline_mode = #tpu.pipeline_mode<synchronous>, transform_indices = @transform_10, window_bounds = array<i64: 128, 256>}, {pipeline_mode = #tpu.pipeline_mode<synchronous>, transform_indices = @transform_11, window_bounds = array<i64: 1, 256>}, {pipeline_mode = #tpu.pipeline_mode<synchronous>, transform_indices = @transform_12, window_bounds = array<i64: 128, 64>}, {pipeline_mode = #tpu.pipeline_mode<synchronous>, transform_indices = @transform_13, window_bounds = array<i64: 1, 64>}, {transform_indices = @transform_14, window_bounds = array<i64: 2, 64>}]} {
    %c0 = arith.constant 0 : index
    %c0_0 = arith.constant 0 : index
    %c0_1 = arith.constant 0 : index
    %0 = vector.load %arg1[%c0, %c0_0, %c0_1] : memref<2x64x7xf32, #tpu.memory_space<vmem>>, vector<2x64x7xf32>
    %1 = vector.shape_cast %0 : vector<2x64x7xf32> to vector<128x7xf32>
    %2 = arith.truncf %1 : vector<128x7xf32> to vector<128x7xbf16>
    %c0_2 = arith.constant 0 : index
    %c0_3 = arith.constant 0 : index
    %3 = vector.load %arg2[%c0_2, %c0_3] : memref<7x32xbf16, #tpu.memory_space<vmem>>, vector<7x32xbf16>
    %cst = arith.constant dense<0.000000e+00> : vector<128x32xf32>
    %4 = tpu.matmul %2, %3, %cst {dimension_numbers = #tpu.dot_dimension_numbers<[1], [0], [0], [1], [0, 0, 1, 1], [], []>} : vector<128x7xbf16>, vector<7x32xbf16>, vector<128x32xf32> -> vector<128x32xf32>
    %c0_4 = arith.constant 0 : index
    %c0_5 = arith.constant 0 : index
    %5 = vector.load %arg3[%c0_4, %c0_5] : memref<1x32xf32, #tpu.memory_space<vmem>>, vector<1x32xf32>
    %6 = vector.broadcast %5 : vector<1x32xf32> to vector<128x32xf32>
    %7 = arith.addf %4, %6 : vector<128x32xf32>
    %cst_6 = arith.constant 0.000000e+00 : f32
    %8 = vector.broadcast %cst_6 : f32 to vector<128x32xf32>
    %9 = arith.maximumf %7, %8 : vector<128x32xf32>
    %c0_7 = arith.constant 0 : index
    %c0_8 = arith.constant 0 : index
    %10 = vector.load %arg16[%c0_7, %c0_8] : memref<128x32xf32, #tpu.memory_space<vmem>>, vector<128x32xf32>
    tpu.vector_store %arg16[%c0_7, %c0_8], %9 {strides = array<i32>} : memref<128x32xf32, #tpu.memory_space<vmem>>, vector<128x32xf32>,
    %c0_9 = arith.constant 0 : index
    %c0_10 = arith.constant 0 : index
    %11 = tpu.strided_load %arg16[%c0_9, %c0_10] {strides = array<i32: 2, 1>} : memref<128x32xf32, #tpu.memory_space<vmem>>, vector<64x32xf32>
    %c1 = arith.constant 1 : index
    %c0_11 = arith.constant 0 : index
    %12 = tpu.strided_load %arg16[%c1, %c0_11] {strides = array<i32: 2, 1>} : memref<128x32xf32, #tpu.memory_space<vmem>>, vector<64x32xf32>
    %13 = arith.maximumf %11, %12 : vector<64x32xf32>
    %14 = vector.shape_cast %13 : vector<64x32xf32> to vector<2x32x32xf32>
    %cst_12 = arith.constant 0.000000e+00 : f32
    %15 = vector.broadcast %cst_12 : f32 to vector<2x32x160xf32>
    %c0_13 = arith.constant 0 : index
    %c0_14 = arith.constant 0 : index
    %c0_15 = arith.constant 0 : index
    %16 = vector.load %arg17[%c0_13, %c0_14, %c0_15] : memref<2x32x160xf32, #tpu.memory_space<vmem>>, vector<2x32x160xf32>
    tpu.vector_store %arg17[%c0_13, %c0_14, %c0_15], %15 {strides = array<i32>} : memref<2x32x160xf32, #tpu.memory_space<vmem>>, vector<2x32x160xf32>,
    %17 = vector.extract_strided_slice %14 {offsets = [0, 0, 0], sizes = [2, 30, 32], strides = [1, 1, 1]} : vector<2x32x32xf32> to vector<2x30x32xf32>
    %c0_16 = arith.constant 0 : index
    %c2 = arith.constant 2 : index
    %c0_17 = arith.constant 0 : index
    %18 = vector.load %arg17[%c0_16, %c2, %c0_17] : memref<2x32x160xf32, #tpu.memory_space<vmem>>, vector<2x30x32xf32>
    tpu.vector_store %arg17[%c0_16, %c2, %c0_17], %17 {strides = array<i32>} : memref<2x32x160xf32, #tpu.memory_space<vmem>>, vector<2x30x32xf32>,
    %19 = vector.extract_strided_slice %14 {offsets = [0, 0, 0], sizes = [2, 31, 32], strides = [1, 1, 1]} : vector<2x32x32xf32> to vector<2x31x32xf32>
    %c0_18 = arith.constant 0 : index
    %c1_19 = arith.constant 1 : index
    %c32 = arith.constant 32 : index
    %20 = vector.load %arg17[%c0_18, %c1_19, %c32] : memref<2x32x160xf32, #tpu.memory_space<vmem>>, vector<2x31x32xf32>
    tpu.vector_store %arg17[%c0_18, %c1_19, %c32], %19 {strides = array<i32>} : memref<2x32x160xf32, #tpu.memory_space<vmem>>, vector<2x31x32xf32>,
    %c0_20 = arith.constant 0 : index
    %c0_21 = arith.constant 0 : index
    %c64 = arith.constant 64 : index
    %21 = vector.load %arg17[%c0_20, %c0_21, %c64] : memref<2x32x160xf32, #tpu.memory_space<vmem>>, vector<2x32x32xf32>
    tpu.vector_store %arg17[%c0_20, %c0_21, %c64], %14 {strides = array<i32>} : memref<2x32x160xf32, #tpu.memory_space<vmem>>, vector<2x32x32xf32>,
    %22 = vector.extract_strided_slice %14 {offsets = [0, 1, 0], sizes = [2, 31, 32], strides = [1, 1, 1]} : vector<2x32x32xf32> to vector<2x31x32xf32>
    %c0_22 = arith.constant 0 : index
    %c0_23 = arith.constant 0 : index
    %c96 = arith.constant 96 : index
    %23 = vector.load %arg17[%c0_22, %c0_23, %c96] : memref<2x32x160xf32, #tpu.memory_space<vmem>>, vector<2x31x32xf32>
    tpu.vector_store %arg17[%c0_22, %c0_23, %c96], %22 {strides = array<i32>} : memref<2x32x160xf32, #tpu.memory_space<vmem>>, vector<2x31x32xf32>,
    %24 = vector.extract_strided_slice %14 {offsets = [0, 2, 0], sizes = [2, 30, 32], strides = [1, 1, 1]} : vector<2x32x32xf32> to vector<2x30x32xf32>
    %c0_24 = arith.constant 0 : index
    %c0_25 = arith.constant 0 : index
    %c128 = arith.constant 128 : index
    %25 = vector.load %arg17[%c0_24, %c0_25, %c128] : memref<2x32x160xf32, #tpu.memory_space<vmem>>, vector<2x30x32xf32>
    tpu.vector_store %arg17[%c0_24, %c0_25, %c128], %24 {strides = array<i32>} : memref<2x32x160xf32, #tpu.memory_space<vmem>>, vector<2x30x32xf32>,
    %c0_26 = arith.constant 0 : index
    %c0_27 = arith.constant 0 : index
    %c0_28 = arith.constant 0 : index
    %26 = vector.load %arg17[%c0_26, %c0_27, %c0_28] : memref<2x32x160xf32, #tpu.memory_space<vmem>>, vector<2x32x160xf32>
    %27 = vector.shape_cast %26 : vector<2x32x160xf32> to vector<64x160xf32>
    %28 = arith.truncf %27 : vector<64x160xf32> to vector<64x160xbf16>
    %c0_29 = arith.constant 0 : index
    %c0_30 = arith.constant 0 : index
    %29 = vector.load %arg4[%c0_29, %c0_30] : memref<160x64xbf16, #tpu.memory_space<vmem>>, vector<160x64xbf16>
    %cst_31 = arith.constant dense<0.000000e+00> : vector<64x64xf32>
    %30 = tpu.matmul %28, %29, %cst_31 {dimension_numbers = #tpu.dot_dimension_numbers<[1], [0], [0], [1], [0, 0, 1, 1], [], []>} : vector<64x160xbf16>, vector<160x64xbf16>, vector<64x64xf32> -> vector<64x64xf32>
    %c0_32 = arith.constant 0 : index
    %c0_33 = arith.constant 0 : index
    %31 = vector.load %arg5[%c0_32, %c0_33] : memref<1x64xf32, #tpu.memory_space<vmem>>, vector<1x64xf32>
    %32 = vector.broadcast %31 : vector<1x64xf32> to vector<64x64xf32>
    %33 = arith.addf %30, %32 : vector<64x64xf32>
    %cst_34 = arith.constant 0.000000e+00 : f32
    %34 = vector.broadcast %cst_34 : f32 to vector<64x64xf32>
    %35 = arith.maximumf %33, %34 : vector<64x64xf32>
    %c0_35 = arith.constant 0 : index
    %c0_36 = arith.constant 0 : index
    %36 = vector.load %arg18[%c0_35, %c0_36] : memref<64x64xf32, #tpu.memory_space<vmem>>, vector<64x64xf32>
    tpu.vector_store %arg18[%c0_35, %c0_36], %35 {strides = array<i32>} : memref<64x64xf32, #tpu.memory_space<vmem>>, vector<64x64xf32>,
    %c0_37 = arith.constant 0 : index
    %c0_38 = arith.constant 0 : index
    %37 = tpu.strided_load %arg18[%c0_37, %c0_38] {strides = array<i32: 2, 1>} : memref<64x64xf32, #tpu.memory_space<vmem>>, vector<32x64xf32>
    %c1_39 = arith.constant 1 : index
    %c0_40 = arith.constant 0 : index
    %38 = tpu.strided_load %arg18[%c1_39, %c0_40] {strides = array<i32: 2, 1>} : memref<64x64xf32, #tpu.memory_space<vmem>>, vector<32x64xf32>
    %39 = arith.maximumf %37, %38 : vector<32x64xf32>
    %40 = vector.shape_cast %39 : vector<32x64xf32> to vector<2x16x64xf32>
    %cst_41 = arith.constant 0.000000e+00 : f32
    %41 = vector.broadcast %cst_41 : f32 to vector<2x16x192xf32>
    %c0_42 = arith.constant 0 : index
    %c0_43 = arith.constant 0 : index
    %c0_44 = arith.constant 0 : index
    %42 = vector.load %arg19[%c0_42, %c0_43, %c0_44] : memref<2x16x192xf32, #tpu.memory_space<vmem>>, vector<2x16x192xf32>
    tpu.vector_store %arg19[%c0_42, %c0_43, %c0_44], %41 {strides = array<i32>} : memref<2x16x192xf32, #tpu.memory_space<vmem>>, vector<2x16x192xf32>,
    %43 = vector.extract_strided_slice %40 {offsets = [0, 0, 0], sizes = [2, 15, 64], strides = [1, 1, 1]} : vector<2x16x64xf32> to vector<2x15x64xf32>
    %c0_45 = arith.constant 0 : index
    %c1_46 = arith.constant 1 : index
    %c0_47 = arith.constant 0 : index
    %44 = vector.load %arg19[%c0_45, %c1_46, %c0_47] : memref<2x16x192xf32, #tpu.memory_space<vmem>>, vector<2x15x64xf32>
    tpu.vector_store %arg19[%c0_45, %c1_46, %c0_47], %43 {strides = array<i32>} : memref<2x16x192xf32, #tpu.memory_space<vmem>>, vector<2x15x64xf32>,
    %c0_48 = arith.constant 0 : index
    %c0_49 = arith.constant 0 : index
    %c64_50 = arith.constant 64 : index
    %45 = vector.load %arg19[%c0_48, %c0_49, %c64_50] : memref<2x16x192xf32, #tpu.memory_space<vmem>>, vector<2x16x64xf32>
    tpu.vector_store %arg19[%c0_48, %c0_49, %c64_50], %40 {strides = array<i32>} : memref<2x16x192xf32, #tpu.memory_space<vmem>>, vector<2x16x64xf32>,
    %46 = vector.extract_strided_slice %40 {offsets = [0, 1, 0], sizes = [2, 15, 64], strides = [1, 1, 1]} : vector<2x16x64xf32> to vector<2x15x64xf32>
    %c0_51 = arith.constant 0 : index
    %c0_52 = arith.constant 0 : index
    %c128_53 = arith.constant 128 : index
    %47 = vector.load %arg19[%c0_51, %c0_52, %c128_53] : memref<2x16x192xf32, #tpu.memory_space<vmem>>, vector<2x15x64xf32>
    tpu.vector_store %arg19[%c0_51, %c0_52, %c128_53], %46 {strides = array<i32>} : memref<2x16x192xf32, #tpu.memory_space<vmem>>, vector<2x15x64xf32>,
    %c0_54 = arith.constant 0 : index
    %c0_55 = arith.constant 0 : index
    %c0_56 = arith.constant 0 : index
    %48 = vector.load %arg19[%c0_54, %c0_55, %c0_56] : memref<2x16x192xf32, #tpu.memory_space<vmem>>, vector<2x16x192xf32>
    %49 = vector.shape_cast %48 : vector<2x16x192xf32> to vector<32x192xf32>
    %50 = arith.truncf %49 : vector<32x192xf32> to vector<32x192xbf16>
    %c0_57 = arith.constant 0 : index
    %c0_58 = arith.constant 0 : index
    %51 = vector.load %arg6[%c0_57, %c0_58] : memref<192x128xbf16, #tpu.memory_space<vmem>>, vector<192x128xbf16>
    %cst_59 = arith.constant dense<0.000000e+00> : vector<32x128xf32>
    %52 = tpu.matmul %50, %51, %cst_59 {dimension_numbers = #tpu.dot_dimension_numbers<[1], [0], [0], [1], [0, 0, 1, 1], [], []>} : vector<32x192xbf16>, vector<192x128xbf16>, vector<32x128xf32> -> vector<32x128xf32>
    %c0_60 = arith.constant 0 : index
    %c0_61 = arith.constant 0 : index
    %53 = vector.load %arg7[%c0_60, %c0_61] : memref<1x128xf32, #tpu.memory_space<vmem>>, vector<1x128xf32>
    %54 = vector.broadcast %53 : vector<1x128xf32> to vector<32x128xf32>
    %55 = arith.addf %52, %54 : vector<32x128xf32>
    %cst_62 = arith.constant 0.000000e+00 : f32
    %56 = vector.broadcast %cst_62 : f32 to vector<32x128xf32>
    %57 = arith.maximumf %55, %56 : vector<32x128xf32>
    %c0_63 = arith.constant 0 : index
    %c0_64 = arith.constant 0 : index
    %58 = vector.load %arg20[%c0_63, %c0_64] : memref<32x128xf32, #tpu.memory_space<vmem>>, vector<32x128xf32>
    tpu.vector_store %arg20[%c0_63, %c0_64], %57 {strides = array<i32>} : memref<32x128xf32, #tpu.memory_space<vmem>>, vector<32x128xf32>,
    %c0_65 = arith.constant 0 : index
    %c0_66 = arith.constant 0 : index
    %59 = tpu.strided_load %arg20[%c0_65, %c0_66] {strides = array<i32: 2, 1>} : memref<32x128xf32, #tpu.memory_space<vmem>>, vector<16x128xf32>
    %c1_67 = arith.constant 1 : index
    %c0_68 = arith.constant 0 : index
    %60 = tpu.strided_load %arg20[%c1_67, %c0_68] {strides = array<i32: 2, 1>} : memref<32x128xf32, #tpu.memory_space<vmem>>, vector<16x128xf32>
    %61 = arith.maximumf %59, %60 : vector<16x128xf32>
    %62 = arith.truncf %61 : vector<16x128xf32> to vector<16x128xbf16>
    %c0_69 = arith.constant 0 : index
    %c0_70 = arith.constant 0 : index
    %63 = vector.load %arg8[%c0_69, %c0_70] : memref<128x256xbf16, #tpu.memory_space<vmem>>, vector<128x256xbf16>
    %cst_71 = arith.constant dense<0.000000e+00> : vector<16x256xf32>
    %64 = tpu.matmul %62, %63, %cst_71 {dimension_numbers = #tpu.dot_dimension_numbers<[1], [0], [0], [1], [0, 0, 1, 1], [], []>} : vector<16x128xbf16>, vector<128x256xbf16>, vector<16x256xf32> -> vector<16x256xf32>
    %c0_72 = arith.constant 0 : index
    %c0_73 = arith.constant 0 : index
    %65 = vector.load %arg10[%c0_72, %c0_73] : memref<1x256xf32, #tpu.memory_space<vmem>>, vector<1x256xf32>
    %66 = vector.broadcast %65 : vector<1x256xf32> to vector<16x256xf32>
    %67 = arith.addf %64, %66 : vector<16x256xf32>
    %68 = vector.shape_cast %67 : vector<16x256xf32> to vector<2x8x256xf32>
    %c0_74 = arith.constant 0 : index
    %c0_75 = arith.constant 0 : index
    %69 = vector.load %arg9[%c0_74, %c0_75] : memref<64x256xbf16, #tpu.memory_space<vmem>>, vector<64x256xbf16>
    %cst_76 = arith.constant 0.000000e+00 : f32
    %70 = vector.broadcast %cst_76 : f32 to vector<2x64xf32>
    %cst_77 = arith.constant 0.000000e+00 : f32
    %71 = vector.broadcast %cst_77 : f32 to vector<2x64xf32>
    %72 = vector.extract_strided_slice %68 {offsets = [0, 0, 0], sizes = [2, 1, 256], strides = [1, 1, 1]} : vector<2x8x256xf32> to vector<2x1x256xf32>
    %73 = vector.shape_cast %72 : vector<2x1x256xf32> to vector<2x256xf32>
    %74 = arith.truncf %70 : vector<2x64xf32> to vector<2x64xbf16>
    %cst_78 = arith.constant dense<0.000000e+00> : vector<2x256xf32>
    %75 = tpu.matmul %74, %69, %cst_78 {dimension_numbers = #tpu.dot_dimension_numbers<[1], [0], [0], [1], [0, 0, 1, 1], [], []>} : vector<2x64xbf16>, vector<64x256xbf16>, vector<2x256xf32> -> vector<2x256xf32>
    %76 = arith.addf %73, %75 : vector<2x256xf32>
    %77 = vector.extract_strided_slice %76 {offsets = [0, 0], sizes = [2, 64], strides = [1, 1]} : vector<2x256xf32> to vector<2x64xf32>
    %78 = arith.negf %77 : vector<2x64xf32>
    %79 = math.exp %78 : vector<2x64xf32>
    %cst_79 = arith.constant 1.000000e+00 : f32
    %80 = vector.broadcast %cst_79 : f32 to vector<2x64xf32>
    %81 = arith.addf %80, %79 : vector<2x64xf32>
    %82 = arith.divf %80, %81 : vector<2x64xf32>
    %83 = vector.extract_strided_slice %76 {offsets = [0, 64], sizes = [2, 64], strides = [1, 1]} : vector<2x256xf32> to vector<2x64xf32>
    %84 = arith.negf %83 : vector<2x64xf32>
    %85 = math.exp %84 : vector<2x64xf32>
    %cst_80 = arith.constant 1.000000e+00 : f32
    %86 = vector.broadcast %cst_80 : f32 to vector<2x64xf32>
    %87 = arith.addf %86, %85 : vector<2x64xf32>
    %88 = arith.divf %86, %87 : vector<2x64xf32>
    %89 = vector.extract_strided_slice %76 {offsets = [0, 128], sizes = [2, 64], strides = [1, 1]} : vector<2x256xf32> to vector<2x64xf32>
    %90 = math.tanh %89 : vector<2x64xf32>
    %91 = vector.extract_strided_slice %76 {offsets = [0, 192], sizes = [2, 64], strides = [1, 1]} : vector<2x256xf32> to vector<2x64xf32>
    %92 = arith.negf %91 : vector<2x64xf32>
    %93 = math.exp %92 : vector<2x64xf32>
    %cst_81 = arith.constant 1.000000e+00 : f32
    %94 = vector.broadcast %cst_81 : f32 to vector<2x64xf32>
    %95 = arith.addf %94, %93 : vector<2x64xf32>
    %96 = arith.divf %94, %95 : vector<2x64xf32>
    %97 = arith.mulf %88, %71 : vector<2x64xf32>
    %98 = arith.mulf %82, %90 : vector<2x64xf32>
    %99 = arith.addf %97, %98 : vector<2x64xf32>
    %100 = math.tanh %99 : vector<2x64xf32>
    %101 = arith.mulf %96, %100 : vector<2x64xf32>
    %102 = vector.extract_strided_slice %68 {offsets = [0, 1, 0], sizes = [2, 1, 256], strides = [1, 1, 1]} : vector<2x8x256xf32> to vector<2x1x256xf32>
    %103 = vector.shape_cast %102 : vector<2x1x256xf32> to vector<2x256xf32>
    %104 = arith.truncf %101 : vector<2x64xf32> to vector<2x64xbf16>
    %cst_82 = arith.constant dense<0.000000e+00> : vector<2x256xf32>
    %105 = tpu.matmul %104, %69, %cst_82 {dimension_numbers = #tpu.dot_dimension_numbers<[1], [0], [0], [1], [0, 0, 1, 1], [], []>} : vector<2x64xbf16>, vector<64x256xbf16>, vector<2x256xf32> -> vector<2x256xf32>
    %106 = arith.addf %103, %105 : vector<2x256xf32>
    %107 = vector.extract_strided_slice %106 {offsets = [0, 0], sizes = [2, 64], strides = [1, 1]} : vector<2x256xf32> to vector<2x64xf32>
    %108 = arith.negf %107 : vector<2x64xf32>
    %109 = math.exp %108 : vector<2x64xf32>
    %cst_83 = arith.constant 1.000000e+00 : f32
    %110 = vector.broadcast %cst_83 : f32 to vector<2x64xf32>
    %111 = arith.addf %110, %109 : vector<2x64xf32>
    %112 = arith.divf %110, %111 : vector<2x64xf32>
    %113 = vector.extract_strided_slice %106 {offsets = [0, 64], sizes = [2, 64], strides = [1, 1]} : vector<2x256xf32> to vector<2x64xf32>
    %114 = arith.negf %113 : vector<2x64xf32>
    %115 = math.exp %114 : vector<2x64xf32>
    %cst_84 = arith.constant 1.000000e+00 : f32
    %116 = vector.broadcast %cst_84 : f32 to vector<2x64xf32>
    %117 = arith.addf %116, %115 : vector<2x64xf32>
    %118 = arith.divf %116, %117 : vector<2x64xf32>
    %119 = vector.extract_strided_slice %106 {offsets = [0, 128], sizes = [2, 64], strides = [1, 1]} : vector<2x256xf32> to vector<2x64xf32>
    %120 = math.tanh %119 : vector<2x64xf32>
    %121 = vector.extract_strided_slice %106 {offsets = [0, 192], sizes = [2, 64], strides = [1, 1]} : vector<2x256xf32> to vector<2x64xf32>
    %122 = arith.negf %121 : vector<2x64xf32>
    %123 = math.exp %122 : vector<2x64xf32>
    %cst_85 = arith.constant 1.000000e+00 : f32
    %124 = vector.broadcast %cst_85 : f32 to vector<2x64xf32>
    %125 = arith.addf %124, %123 : vector<2x64xf32>
    %126 = arith.divf %124, %125 : vector<2x64xf32>
    %127 = arith.mulf %118, %99 : vector<2x64xf32>
    %128 = arith.mulf %112, %120 : vector<2x64xf32>
    %129 = arith.addf %127, %128 : vector<2x64xf32>
    %130 = math.tanh %129 : vector<2x64xf32>
    %131 = arith.mulf %126, %130 : vector<2x64xf32>
    %132 = vector.extract_strided_slice %68 {offsets = [0, 2, 0], sizes = [2, 1, 256], strides = [1, 1, 1]} : vector<2x8x256xf32> to vector<2x1x256xf32>
    %133 = vector.shape_cast %132 : vector<2x1x256xf32> to vector<2x256xf32>
    %134 = arith.truncf %131 : vector<2x64xf32> to vector<2x64xbf16>
    %cst_86 = arith.constant dense<0.000000e+00> : vector<2x256xf32>
    %135 = tpu.matmul %134, %69, %cst_86 {dimension_numbers = #tpu.dot_dimension_numbers<[1], [0], [0], [1], [0, 0, 1, 1], [], []>} : vector<2x64xbf16>, vector<64x256xbf16>, vector<2x256xf32> -> vector<2x256xf32>
    %136 = arith.addf %133, %135 : vector<2x256xf32>
    %137 = vector.extract_strided_slice %136 {offsets = [0, 0], sizes = [2, 64], strides = [1, 1]} : vector<2x256xf32> to vector<2x64xf32>
    %138 = arith.negf %137 : vector<2x64xf32>
    %139 = math.exp %138 : vector<2x64xf32>
    %cst_87 = arith.constant 1.000000e+00 : f32
    %140 = vector.broadcast %cst_87 : f32 to vector<2x64xf32>
    %141 = arith.addf %140, %139 : vector<2x64xf32>
    %142 = arith.divf %140, %141 : vector<2x64xf32>
    %143 = vector.extract_strided_slice %136 {offsets = [0, 64], sizes = [2, 64], strides = [1, 1]} : vector<2x256xf32> to vector<2x64xf32>
    %144 = arith.negf %143 : vector<2x64xf32>
    %145 = math.exp %144 : vector<2x64xf32>
    %cst_88 = arith.constant 1.000000e+00 : f32
    %146 = vector.broadcast %cst_88 : f32 to vector<2x64xf32>
    %147 = arith.addf %146, %145 : vector<2x64xf32>
    %148 = arith.divf %146, %147 : vector<2x64xf32>
    %149 = vector.extract_strided_slice %136 {offsets = [0, 128], sizes = [2, 64], strides = [1, 1]} : vector<2x256xf32> to vector<2x64xf32>
    %150 = math.tanh %149 : vector<2x64xf32>
    %151 = vector.extract_strided_slice %136 {offsets = [0, 192], sizes = [2, 64], strides = [1, 1]} : vector<2x256xf32> to vector<2x64xf32>
    %152 = arith.negf %151 : vector<2x64xf32>
    %153 = math.exp %152 : vector<2x64xf32>
    %cst_89 = arith.constant 1.000000e+00 : f32
    %154 = vector.broadcast %cst_89 : f32 to vector<2x64xf32>
    %155 = arith.addf %154, %153 : vector<2x64xf32>
    %156 = arith.divf %154, %155 : vector<2x64xf32>
    %157 = arith.mulf %148, %129 : vector<2x64xf32>
    %158 = arith.mulf %142, %150 : vector<2x64xf32>
    %159 = arith.addf %157, %158 : vector<2x64xf32>
    %160 = math.tanh %159 : vector<2x64xf32>
    %161 = arith.mulf %156, %160 : vector<2x64xf32>
    %162 = vector.extract_strided_slice %68 {offsets = [0, 3, 0], sizes = [2, 1, 256], strides = [1, 1, 1]} : vector<2x8x256xf32> to vector<2x1x256xf32>
    %163 = vector.shape_cast %162 : vector<2x1x256xf32> to vector<2x256xf32>
    %164 = arith.truncf %161 : vector<2x64xf32> to vector<2x64xbf16>
    %cst_90 = arith.constant dense<0.000000e+00> : vector<2x256xf32>
    %165 = tpu.matmul %164, %69, %cst_90 {dimension_numbers = #tpu.dot_dimension_numbers<[1], [0], [0], [1], [0, 0, 1, 1], [], []>} : vector<2x64xbf16>, vector<64x256xbf16>, vector<2x256xf32> -> vector<2x256xf32>
    %166 = arith.addf %163, %165 : vector<2x256xf32>
    %167 = vector.extract_strided_slice %166 {offsets = [0, 0], sizes = [2, 64], strides = [1, 1]} : vector<2x256xf32> to vector<2x64xf32>
    %168 = arith.negf %167 : vector<2x64xf32>
    %169 = math.exp %168 : vector<2x64xf32>
    %cst_91 = arith.constant 1.000000e+00 : f32
    %170 = vector.broadcast %cst_91 : f32 to vector<2x64xf32>
    %171 = arith.addf %170, %169 : vector<2x64xf32>
    %172 = arith.divf %170, %171 : vector<2x64xf32>
    %173 = vector.extract_strided_slice %166 {offsets = [0, 64], sizes = [2, 64], strides = [1, 1]} : vector<2x256xf32> to vector<2x64xf32>
    %174 = arith.negf %173 : vector<2x64xf32>
    %175 = math.exp %174 : vector<2x64xf32>
    %cst_92 = arith.constant 1.000000e+00 : f32
    %176 = vector.broadcast %cst_92 : f32 to vector<2x64xf32>
    %177 = arith.addf %176, %175 : vector<2x64xf32>
    %178 = arith.divf %176, %177 : vector<2x64xf32>
    %179 = vector.extract_strided_slice %166 {offsets = [0, 128], sizes = [2, 64], strides = [1, 1]} : vector<2x256xf32> to vector<2x64xf32>
    %180 = math.tanh %179 : vector<2x64xf32>
    %181 = vector.extract_strided_slice %166 {offsets = [0, 192], sizes = [2, 64], strides = [1, 1]} : vector<2x256xf32> to vector<2x64xf32>
    %182 = arith.negf %181 : vector<2x64xf32>
    %183 = math.exp %182 : vector<2x64xf32>
    %cst_93 = arith.constant 1.000000e+00 : f32
    %184 = vector.broadcast %cst_93 : f32 to vector<2x64xf32>
    %185 = arith.addf %184, %183 : vector<2x64xf32>
    %186 = arith.divf %184, %185 : vector<2x64xf32>
    %187 = arith.mulf %178, %159 : vector<2x64xf32>
    %188 = arith.mulf %172, %180 : vector<2x64xf32>
    %189 = arith.addf %187, %188 : vector<2x64xf32>
    %190 = math.tanh %189 : vector<2x64xf32>
    %191 = arith.mulf %186, %190 : vector<2x64xf32>
    %192 = vector.extract_strided_slice %68 {offsets = [0, 4, 0], sizes = [2, 1, 256], strides = [1, 1, 1]} : vector<2x8x256xf32> to vector<2x1x256xf32>
    %193 = vector.shape_cast %192 : vector<2x1x256xf32> to vector<2x256xf32>
    %194 = arith.truncf %191 : vector<2x64xf32> to vector<2x64xbf16>
    %cst_94 = arith.constant dense<0.000000e+00> : vector<2x256xf32>
    %195 = tpu.matmul %194, %69, %cst_94 {dimension_numbers = #tpu.dot_dimension_numbers<[1], [0], [0], [1], [0, 0, 1, 1], [], []>} : vector<2x64xbf16>, vector<64x256xbf16>, vector<2x256xf32> -> vector<2x256xf32>
    %196 = arith.addf %193, %195 : vector<2x256xf32>
    %197 = vector.extract_strided_slice %196 {offsets = [0, 0], sizes = [2, 64], strides = [1, 1]} : vector<2x256xf32> to vector<2x64xf32>
    %198 = arith.negf %197 : vector<2x64xf32>
    %199 = math.exp %198 : vector<2x64xf32>
    %cst_95 = arith.constant 1.000000e+00 : f32
    %200 = vector.broadcast %cst_95 : f32 to vector<2x64xf32>
    %201 = arith.addf %200, %199 : vector<2x64xf32>
    %202 = arith.divf %200, %201 : vector<2x64xf32>
    %203 = vector.extract_strided_slice %196 {offsets = [0, 64], sizes = [2, 64], strides = [1, 1]} : vector<2x256xf32> to vector<2x64xf32>
    %204 = arith.negf %203 : vector<2x64xf32>
    %205 = math.exp %204 : vector<2x64xf32>
    %cst_96 = arith.constant 1.000000e+00 : f32
    %206 = vector.broadcast %cst_96 : f32 to vector<2x64xf32>
    %207 = arith.addf %206, %205 : vector<2x64xf32>
    %208 = arith.divf %206, %207 : vector<2x64xf32>
    %209 = vector.extract_strided_slice %196 {offsets = [0, 128], sizes = [2, 64], strides = [1, 1]} : vector<2x256xf32> to vector<2x64xf32>
    %210 = math.tanh %209 : vector<2x64xf32>
    %211 = vector.extract_strided_slice %196 {offsets = [0, 192], sizes = [2, 64], strides = [1, 1]} : vector<2x256xf32> to vector<2x64xf32>
    %212 = arith.negf %211 : vector<2x64xf32>
    %213 = math.exp %212 : vector<2x64xf32>
    %cst_97 = arith.constant 1.000000e+00 : f32
    %214 = vector.broadcast %cst_97 : f32 to vector<2x64xf32>
    %215 = arith.addf %214, %213 : vector<2x64xf32>
    %216 = arith.divf %214, %215 : vector<2x64xf32>
    %217 = arith.mulf %208, %189 : vector<2x64xf32>
    %218 = arith.mulf %202, %210 : vector<2x64xf32>
    %219 = arith.addf %217, %218 : vector<2x64xf32>
    %220 = math.tanh %219 : vector<2x64xf32>
    %221 = arith.mulf %216, %220 : vector<2x64xf32>
    %222 = vector.extract_strided_slice %68 {offsets = [0, 5, 0], sizes = [2, 1, 256], strides = [1, 1, 1]} : vector<2x8x256xf32> to vector<2x1x256xf32>
    %223 = vector.shape_cast %222 : vector<2x1x256xf32> to vector<2x256xf32>
    %224 = arith.truncf %221 : vector<2x64xf32> to vector<2x64xbf16>
    %cst_98 = arith.constant dense<0.000000e+00> : vector<2x256xf32>
    %225 = tpu.matmul %224, %69, %cst_98 {dimension_numbers = #tpu.dot_dimension_numbers<[1], [0], [0], [1], [0, 0, 1, 1], [], []>} : vector<2x64xbf16>, vector<64x256xbf16>, vector<2x256xf32> -> vector<2x256xf32>
    %226 = arith.addf %223, %225 : vector<2x256xf32>
    %227 = vector.extract_strided_slice %226 {offsets = [0, 0], sizes = [2, 64], strides = [1, 1]} : vector<2x256xf32> to vector<2x64xf32>
    %228 = arith.negf %227 : vector<2x64xf32>
    %229 = math.exp %228 : vector<2x64xf32>
    %cst_99 = arith.constant 1.000000e+00 : f32
    %230 = vector.broadcast %cst_99 : f32 to vector<2x64xf32>
    %231 = arith.addf %230, %229 : vector<2x64xf32>
    %232 = arith.divf %230, %231 : vector<2x64xf32>
    %233 = vector.extract_strided_slice %226 {offsets = [0, 64], sizes = [2, 64], strides = [1, 1]} : vector<2x256xf32> to vector<2x64xf32>
    %234 = arith.negf %233 : vector<2x64xf32>
    %235 = math.exp %234 : vector<2x64xf32>
    %cst_100 = arith.constant 1.000000e+00 : f32
    %236 = vector.broadcast %cst_100 : f32 to vector<2x64xf32>
    %237 = arith.addf %236, %235 : vector<2x64xf32>
    %238 = arith.divf %236, %237 : vector<2x64xf32>
    %239 = vector.extract_strided_slice %226 {offsets = [0, 128], sizes = [2, 64], strides = [1, 1]} : vector<2x256xf32> to vector<2x64xf32>
    %240 = math.tanh %239 : vector<2x64xf32>
    %241 = vector.extract_strided_slice %226 {offsets = [0, 192], sizes = [2, 64], strides = [1, 1]} : vector<2x256xf32> to vector<2x64xf32>
    %242 = arith.negf %241 : vector<2x64xf32>
    %243 = math.exp %242 : vector<2x64xf32>
    %cst_101 = arith.constant 1.000000e+00 : f32
    %244 = vector.broadcast %cst_101 : f32 to vector<2x64xf32>
    %245 = arith.addf %244, %243 : vector<2x64xf32>
    %246 = arith.divf %244, %245 : vector<2x64xf32>
    %247 = arith.mulf %238, %219 : vector<2x64xf32>
    %248 = arith.mulf %232, %240 : vector<2x64xf32>
    %249 = arith.addf %247, %248 : vector<2x64xf32>
    %250 = math.tanh %249 : vector<2x64xf32>
    %251 = arith.mulf %246, %250 : vector<2x64xf32>
    %252 = vector.extract_strided_slice %68 {offsets = [0, 6, 0], sizes = [2, 1, 256], strides = [1, 1, 1]} : vector<2x8x256xf32> to vector<2x1x256xf32>
    %253 = vector.shape_cast %252 : vector<2x1x256xf32> to vector<2x256xf32>
    %254 = arith.truncf %251 : vector<2x64xf32> to vector<2x64xbf16>
    %cst_102 = arith.constant dense<0.000000e+00> : vector<2x256xf32>
    %255 = tpu.matmul %254, %69, %cst_102 {dimension_numbers = #tpu.dot_dimension_numbers<[1], [0], [0], [1], [0, 0, 1, 1], [], []>} : vector<2x64xbf16>, vector<64x256xbf16>, vector<2x256xf32> -> vector<2x256xf32>
    %256 = arith.addf %253, %255 : vector<2x256xf32>
    %257 = vector.extract_strided_slice %256 {offsets = [0, 0], sizes = [2, 64], strides = [1, 1]} : vector<2x256xf32> to vector<2x64xf32>
    %258 = arith.negf %257 : vector<2x64xf32>
    %259 = math.exp %258 : vector<2x64xf32>
    %cst_103 = arith.constant 1.000000e+00 : f32
    %260 = vector.broadcast %cst_103 : f32 to vector<2x64xf32>
    %261 = arith.addf %260, %259 : vector<2x64xf32>
    %262 = arith.divf %260, %261 : vector<2x64xf32>
    %263 = vector.extract_strided_slice %256 {offsets = [0, 64], sizes = [2, 64], strides = [1, 1]} : vector<2x256xf32> to vector<2x64xf32>
    %264 = arith.negf %263 : vector<2x64xf32>
    %265 = math.exp %264 : vector<2x64xf32>
    %cst_104 = arith.constant 1.000000e+00 : f32
    %266 = vector.broadcast %cst_104 : f32 to vector<2x64xf32>
    %267 = arith.addf %266, %265 : vector<2x64xf32>
    %268 = arith.divf %266, %267 : vector<2x64xf32>
    %269 = vector.extract_strided_slice %256 {offsets = [0, 128], sizes = [2, 64], strides = [1, 1]} : vector<2x256xf32> to vector<2x64xf32>
    %270 = math.tanh %269 : vector<2x64xf32>
    %271 = vector.extract_strided_slice %256 {offsets = [0, 192], sizes = [2, 64], strides = [1, 1]} : vector<2x256xf32> to vector<2x64xf32>
    %272 = arith.negf %271 : vector<2x64xf32>
    %273 = math.exp %272 : vector<2x64xf32>
    %cst_105 = arith.constant 1.000000e+00 : f32
    %274 = vector.broadcast %cst_105 : f32 to vector<2x64xf32>
    %275 = arith.addf %274, %273 : vector<2x64xf32>
    %276 = arith.divf %274, %275 : vector<2x64xf32>
    %277 = arith.mulf %268, %249 : vector<2x64xf32>
    %278 = arith.mulf %262, %270 : vector<2x64xf32>
    %279 = arith.addf %277, %278 : vector<2x64xf32>
    %280 = math.tanh %279 : vector<2x64xf32>
    %281 = arith.mulf %276, %280 : vector<2x64xf32>
    %282 = vector.extract_strided_slice %68 {offsets = [0, 7, 0], sizes = [2, 1, 256], strides = [1, 1, 1]} : vector<2x8x256xf32> to vector<2x1x256xf32>
    %283 = vector.shape_cast %282 : vector<2x1x256xf32> to vector<2x256xf32>
    %284 = arith.truncf %281 : vector<2x64xf32> to vector<2x64xbf16>
    %cst_106 = arith.constant dense<0.000000e+00> : vector<2x256xf32>
    %285 = tpu.matmul %284, %69, %cst_106 {dimension_numbers = #tpu.dot_dimension_numbers<[1], [0], [0], [1], [0, 0, 1, 1], [], []>} : vector<2x64xbf16>, vector<64x256xbf16>, vector<2x256xf32> -> vector<2x256xf32>
    %286 = arith.addf %283, %285 : vector<2x256xf32>
    %287 = vector.extract_strided_slice %286 {offsets = [0, 0], sizes = [2, 64], strides = [1, 1]} : vector<2x256xf32> to vector<2x64xf32>
    %288 = arith.negf %287 : vector<2x64xf32>
    %289 = math.exp %288 : vector<2x64xf32>
    %cst_107 = arith.constant 1.000000e+00 : f32
    %290 = vector.broadcast %cst_107 : f32 to vector<2x64xf32>
    %291 = arith.addf %290, %289 : vector<2x64xf32>
    %292 = arith.divf %290, %291 : vector<2x64xf32>
    %293 = vector.extract_strided_slice %286 {offsets = [0, 64], sizes = [2, 64], strides = [1, 1]} : vector<2x256xf32> to vector<2x64xf32>
    %294 = arith.negf %293 : vector<2x64xf32>
    %295 = math.exp %294 : vector<2x64xf32>
    %cst_108 = arith.constant 1.000000e+00 : f32
    %296 = vector.broadcast %cst_108 : f32 to vector<2x64xf32>
    %297 = arith.addf %296, %295 : vector<2x64xf32>
    %298 = arith.divf %296, %297 : vector<2x64xf32>
    %299 = vector.extract_strided_slice %286 {offsets = [0, 128], sizes = [2, 64], strides = [1, 1]} : vector<2x256xf32> to vector<2x64xf32>
    %300 = math.tanh %299 : vector<2x64xf32>
    %301 = vector.extract_strided_slice %286 {offsets = [0, 192], sizes = [2, 64], strides = [1, 1]} : vector<2x256xf32> to vector<2x64xf32>
    %302 = arith.negf %301 : vector<2x64xf32>
    %303 = math.exp %302 : vector<2x64xf32>
    %cst_109 = arith.constant 1.000000e+00 : f32
    %304 = vector.broadcast %cst_109 : f32 to vector<2x64xf32>
    %305 = arith.addf %304, %303 : vector<2x64xf32>
    %306 = arith.divf %304, %305 : vector<2x64xf32>
    %307 = arith.mulf %298, %279 : vector<2x64xf32>
    %308 = arith.mulf %292, %300 : vector<2x64xf32>
    %309 = arith.addf %307, %308 : vector<2x64xf32>
    %310 = math.tanh %309 : vector<2x64xf32>
    %311 = arith.mulf %306, %310 : vector<2x64xf32>
    %312 = vector.shape_cast %62 : vector<16x128xbf16> to vector<2x8x128xbf16>
    %313 = vector.extract_strided_slice %312 {offsets = [0, 7, 0], sizes = [2, 1, 128], strides = [1, 1, 1]} : vector<2x8x128xbf16> to vector<2x1x128xbf16>
    %314 = vector.shape_cast %313 : vector<2x1x128xbf16> to vector<2x128xbf16>
    %c0_110 = arith.constant 0 : index
    %c0_111 = arith.constant 0 : index
    %315 = vector.load %arg11[%c0_110, %c0_111] : memref<128x256xbf16, #tpu.memory_space<vmem>>, vector<128x256xbf16>
    %cst_112 = arith.constant dense<0.000000e+00> : vector<2x256xf32>
    %316 = tpu.matmul %314, %315, %cst_112 {dimension_numbers = #tpu.dot_dimension_numbers<[1], [0], [0], [1], [0, 0, 1, 1], [], []>} : vector<2x128xbf16>, vector<128x256xbf16>, vector<2x256xf32> -> vector<2x256xf32>
    %c0_113 = arith.constant 0 : index
    %c0_114 = arith.constant 0 : index
    %317 = vector.load %arg12[%c0_113, %c0_114] : memref<1x256xf32, #tpu.memory_space<vmem>>, vector<1x256xf32>
    %318 = vector.broadcast %317 : vector<1x256xf32> to vector<2x256xf32>
    %319 = arith.addf %316, %318 : vector<2x256xf32>
    %320 = vector.extract_strided_slice %319 {offsets = [0, 0], sizes = [2, 64], strides = [1, 1]} : vector<2x256xf32> to vector<2x64xf32>
    %321 = arith.negf %320 : vector<2x64xf32>
    %322 = math.exp %321 : vector<2x64xf32>
    %cst_115 = arith.constant 1.000000e+00 : f32
    %323 = vector.broadcast %cst_115 : f32 to vector<2x64xf32>
    %324 = arith.addf %323, %322 : vector<2x64xf32>
    %325 = arith.divf %323, %324 : vector<2x64xf32>
    %326 = vector.extract_strided_slice %319 {offsets = [0, 128], sizes = [2, 64], strides = [1, 1]} : vector<2x256xf32> to vector<2x64xf32>
    %327 = math.tanh %326 : vector<2x64xf32>
    %328 = vector.extract_strided_slice %319 {offsets = [0, 192], sizes = [2, 64], strides = [1, 1]} : vector<2x256xf32> to vector<2x64xf32>
    %329 = arith.negf %328 : vector<2x64xf32>
    %330 = math.exp %329 : vector<2x64xf32>
    %cst_116 = arith.constant 1.000000e+00 : f32
    %331 = vector.broadcast %cst_116 : f32 to vector<2x64xf32>
    %332 = arith.addf %331, %330 : vector<2x64xf32>
    %333 = arith.divf %331, %332 : vector<2x64xf32>
    %334 = arith.mulf %325, %327 : vector<2x64xf32>
    %335 = math.tanh %334 : vector<2x64xf32>
    %336 = arith.mulf %333, %335 : vector<2x64xf32>
    %337 = arith.truncf %311 : vector<2x64xf32> to vector<2x64xbf16>
    %c0_117 = arith.constant 0 : index
    %c0_118 = arith.constant 0 : index
    %338 = vector.load %arg13[%c0_117, %c0_118] : memref<128x64xbf16, #tpu.memory_space<vmem>>, vector<64x64xbf16>
    %cst_119 = arith.constant dense<0.000000e+00> : vector<2x64xf32>
    %339 = tpu.matmul %337, %338, %cst_119 {dimension_numbers = #tpu.dot_dimension_numbers<[1], [0], [0], [1], [0, 0, 1, 1], [], []>} : vector<2x64xbf16>, vector<64x64xbf16>, vector<2x64xf32> -> vector<2x64xf32>
    %340 = arith.truncf %336 : vector<2x64xf32> to vector<2x64xbf16>
    %c64_120 = arith.constant 64 : index
    %c0_121 = arith.constant 0 : index
    %341 = vector.load %arg13[%c64_120, %c0_121] : memref<128x64xbf16, #tpu.memory_space<vmem>>, vector<64x64xbf16>
    %cst_122 = arith.constant dense<0.000000e+00> : vector<2x64xf32>
    %342 = tpu.matmul %340, %341, %cst_122 {dimension_numbers = #tpu.dot_dimension_numbers<[1], [0], [0], [1], [0, 0, 1, 1], [], []>} : vector<2x64xbf16>, vector<64x64xbf16>, vector<2x64xf32> -> vector<2x64xf32>
    %343 = arith.addf %339, %342 : vector<2x64xf32>
    %c0_123 = arith.constant 0 : index
    %c0_124 = arith.constant 0 : index
    %344 = vector.load %arg14[%c0_123, %c0_124] : memref<1x64xf32, #tpu.memory_space<vmem>>, vector<1x64xf32>
    %345 = vector.broadcast %344 : vector<1x64xf32> to vector<2x64xf32>
    %346 = arith.addf %343, %345 : vector<2x64xf32>
    %cst_125 = arith.constant 0.000000e+00 : f32
    %347 = vector.broadcast %cst_125 : f32 to vector<2x64xf32>
    %348 = arith.maximumf %346, %347 : vector<2x64xf32>
    %c0_126 = arith.constant 0 : index
    %c0_127 = arith.constant 0 : index
    %349 = vector.load %arg15[%c0_126, %c0_127] : memref<2x64xf32, #tpu.memory_space<vmem>>, vector<2x64xf32>
    tpu.vector_store %arg15[%c0_126, %c0_127], %348 {strides = array<i32>} : memref<2x64xf32, #tpu.memory_space<vmem>>, vector<2x64xf32>,
    return
  }
  func.func @transform_0(%arg0: i32) -> (i32, i32, i32) {
    %c0_i32 = arith.constant 0 : i32
    %c0_i32_0 = arith.constant 0 : i32
    %c0_i32_1 = arith.constant 0 : i32
    return %arg0, %c0_i32, %c0_i32_0 : i32, i32, i32
  }
  func.func @transform_1(%arg0: i32) -> (i32, i32) {
    %c0_i32 = arith.constant 0 : i32
    %c0_i32_0 = arith.constant 0 : i32
    %c0_i32_1 = arith.constant 0 : i32
    return %c0_i32, %c0_i32_0 : i32, i32
  }
  func.func @transform_2(%arg0: i32) -> (i32, i32) {
    %c0_i32 = arith.constant 0 : i32
    %c0_i32_0 = arith.constant 0 : i32
    %c0_i32_1 = arith.constant 0 : i32
    return %c0_i32, %c0_i32_0 : i32, i32
  }
  func.func @transform_3(%arg0: i32) -> (i32, i32) {
    %c0_i32 = arith.constant 0 : i32
    %c0_i32_0 = arith.constant 0 : i32
    %c0_i32_1 = arith.constant 0 : i32
    return %c0_i32, %c0_i32_0 : i32, i32
  }
  func.func @transform_4(%arg0: i32) -> (i32, i32) {
    %c0_i32 = arith.constant 0 : i32
    %c0_i32_0 = arith.constant 0 : i32
    %c0_i32_1 = arith.constant 0 : i32
    return %c0_i32, %c0_i32_0 : i32, i32
  }
  func.func @transform_5(%arg0: i32) -> (i32, i32) {
    %c0_i32 = arith.constant 0 : i32
    %c0_i32_0 = arith.constant 0 : i32
    %c0_i32_1 = arith.constant 0 : i32
    return %c0_i32, %c0_i32_0 : i32, i32
  }
  func.func @transform_6(%arg0: i32) -> (i32, i32) {
    %c0_i32 = arith.constant 0 : i32
    %c0_i32_0 = arith.constant 0 : i32
    %c0_i32_1 = arith.constant 0 : i32
    return %c0_i32, %c0_i32_0 : i32, i32
  }
  func.func @transform_7(%arg0: i32) -> (i32, i32) {
    %c0_i32 = arith.constant 0 : i32
    %c0_i32_0 = arith.constant 0 : i32
    %c0_i32_1 = arith.constant 0 : i32
    return %c0_i32, %c0_i32_0 : i32, i32
  }
  func.func @transform_8(%arg0: i32) -> (i32, i32) {
    %c0_i32 = arith.constant 0 : i32
    %c0_i32_0 = arith.constant 0 : i32
    %c0_i32_1 = arith.constant 0 : i32
    return %c0_i32, %c0_i32_0 : i32, i32
  }
  func.func @transform_9(%arg0: i32) -> (i32, i32) {
    %c0_i32 = arith.constant 0 : i32
    %c0_i32_0 = arith.constant 0 : i32
    %c0_i32_1 = arith.constant 0 : i32
    return %c0_i32, %c0_i32_0 : i32, i32
  }
  func.func @transform_10(%arg0: i32) -> (i32, i32) {
    %c0_i32 = arith.constant 0 : i32
    %c0_i32_0 = arith.constant 0 : i32
    %c0_i32_1 = arith.constant 0 : i32
    return %c0_i32, %c0_i32_0 : i32, i32
  }
  func.func @transform_11(%arg0: i32) -> (i32, i32) {
    %c0_i32 = arith.constant 0 : i32
    %c0_i32_0 = arith.constant 0 : i32
    %c0_i32_1 = arith.constant 0 : i32
    return %c0_i32, %c0_i32_0 : i32, i32
  }
  func.func @transform_12(%arg0: i32) -> (i32, i32) {
    %c0_i32 = arith.constant 0 : i32
    %c0_i32_0 = arith.constant 0 : i32
    %c0_i32_1 = arith.constant 0 : i32
    return %c0_i32, %c0_i32_0 : i32, i32
  }
  func.func @transform_13(%arg0: i32) -> (i32, i32) {
    %c0_i32 = arith.constant 0 : i32
    %c0_i32_0 = arith.constant 0 : i32
    %c0_i32_1 = arith.constant 0 : i32
    return %c0_i32, %c0_i32_0 : i32, i32
  }
  func.func @transform_14(%arg0: i32) -> (i32, i32) {
    %c0_i32 = arith.constant 0 : i32
    %c0_i32_0 = arith.constant 0 : i32
    return %arg0, %c0_i32 : i32, i32
  }
}

</mosaic_0001>

<bundles_post_ra>
// kernel: _lambda_.1
= control target key start
LH: loop header
LB: loop body
LE: loop exit
PB: predicated region body
PF: predicated region fallthrough
CT: control target
= control target key end

     0   :  { %19 = vsyncpa [#allocation8], 0  ;;  %s4294_s0 = inlined_call_operand.vmem [shape: f32[2,64,7], index: 0, kind: input, shape index: {}]   ;;  %s4295_s1 = inlined_call_operand.vmem [shape: bf16[7,32], index: 1, kind: input, shape index: {}]   ;;  %s4296_s2 = inlined_call_operand.vmem [shape: f32[1,32], index: 2, kind: input, shape index: {}]   ;;  %s4297_s3 = inlined_call_operand.hbm [shape: bf16[160,64], index: 3, kind: input, shape index: {}]   ;;  %s4298_s4 = inlined_call_operand.vmem [shape: f32[1,64], index: 4, kind: input, shape index: {}]   ;;  %s4299_s5 = inlined_call_operand.hbm [shape: bf16[192,128], index: 5, kind: input, shape index: {}]   ;;  %s4300_s6 = inlined_call_operand.vmem [shape: f32[1,128], index: 6, kind: input, shape index: {}]   ;;  %s4301_s7 = inlined_call_operand.hbm [shape: bf16[128,256], index: 7, kind: input, shape index: {}]   ;;  %s4302_s8 = inlined_call_operand.hbm [shape: bf16[64,256], index: 8, kind: input, shape index: {}]   ;;  %s4303_s9 = inlined_call_operand.vmem [shape: f32[1,256], index: 9, kind: input, shape index: {}]   ;;  %s4304_s10 = inlined_call_operand.vmem [shape: bf16[128,256], index: 10, kind: input, shape index: {}]   ;;  %s4305_s11 = inlined_call_operand.vmem [shape: f32[1,256], index: 11, kind: input, shape index: {}]   ;;  %s4306_s12 = inlined_call_operand.hbm [shape: bf16[128,64], index: 12, kind: input, shape index: {}]   ;;  %s4307_s13 = inlined_call_operand.vmem [shape: f32[1,64], index: 13, kind: input, shape index: {}]   ;;  %s4308_s14 = inlined_call_operand.hbm [shape: f32[2,64], index: 14, kind: output, shape index: {}]  }
   0x1   :  { %20 = vsyncpa [#allocation11], 0 }
   0x2   :  { %21 = vsyncpa [#allocation14], 0 }
   0x3   :  { %22 = vsyncpa [#allocation9], 0  ;;  %s48_s15 = sshll.u32 %s4299_s5, 4  ;;  %s3506_s16 = smov [#allocation10]   ;;  %s49_s15 = int_to_ptr.hbm [resolvable:$true] %s48_s15 }
   0x4   :  { %s50_s17 = sshll.u32 %s3506_s16, 4  ;;  %s3507_s18 = smov 64   ;;  %s51_s17 = int_to_ptr.vmem [resolvable:$true] %s50_s17 }
   0x5   :  { %s3508_s19 = smov 4   ;;  %s76_s22 = sshll.u32 %s4302_s8, 4  ;;  %s77_s22 = int_to_ptr.hbm [resolvable:$true] %s76_s22 }
   0x6   :  { %56 = dma.hbm_to_vmem [thread:$0]  %s49_s15, 1536, %s51_s17, [#allocation11], %s3507_s18, %s3507_s18, %s3508_s19  }
   0x7   :  { %s3509_s23 = smov [#allocation13]   ;;  %s33_s5 = sshll.u32 %s4297_s3, 4  ;;  %s34_s5 = int_to_ptr.hbm [resolvable:$true] %s33_s5 }
   0x8   :  { %s78_s24 = sshll.u32 %s3509_s23, 4  ;;  %s3510_s27 = smov 128   ;;  %s79_s24 = int_to_ptr.vmem [resolvable:$true] %s78_s24 }
   0x9   :  { %s3511_s28 = smov 8   ;;  %s63_s15 = sshll.u32 %s4301_s7, 4  ;;  %s64_s15 = int_to_ptr.hbm [resolvable:$true] %s63_s15 }
   0xa   :  { %84 = dma.hbm_to_vmem [thread:$0]  %s77_s22, 1024, %s79_s24, [#allocation14], %s3510_s27, %s3510_s27, %s3511_s28  }
   0xb   :  { %s3512_s16 = smov [#allocation7]   ;;  %s3513_s8 = smov [#allocation12]  }
   0xc   :  { %s35_s17 = sshll.u32 %s3512_s16, 4  ;;  %s65_s20 = sshll.u32 %s3513_s8, 4  ;;  %s36_s17 = int_to_ptr.vmem [resolvable:$true] %s35_s17  ;;  %s66_s20 = int_to_ptr.vmem [resolvable:$true] %s65_s20 }
   0xd   :  { %41 = dma.hbm_to_vmem [thread:$0]  %s34_s5, 1280, %s36_s17, [#allocation8], %s3507_s18, %s3507_s18, %s3508_s19  }
   0xe   :  { %s95_s23 = sshll.u32 %s4306_s12, 4  ;;  %s3514_s22 = smov [#allocation15]   ;;  %s96_s23 = int_to_ptr.hbm [resolvable:$true] %s95_s23 }
   0xf   :  { %71 = dma.hbm_to_vmem [thread:$0]  %s64_s15, 2048, %s66_s20, [#allocation11], %s3510_s27, %s3510_s27, %s3511_s28  }
  0x10   :  { %s97_s24 = sshll.u32 %s3514_s22, 4  ;;  %s98_s24 = int_to_ptr.vmem [resolvable:$true] %s97_s24 }
  0x11   :  { %103 = dma.hbm_to_vmem [thread:$0]  %s96_s23, 1024, %s98_s24, [#allocation14], %s3507_s18, %s3507_s18, %s3508_s19  }
  0x12   :  { %3498 = dma.done.wait [#allocation8], 1280  }
  0x13   :  { %3499 = vsyncadd [#allocation8], 4294966016 }
  0x14   :  { %3500 = dma.done.wait [#allocation11], 3584  }
  0x15   :  { %3501 = vsyncadd [#allocation11], 4294963712 }
  0x16   :  { %3502 = dma.done.wait [#allocation14], 2048  }
  0x17   :  { %3503 = vsyncadd [#allocation14], 4294965248  ;;  %vm181_vm0 = vcmask 1042432   ;;  %vm182_vm1 = vcmask 1043456   ;;  %v3515_v0 = vmov 65535   ;;  %v127_v4 = vld [vmem:[%s4294_s0] sm:$0xff] }
  0x18   :  { %v183_v1 = vsel %vm181_vm0, 4294967295, %v3515_v0  ;;  %v151_v3 = vld [vmem:[%s4295_s1] sm:$0xf]  ;;  %v128_v5 = vld [vmem:[%s4294_s0 + $0x8] sm:$0xff]  ;;  %vm156_vm2 = vcmask 56320   ;;  %v129_v8 = vld [vmem:[%s4294_s0 + $0x10] sm:$0xff] }
  0x19   :  { %v184_v2 = vsel %vm182_vm1, %v183_v1, 0  ;;  %v143_v7 = vpack.c.bf16 %v128_v5, %v127_v4  ;;  %v130_v9 = vld [vmem:[%s4294_s0 + $0x18] sm:$0xff]  ;;  %v131_v11 = vld [vmem:[%s4294_s0 + $0x20] sm:$0xff]  ;;  %v132_v12 = vld [vmem:[%s4294_s0 + $0x28] sm:$0xff]  ;;  %vm253_vm3 = vcmask 261120   ;;  %v3516_v29 = vmov 0.0  }
  0x1a   :  { %v186_v6 = vand.u32 %v184_v2, %v151_v3  ;;  %v144_v10 = vpack.c.bf16 %v130_v9, %v129_v8  ;;  %v145_v13 = vpack.c.bf16 %v132_v12, %v131_v11  ;;  %v133_v14 = vld [vmem:[%s4294_s0 + $0x30] sm:$0xff]  ;;  %v134_v15 = vld [vmem:[%s4294_s0 + $0x38] sm:$0xff]  ;;  %v135_v17 = vld [vmem:[%s4294_s0 + $0x40] sm:$0xff]  ;;  %310 = vst.msk [vmem:[#allocation3 + $0x8] sm:$0xff] %vm253_vm3, %v3516_v29  ;;  %vm356_vm4 = vcmask 261122   ;;  %s2703_s8 = sshll.u32 %s4308_s14, 4  ;;  %s2704_s8 = int_to_ptr.hbm [resolvable:$true] %s2703_s8 }
  0x1b   :  { %v146_v16 = vpack.c.bf16 %v134_v15, %v133_v14  ;;  %v136_v18 = vld [vmem:[%s4294_s0 + $0x48] sm:$0xff]  ;;  %v137_v20 = vld [vmem:[%s4294_s0 + $0x50] sm:$0xff]  ;;  %v138_v21 = vld [vmem:[%s4294_s0 + $0x58] sm:$0xff]  ;;  %309 = vst [vmem:[#allocation3] sm:$0xff] %v3516_v29  ;;  %vm496_vm5 = vcmask 1045504   ;;  %vm447_vm6 = vcmask 1046528  }
  0x1c   :  { %195 = vmatpush.bf16.msra.mxu0 %v186_v6  ;;  %v147_v19 = vpack.c.bf16 %v136_v18, %v135_v17  ;;  %v148_v22 = vpack.c.bf16 %v138_v21, %v137_v20  ;;  %v139_v23 = vld [vmem:[%s4294_s0 + $0x60] sm:$0xff]  ;;  %v140_v24 = vld [vmem:[%s4294_s0 + $0x68] sm:$0xff]  ;;  %v141_v26 = vld [vmem:[%s4294_s0 + $0x70] sm:$0xff]  ;;  %311 = vst [vmem:[#allocation3 + $0x10] sm:$0xff] %v3516_v29  ;;  %vm365_vm7 = vcmask 1040384   ;;  %vm333_vm8 = vcmask 1041408  }
  0x1d   :  { %v149_v25 = vpack.c.bf16 %v140_v24, %v139_v23  ;;  %v142_v27 = vld [vmem:[%s4294_s0 + $0x78] sm:$0xff]  ;;  %312 = vst.msk [vmem:[#allocation3 + $0x18] sm:$0xff] %vm253_vm3, %v3516_v29  ;;  %v3689_v30 = vld [vmem:[%s4296_s2] ss:$0 sm:$0xff]  ;;  %s3517_s0 = smov 32   ;;  %v3070_v48 = vld [vmem:[#allocation7 + $0x48] sm:$0xff] }
  0x1e   :  { %v150_v28 = vpack.c.bf16 %v142_v27, %v141_v26  ;;  %313 = vst [vmem:[#allocation3 + $0x20] sm:$0xff] %v3516_v29  ;;  %683 = vmatpush.bf16.msra.mxu2 %v3070_v48  ;;  %v3069_v49 = vld [vmem:[#allocation7 + $0x40] sm:$0xff]  ;;  %s3518_s2 = smov 96   ;;  %vm522_vm9 = vcmask 259072   ;;  %vm404_vm10 = vcmask 523521   ;;  %vm438_vm11 = vcmask 785920  }
  0x1f   :  { %2715 = vmatmul.msk.bf16.vlgmr.msra.gmra.mxu0 %vm156_vm2, %v143_v7  ;;  %314 = vst.msk [vmem:[#allocation3 + $0x28] sm:$0xff] %vm253_vm3, %v3516_v29  ;;  %vm486_vm12 = vcmask 1048320   ;;  %vm406_vm13 = vcmask 523520   ;;  %vm490_vm14 = vcmask 1047296   ;;  %vm714_vm15 = vcmask 523264  }
  0x20   :  { %315 = vst [vmem:[#allocation3 + $0x30] sm:$0xff] %v3516_v29  ;;  %vm764_vm0 = vcmask 523265   ;;  %vm797_vm1 = vcmask 522240  }
  0x21   :  { %316 = vst.msk [vmem:[#allocation3 + $0x38] sm:$0xff] %vm253_vm3, %v3516_v29 }
  0x22   :  { %317 = vst [vmem:[#allocation3 + $0x40] sm:$0xff] %v3516_v29  ;;  %684 = vmatpush.bf16.msra.mxu2 %v3069_v49 }
  0x23   :  { %318 = vst.msk [vmem:[#allocation3 + $0x48] sm:$0xff] %vm253_vm3, %v3516_v29 }
  0x24   :  { %319 = vst [vmem:[#allocation3 + $0x50] sm:$0xff] %v3516_v29 }
  0x25   :  { %320 = vst.msk [vmem:[#allocation3 + $0x58] sm:$0xff] %vm253_vm3, %v3516_v29 }
  0x26   :  { %321 = vst [vmem:[#allocation3 + $0x60] sm:$0xff] %v3516_v29 }
  0x27   :  { %322 = vst.msk [vmem:[#allocation3 + $0x68] sm:$0xff] %vm253_vm3, %v3516_v29 }
  0x28   :  { %323 = vst [vmem:[#allocation3 + $0x70] sm:$0xff] %v3516_v29 }
  0x29   :  { %324 = vst.msk [vmem:[#allocation3 + $0x78] sm:$0xff] %vm253_vm3, %v3516_v29 }
  0x2a   :  { %742 = vst [vmem:[#allocation5] sm:$0xff] %v3516_v29 }
  0x2b   :  { %744 = vst [vmem:[#allocation5 + $0x10] sm:$0xff] %v3516_v29 }
  0x2c   :  { %746 = vst [vmem:[#allocation5 + $0x20] sm:$0xff] %v3516_v29 }
  0x2d   :  { %748 = vst [vmem:[#allocation5 + $0x30] sm:$0xff] %v3516_v29 }
  0x2e   :  { %743 = vst.msk [vmem:[#allocation5 + $0x8] sm:$0xff] %vm714_vm15, %v3516_v29 }
  0x2f   :  { %2716 = vmatmul.msk.bf16.gmra.mxu0 %vm156_vm2, %v144_v10  ;;  %745 = vst.msk [vmem:[#allocation5 + $0x18] sm:$0xff] %vm714_vm15, %v3516_v29 }
  0x30   :  { %747 = vst.msk [vmem:[#allocation5 + $0x28] sm:$0xff] %vm714_vm15, %v3516_v29 }
  0x31   :  { %749 = vst.msk [vmem:[#allocation5 + $0x38] sm:$0xff] %vm714_vm15, %v3516_v29 }
  0x3f   :  { %2717 = vmatmul.msk.bf16.gmra.mxu0 %vm156_vm2, %v145_v13 }
  0x4f   :  { %2718 = vmatmul.msk.bf16.gmra.mxu0 %vm156_vm2, %v146_v16 }
  0x5f   :  { %2719 = vmatmul.msk.bf16.gmra.mxu0 %vm156_vm2, %v147_v19 }
  0x6f   :  { %2720 = vmatmul.msk.bf16.gmra.mxu0 %vm156_vm2, %v148_v22 }
  0x7f   :  { %2721 = vmatmul.msk.bf16.gmra.mxu0 %vm156_vm2, %v149_v25 }
  0x8f   :  { %2722 = vmatmul.msk.bf16.gmra.mxu0 %vm156_vm2, %v150_v28  ;;  %vm781_vm2 = vcmask 1048064  }
  0x9c   :  { %v197_v31 = vpop.f32.mrf.mxu0 }
  0x9d   :  { %v198_v32 = vadd.f32 %v3689_v30, %v197_v31 }
  0x9f   :  { %v237_v33 = vmax.f32 %v198_v32, 0.0 }
  0xa1   :  { %254 = vst.msk [vmem:[#allocation2] sm:$0xff] %vm253_vm3, %v237_v33 }
  0xa4   :  { %v199_v34 = vpop.f32.mrf.mxu0 }
  0xa5   :  { %v200_v35 = vadd.f32 %v3689_v30, %v199_v34 }
  0xa7   :  { %v238_v36 = vmax.f32 %v200_v35, 0.0 }
  0xa9   :  { %255 = vst.msk [vmem:[#allocation2 + $0x8] sm:$0xff] %vm253_vm3, %v238_v36 }
  0xac   :  { %v202_v37 = vpop.f32.mrf.mxu0 }
  0xad   :  { %v203_v38 = vadd.f32 %v3689_v30, %v202_v37 }
  0xaf   :  { %v239_v39 = vmax.f32 %v203_v38, 0.0 }
  0xb0   :  { %v270_v40 = vld [vmem:[#allocation2] ss:$2 sm:$0xff]  ;;  %v286_v41 = vld [vmem:[#allocation2 + $0x1] ss:$2 sm:$0xff] }
  0xb1   :  { %256 = vst.msk [vmem:[#allocation2 + $0x10] sm:$0xff] %vm253_vm3, %v239_v39  ;;  %v301_v42 = vmax.f32 %v270_v40, %v286_v41 }
  0xb3   :  { %414 = vrot.lane.b32.xlu1 %v301_v42, %s3507_s18  ;;  %v366_v43 = vrot.slane %v301_v42, 7  ;;  %v334_v44 = vrot.slane %v301_v42, 6  ;;  %v497_v56 = vrot.slane %v301_v42, 2  ;;  %v448_v57 = vrot.slane %v301_v42, 1 }
  0xb4   :  { %v204_v45 = vpop.f32.mrf.mxu0 }
  0xb5   :  { %v205_v46 = vadd.f32 %v3689_v30, %v204_v45  ;;  %380 = vrot.lane.b32.xlu0 %v366_v43, %s3517_s0  ;;  %357 = vst.msk [vmem:[#allocation3] sm:$0xfc] %vm356_vm4, %v334_v44 }
  0xb7   :  { %v240_v47 = vmax.f32 %v205_v46, 0.0 }
  0xb9   :  { %257 = vst.msk [vmem:[#allocation2 + $0x18] sm:$0xff] %vm253_vm3, %v240_v47 }
  0xbc   :  { %v207_v50 = vpop.f32.mrf.mxu0 }
  0xbd   :  { %v208_v51 = vadd.f32 %v3689_v30, %v207_v50 }
  0xbf   :  { %v241_v52 = vmax.f32 %v208_v51, 0.0 }
  0xc0   :  { %v272_v53 = vld [vmem:[#allocation2 + $0x10] ss:$2 sm:$0xff]  ;;  %v288_v54 = vld [vmem:[#allocation2 + $0x11] ss:$2 sm:$0xff] }
  0xc1   :  { %258 = vst.msk [vmem:[#allocation2 + $0x20] sm:$0xff] %vm253_vm3, %v241_v52  ;;  %v302_v55 = vmax.f32 %v272_v53, %v288_v54 }
  0xc3   :  { %v498_v58 = vrot.slane %v302_v55, 2  ;;  %416 = vrot.lane.b32.xlu1 %v302_v55, %s3507_s18  ;;  %v449_v59 = vrot.slane %v302_v55, 1  ;;  %v367_v60 = vrot.slane %v302_v55, 7  ;;  %v335_v61 = vrot.slane %v302_v55, 6 }
  0xc4   :  { %v209_v62 = vpop.f32.mrf.mxu0 }
  0xc5   :  { %v499_v63 = vsel %vm496_vm5, %v497_v56, %v498_v58  ;;  %v210_v0 = vadd.f32 %v3689_v30, %v209_v62  ;;  %v450_v1 = vsel %vm447_vm6, %v448_v57, %v449_v59  ;;  %v368_v2 = vsel %vm365_vm7, %v366_v43, %v367_v60 }
  0xc6   :  { %519 = vst.msk [vmem:[#allocation3 + $0x8] sm:$0xff] %vm253_vm3, %v499_v63  ;;  %462 = vrot.lane.b32.xlu2 %v450_v1, %s3518_s2  ;;  %382 = vrot.lane.b32.xlu0 %v368_v2, %s3517_s0  ;;  %v336_v3 = vsel %vm333_vm8, %v334_v44, %v335_v61 }
  0xc7   :  { %v242_v4 = vmax.f32 %v210_v0, 0.0  ;;  %358 = vst.msk [vmem:[#allocation3 + $0x10] sm:$0xff] %vm253_vm3, %v336_v3 }
  0xc9   :  { %259 = vst.msk [vmem:[#allocation2 + $0x28] sm:$0xff] %vm253_vm3, %v242_v4 }
  0xcc   :  { %v212_v5 = vpop.f32.mrf.mxu0 }
  0xcd   :  { %v213_v6 = vadd.f32 %v3689_v30, %v212_v5  ;;  %v529_v24 = vld [vmem:[#allocation3 + $0x8] sm:$0xff]  ;;  %v3068_v5 = vld [vmem:[#allocation7 + $0x38] sm:$0xff] }
  0xce   :  { %648 = vmatpush.bf16.msra.mxu1 %v3068_v5 }
  0xcf   :  { %v243_v7 = vmax.f32 %v213_v6, 0.0 }
  0xd0   :  { %v274_v8 = vld [vmem:[#allocation2 + $0x20] ss:$2 sm:$0xff]  ;;  %v290_v9 = vld [vmem:[#allocation2 + $0x21] ss:$2 sm:$0xff] }
  0xd1   :  { %260 = vst.msk [vmem:[#allocation2 + $0x30] sm:$0xff] %vm253_vm3, %v243_v7  ;;  %v303_v10 = vmax.f32 %v274_v8, %v290_v9 }
  0xd3   :  { %v451_v11 = vrot.slane %v303_v10, 1  ;;  %v500_v12 = vrot.slane %v303_v10, 2  ;;  %v369_v13 = vrot.slane %v303_v10, 7  ;;  %v337_v14 = vrot.slane %v303_v10, 6 }
  0xd4   :  { %v214_v15 = vpop.f32.mrf.mxu0 }
  0xd5   :  { %v215_v16 = vadd.f32 %v3689_v30, %v214_v15  ;;  %v452_v17 = vsel %vm447_vm6, %v449_v59, %v451_v11  ;;  %v501_v18 = vsel %vm496_vm5, %v498_v58, %v500_v12  ;;  %v370_v19 = vsel %vm365_vm7, %v367_v60, %v369_v13 }
  0xd6   :  { %464 = vrot.lane.b32.xlu2 %v452_v17, %s3518_s2  ;;  %520 = vst.msk [vmem:[#allocation3 + $0x18] sm:$0xff] %vm253_vm3, %v501_v18  ;;  %384 = vrot.lane.b32.xlu0 %v370_v19, %s3517_s0  ;;  %v338_v20 = vsel %vm333_vm8, %v335_v61, %v337_v14 }
  0xd7   :  { %v244_v21 = vmax.f32 %v215_v16, 0.0  ;;  %359 = vst.msk [vmem:[#allocation3 + $0x20] sm:$0xff] %vm253_vm3, %v338_v20 }
  0xd9   :  { %261 = vst.msk [vmem:[#allocation2 + $0x38] sm:$0xff] %vm253_vm3, %v244_v21  ;;  %v3065_v21 = vld [vmem:[#allocation7 + $0x20] sm:$0xff] }
  0xdc   :  { %v217_v22 = vpop.f32.mrf.mxu0 }
  0xdd   :  { %v218_v23 = vadd.f32 %v3689_v30, %v217_v22  ;;  %v531_v25 = vld [vmem:[#allocation3 + $0x18] sm:$0xff] }
  0xde   :  { %418 = vrot.lane.b32.xlu2 %v303_v10, %s3507_s18  ;;  %v545_v26 = vpack.c.bf16 %v531_v25, %v529_v24 }
  0xdf   :  { %v245_v27 = vmax.f32 %v218_v23, 0.0 }
  0xe0   :  { %2763 = vmatmul.msk.bf16.vlgmr.msra.gmra.mxu2 %vm253_vm3, %v545_v26  ;;  %v276_v28 = vld [vmem:[#allocation2 + $0x30] ss:$2 sm:$0xff]  ;;  %v292_v31 = vld [vmem:[#allocation2 + $0x31] ss:$2 sm:$0xff] }
  0xe1   :  { %262 = vst.msk [vmem:[#allocation2 + $0x40] sm:$0xff] %vm253_vm3, %v245_v27  ;;  %v304_v32 = vmax.f32 %v276_v28, %v292_v31  ;;  %v3064_v28 = vld [vmem:[#allocation7 + $0x18] sm:$0xff] }
  0xe3   :  { %v502_v33 = vrot.slane %v304_v32, 2  ;;  %420 = vrot.lane.b32.xlu0 %v304_v32, %s3507_s18  ;;  %v371_v34 = vrot.slane %v304_v32, 7  ;;  %v453_v35 = vrot.slane %v304_v32, 1  ;;  %v339_v36 = vrot.slane %v304_v32, 6 }
  0xe4   :  { %v219_v37 = vpop.f32.mrf.mxu0 }
  0xe5   :  { %v503_v38 = vsel %vm496_vm5, %v500_v12, %v502_v33  ;;  %523 = vst.msk [vmem:[#allocation3 + $0x38] sm:$0x3f] %vm522_vm9, %v502_v33  ;;  %v220_v39 = vadd.f32 %v3689_v30, %v219_v37  ;;  %v372_v40 = vsel %vm365_vm7, %v369_v13, %v371_v34  ;;  %v340_v41 = vsel %vm333_vm8, %v337_v14, %v339_v36  ;;  %v3066_v13 = vld [vmem:[#allocation7 + $0x28] sm:$0xff] }
  0xe6   :  { %521 = vst.msk [vmem:[#allocation3 + $0x28] sm:$0xff] %vm253_vm3, %v503_v38  ;;  %386 = vrot.lane.b32.xlu1 %v372_v40, %s3517_s0  ;;  %468 = vrot.lane.b32.xlu2 %v453_v35, %s3518_s2  ;;  %v454_v46 = vsel %vm447_vm6, %v451_v11, %v453_v35  ;;  %v3067_v11 = vld [vmem:[#allocation7 + $0x30] sm:$0xff]  ;;  %v3062_v37 = vld [vmem:[#allocation7 + $0x8] sm:$0xff] }
  0xe7   :  { %v246_v42 = vmax.f32 %v220_v39, 0.0  ;;  %360 = vst.msk [vmem:[#allocation3 + $0x30] sm:$0xff] %vm253_vm3, %v340_v41  ;;  %649 = vmatpush.bf16.msra.mxu1 %v3067_v11 }
  0xe9   :  { %263 = vst.msk [vmem:[#allocation2 + $0x48] sm:$0xff] %vm253_vm3, %v246_v42 }
  0xeb   :  { %650 = vmatpush.bf16.msra.mxu1 %v3066_v13 }
  0xec   :  { %v222_v43 = vpop.f32.mrf.mxu0  ;;  %v535_v44 = vld [vmem:[#allocation3 + $0x38] sm:$0xff] }
  0xed   :  { %v223_v45 = vadd.f32 %v3689_v30, %v222_v43  ;;  %v533_v47 = vld [vmem:[#allocation3 + $0x28] sm:$0xff]  ;;  %v3061_v43 = vld [vmem:[#allocation7] sm:$0xff] }
  0xee   :  { %466 = vrot.lane.b32.xlu1 %v454_v46, %s3518_s2  ;;  %v547_v48 = vpack.c.bf16 %v535_v44, %v533_v47 }
  0xef   :  { %v247_v49 = vmax.f32 %v223_v45, 0.0  ;;  %651 = vmatpush.bf16.msra.mxu1 %v3065_v21 }
  0xf0   :  { %2764 = vmatmul.msk.bf16.gmra.mxu2 %vm253_vm3, %v547_v48  ;;  %v278_v50 = vld [vmem:[#allocation2 + $0x40] ss:$2 sm:$0xff]  ;;  %v294_v51 = vld [vmem:[#allocation2 + $0x41] ss:$2 sm:$0xff] }
  0xf1   :  { %264 = vst.msk [vmem:[#allocation2 + $0x50] sm:$0xff] %vm253_vm3, %v247_v49  ;;  %v305_v52 = vmax.f32 %v278_v50, %v294_v51 }
  0xf3   :  { %422 = vrot.lane.b32.xlu2 %v305_v52, %s3507_s18  ;;  %v373_v53 = vrot.slane %v305_v52, 7  ;;  %v341_v54 = vrot.slane %v305_v52, 6  ;;  %v504_v0 = vrot.slane %v305_v52, 2  ;;  %v455_v14 = vrot.slane %v305_v52, 1  ;;  %652 = vmatpush.bf16.msra.mxu1 %v3064_v28  ;;  %v3847_v28 = vld [vmem:[%s4298_s4] ss:$0 sm:$0xff] }
  0xf4   :  { %v224_v55 = vpop.f32.mrf.mxu0 }
  0xf5   :  { %v225_v56 = vadd.f32 %v3689_v30, %v224_v55  ;;  %388 = vrot.lane.b32.xlu0 %v373_v53, %s3517_s0  ;;  %361 = vst.msk [vmem:[#allocation3 + $0x40] sm:$0xfc] %vm356_vm4, %v341_v54 }
  0xf7   :  { %v248_v57 = vmax.f32 %v225_v56, 0.0 }
  0xf9   :  { %265 = vst.msk [vmem:[#allocation2 + $0x58] sm:$0xff] %vm253_vm3, %v248_v57 }
  0xfc   :  { %v227_v58 = vpop.f32.mrf.mxu0 }
  0xfd   :  { %v228_v59 = vadd.f32 %v3689_v30, %v227_v58 }
  0xff   :  { %v249_v60 = vmax.f32 %v228_v59, 0.0 }
 0x100   :  { %v280_v61 = vld [vmem:[#allocation2 + $0x50] ss:$2 sm:$0xff]  ;;  %v296_v62 = vld [vmem:[#allocation2 + $0x51] ss:$2 sm:$0xff] }
 0x101   :  { %266 = vst.msk [vmem:[#allocation2 + $0x60] sm:$0xff] %vm253_vm3, %v249_v60  ;;  %v306_v63 = vmax.f32 %v280_v61, %v296_v62 }
 0x103   :  { %v505_v1 = vrot.slane %v306_v63, 2  ;;  %424 = vrot.lane.b32.xlu0 %v306_v63, %s3507_s18  ;;  %v374_v2 = vrot.slane %v306_v63, 7  ;;  %v342_v3 = vrot.slane %v306_v63, 6  ;;  %v456_v12 = vrot.slane %v306_v63, 1 }
 0x104   :  { %v229_v4 = vpop.f32.mrf.mxu0 }
 0x105   :  { %v506_v6 = vsel %vm496_vm5, %v504_v0, %v505_v1  ;;  %v230_v7 = vadd.f32 %v3689_v30, %v229_v4  ;;  %v375_v8 = vsel %vm365_vm7, %v373_v53, %v374_v2  ;;  %v343_v9 = vsel %vm333_vm8, %v341_v54, %v342_v3 }
 0x106   :  { %524 = vst.msk [vmem:[#allocation3 + $0x48] sm:$0xff] %vm253_vm3, %v506_v6  ;;  %390 = vrot.lane.b32.xlu1 %v375_v8, %s3517_s0  ;;  %v457_v17 = vsel %vm447_vm6, %v455_v14, %v456_v12 }
 0x107   :  { %v250_v10 = vmax.f32 %v230_v7, 0.0  ;;  %362 = vst.msk [vmem:[#allocation3 + $0x50] sm:$0xff] %vm253_vm3, %v343_v9 }
 0x109   :  { %267 = vst.msk [vmem:[#allocation2 + $0x68] sm:$0xff] %vm253_vm3, %v250_v10 }
 0x10c   :  { %v232_v15 = vpop.f32.mrf.mxu0 }
 0x10d   :  { %v233_v16 = vadd.f32 %v3689_v30, %v232_v15  ;;  %v537_v38 = vld [vmem:[#allocation3 + $0x48] sm:$0xff] }
 0x10e   :  { %470 = vrot.lane.b32.xlu1 %v457_v17, %s3518_s2 }
 0x10f   :  { %v251_v18 = vmax.f32 %v233_v16, 0.0 }
 0x110   :  { %v282_v19 = vld [vmem:[#allocation2 + $0x60] ss:$2 sm:$0xff]  ;;  %v298_v20 = vld [vmem:[#allocation2 + $0x61] ss:$2 sm:$0xff] }
 0x111   :  { %268 = vst.msk [vmem:[#allocation2 + $0x70] sm:$0xff] %vm253_vm3, %v251_v18  ;;  %v307_v22 = vmax.f32 %v282_v19, %v298_v20 }
 0x113   :  { %v458_v23 = vrot.slane %v307_v22, 1  ;;  %v507_v24 = vrot.slane %v307_v22, 2  ;;  %v376_v25 = vrot.slane %v307_v22, 7  ;;  %v344_v26 = vrot.slane %v307_v22, 6 }
 0x114   :  { %v234_v27 = vpop.f32.mrf.mxu0 }
 0x115   :  { %v235_v31 = vadd.f32 %v3689_v30, %v234_v27  ;;  %v459_v32 = vsel %vm447_vm6, %v456_v12, %v458_v23  ;;  %v508_v33 = vsel %vm496_vm5, %v505_v1, %v507_v24  ;;  %v377_v34 = vsel %vm365_vm7, %v374_v2, %v376_v25  ;;  %v3063_v30 = vld [vmem:[#allocation7 + $0x10] sm:$0xff] }
 0x116   :  { %472 = vrot.lane.b32.xlu2 %v459_v32, %s3518_s2  ;;  %525 = vst.msk [vmem:[#allocation3 + $0x58] sm:$0xff] %vm253_vm3, %v508_v33  ;;  %392 = vrot.lane.b32.xlu0 %v377_v34, %s3517_s0  ;;  %v345_v35 = vsel %vm333_vm8, %v342_v3, %v344_v26 }
 0x117   :  { %v252_v36 = vmax.f32 %v235_v31, 0.0  ;;  %363 = vst.msk [vmem:[#allocation3 + $0x60] sm:$0xff] %vm253_vm3, %v345_v35  ;;  %653 = vmatpush.bf16.msra.mxu1 %v3063_v30 }
 0x119   :  { %269 = vst.msk [vmem:[#allocation2 + $0x78] sm:$0xff] %vm253_vm3, %v252_v36 }
 0x11b   :  { %654 = vmatpush.bf16.msra.mxu1 %v3062_v37 }
 0x11d   :  { %v539_v39 = vld [vmem:[#allocation3 + $0x58] sm:$0xff] }
 0x11e   :  { %426 = vrot.lane.b32.xlu2 %v307_v22, %s3507_s18  ;;  %v549_v40 = vpack.c.bf16 %v539_v39, %v537_v38 }
 0x11f   :  { %655 = vmatpush.bf16.msra.mxu1 %v3061_v43 }
 0x120   :  { %2765 = vmatmul.msk.bf16.gmra.mxu2 %vm253_vm3, %v549_v40  ;;  %v284_v41 = vld [vmem:[#allocation2 + $0x70] ss:$2 sm:$0xff]  ;;  %v300_v42 = vld [vmem:[#allocation2 + $0x71] ss:$2 sm:$0xff]  ;;  %v463_v54 = vpop.permute.xlu2 %462 }
 0x121   :  { %v308_v44 = vmax.f32 %v284_v41, %v300_v42 }
 0x123   :  { %v509_v45 = vrot.slane %v308_v44, 2  ;;  %428 = vrot.lane.b32.xlu0 %v308_v44, %s3507_s18  ;;  %v378_v46 = vrot.slane %v308_v44, 7  ;;  %v460_v47 = vrot.slane %v308_v44, 1  ;;  %v346_v48 = vrot.slane %v308_v44, 6 }
 0x125   :  { %v510_v49 = vsel %vm496_vm5, %v507_v24, %v509_v45  ;;  %527 = vst.msk [vmem:[#allocation3 + $0x78] sm:$0x3f] %vm522_vm9, %v509_v45  ;;  %v379_v50 = vsel %vm365_vm7, %v376_v25, %v378_v46  ;;  %v347_v51 = vsel %vm333_vm8, %v344_v26, %v346_v48  ;;  %v415_v53 = vpop.permute.xlu1 %414  ;;  %v461_v56 = vsel %vm447_vm6, %v458_v23, %v460_v47 }
 0x126   :  { %526 = vst.msk [vmem:[#allocation3 + $0x68] sm:$0xff] %vm253_vm3, %v510_v49  ;;  %394 = vrot.lane.b32.xlu1 %v379_v50, %s3517_s0  ;;  %476 = vrot.lane.b32.xlu2 %v460_v47, %s3518_s2 }
 0x127   :  { %v381_v52 = vpop.permute.xlu0 %380  ;;  %364 = vst.msk [vmem:[#allocation3 + $0x70] sm:$0xff] %vm253_vm3, %v347_v51 }
 0x128   :  { %405 = vst.msk [vmem:[#allocation3] sm:$0xfe] %vm404_vm10, %v381_v52 }
 0x129   :  { %439 = vst.msk [vmem:[#allocation3] sm:$0xff] %vm438_vm11, %v415_v53 }
 0x12a   :  { %487 = vst.msk [vmem:[#allocation3] sm:$0xff] %vm486_vm12, %v463_v54 }
 0x12c   :  { %v543_v55 = vld [vmem:[#allocation3 + $0x78] sm:$0xff] }
 0x12d   :  { %v541_v57 = vld [vmem:[#allocation3 + $0x68] sm:$0xff] }
 0x12e   :  { %474 = vrot.lane.b32.xlu1 %v461_v56, %s3518_s2  ;;  %v551_v58 = vpack.c.bf16 %v543_v55, %v541_v57 }
 0x130   :  { %2766 = vmatmul.msk.bf16.gmra.mxu2 %vm253_vm3, %v551_v58  ;;  %v465_v61 = vpop.permute.xlu2 %464  ;;  %vm1304_vm3 = vcmask 1041409  }
 0x131   :  { %v528_v62 = vld [vmem:[#allocation3] sm:$0xff] }
 0x135   :  { %v417_v60 = vpop.permute.xlu1 %416 }
 0x138   :  { %v383_v59 = vpop.permute.xlu0 %382  ;;  %v419_v2 = vpop.permute.xlu2 %418 }
 0x139   :  { %407 = vst.msk [vmem:[#allocation3 + $0x10] sm:$0xff] %vm406_vm13, %v383_v59 }
 0x13a   :  { %440 = vst.msk [vmem:[#allocation3 + $0x10] sm:$0xff] %vm438_vm11, %v417_v60 }
 0x13b   :  { %488 = vst.msk [vmem:[#allocation3 + $0x10] sm:$0xff] %vm486_vm12, %v465_v61 }
 0x140   :  { %v469_v5 = vpop.permute.xlu2 %468 }
 0x142   :  { %v530_v63 = vld [vmem:[#allocation3 + $0x10] sm:$0xff] }
 0x143   :  { %v544_v0 = vpack.c.bf16 %v530_v63, %v528_v62 }
 0x145   :  { %656 = vmatmul.bf16.vlgmr.msra.gmra.mxu1 %v544_v0 }
 0x148   :  { %v385_v1 = vpop.permute.xlu0 %384 }
 0x149   :  { %408 = vst.msk [vmem:[#allocation3 + $0x20] sm:$0xff] %vm406_vm13, %v385_v1 }
 0x14a   :  { %441 = vst.msk [vmem:[#allocation3 + $0x20] sm:$0xff] %vm438_vm11, %v419_v2 }
 0x14d   :  { %v423_v8 = vpop.permute.xlu2 %422 }
 0x155   :  { %v421_v4 = vpop.permute.xlu0 %420 }
 0x158   :  { %v387_v3 = vpop.permute.xlu1 %386 }
 0x159   :  { %409 = vst.msk [vmem:[#allocation3 + $0x30] sm:$0xff] %vm406_vm13, %v387_v3 }
 0x15a   :  { %442 = vst.msk [vmem:[#allocation3 + $0x30] sm:$0xff] %vm438_vm11, %v421_v4 }
 0x15b   :  { %491 = vst.msk [vmem:[#allocation3 + $0x30] sm:$0x7f] %vm490_vm14, %v469_v5 }
 0x160   :  { %v467_v6 = vpop.permute.xlu1 %466 }
 0x161   :  { %489 = vst.msk [vmem:[#allocation3 + $0x20] sm:$0xff] %vm486_vm12, %v467_v6 }
 0x162   :  { %v534_v10 = vld [vmem:[#allocation3 + $0x30] sm:$0xff] }
 0x163   :  { %v686_v31 = vpop.f32.mrf.mxu2 }
 0x167   :  { %v389_v7 = vpop.permute.xlu0 %388 }
 0x168   :  { %410 = vst.msk [vmem:[#allocation3 + $0x40] sm:$0xfe] %vm404_vm10, %v389_v7  ;;  %v532_v9 = vld [vmem:[#allocation3 + $0x20] sm:$0xff] }
 0x169   :  { %443 = vst.msk [vmem:[#allocation3 + $0x40] sm:$0xff] %vm438_vm11, %v423_v8  ;;  %v546_v11 = vpack.c.bf16 %v534_v10, %v532_v9 }
 0x16b   :  { %661 = vmatmul.bf16.gmra.mxu1 %v546_v11  ;;  %v688_v37 = vpop.f32.mrf.mxu2 }
 0x170   :  { %v473_v14 = vpop.permute.xlu2 %472 }
 0x173   :  { %v691_v43 = vpop.f32.mrf.mxu2 }
 0x175   :  { %v425_v13 = vpop.permute.xlu0 %424 }
 0x178   :  { %v391_v12 = vpop.permute.xlu1 %390  ;;  %v427_v19 = vpop.permute.xlu2 %426 }
 0x179   :  { %411 = vst.msk [vmem:[#allocation3 + $0x50] sm:$0xff] %vm406_vm13, %v391_v12 }
 0x17a   :  { %444 = vst.msk [vmem:[#allocation3 + $0x50] sm:$0xff] %vm438_vm11, %v425_v13 }
 0x17b   :  { %493 = vst.msk [vmem:[#allocation3 + $0x50] sm:$0xff] %vm486_vm12, %v473_v14  ;;  %v693_v50 = vpop.f32.mrf.mxu2 }
 0x180   :  { %v471_v15 = vpop.permute.xlu1 %470  ;;  %v477_v23 = vpop.permute.xlu2 %476 }
 0x181   :  { %492 = vst.msk [vmem:[#allocation3 + $0x40] sm:$0xff] %vm486_vm12, %v471_v15 }
 0x182   :  { %v538_v18 = vld [vmem:[#allocation3 + $0x50] sm:$0xff] }
 0x188   :  { %v393_v16 = vpop.permute.xlu0 %392  ;;  %v536_v17 = vld [vmem:[#allocation3 + $0x40] sm:$0xff] }
 0x189   :  { %412 = vst.msk [vmem:[#allocation3 + $0x60] sm:$0xff] %vm406_vm13, %v393_v16  ;;  %v548_v20 = vpack.c.bf16 %v538_v18, %v536_v17  ;;  %v3078_v16 = vld [vmem:[#allocation10 + $0x38] sm:$0xff]  ;;  %v3077_v18 = vld [vmem:[#allocation10 + $0x30] sm:$0xff] }
 0x18a   :  { %445 = vst.msk [vmem:[#allocation3 + $0x60] sm:$0xff] %vm438_vm11, %v427_v19  ;;  %919 = vmatpush.bf16.msra.mxu3 %v3078_v16 }
 0x18b   :  { %666 = vmatmul.bf16.gmra.mxu1 %v548_v20 }
 0x18e   :  { %920 = vmatpush.bf16.msra.mxu3 %v3077_v18  ;;  %v2861_v18 = vld [vmem:[#allocation12 + $0x58] sm:$0xf0] }
 0x195   :  { %v429_v22 = vpop.permute.xlu0 %428 }
 0x198   :  { %v395_v21 = vpop.permute.xlu1 %394 }
 0x199   :  { %413 = vst.msk [vmem:[#allocation3 + $0x70] sm:$0xff] %vm406_vm13, %v395_v21 }
 0x19a   :  { %446 = vst.msk [vmem:[#allocation3 + $0x70] sm:$0xff] %vm438_vm11, %v429_v22  ;;  %v3076_v22 = vld [vmem:[#allocation10 + $0x28] sm:$0xff] }
 0x19b   :  { %495 = vst.msk [vmem:[#allocation3 + $0x70] sm:$0x7f] %vm490_vm14, %v477_v23  ;;  %921 = vmatpush.bf16.msra.mxu3 %v3076_v22 }
 0x1a0   :  { %v475_v24 = vpop.permute.xlu1 %474 }
 0x1a1   :  { %494 = vst.msk [vmem:[#allocation3 + $0x60] sm:$0xff] %vm486_vm12, %v475_v24  ;;  %v3075_v24 = vld [vmem:[#allocation10 + $0x20] sm:$0xff] }
 0x1a2   :  { %v542_v26 = vld [vmem:[#allocation3 + $0x70] sm:$0xff]  ;;  %922 = vmatpush.bf16.msra.mxu3 %v3075_v24 }
 0x1a3   :  { %v696_v61 = vpop.f32.mrf.mxu2  ;;  %v3091_v24 = vld [vmem:[#allocation12 + $0x44] sm:$0xf] }
 0x1a8   :  { %v540_v25 = vld [vmem:[#allocation3 + $0x60] sm:$0xff] }
 0x1a9   :  { %v550_v27 = vpack.c.bf16 %v542_v26, %v540_v25  ;;  %v3074_v25 = vld [vmem:[#allocation10 + $0x18] sm:$0xff] }
 0x1aa   :  { %923 = vmatpush.bf16.msra.mxu3 %v3074_v25  ;;  %v2853_v25 = vld [vmem:[#allocation12 + $0x48] sm:$0xf0] }
 0x1ab   :  { %671 = vmatmul.bf16.gmra.mxu1 %v550_v27  ;;  %v698_v4 = vpop.f32.mrf.mxu2 }
 0x1b3   :  { %v701_v11 = vpop.f32.mrf.mxu2 }
 0x1bb   :  { %v703_v20 = vpop.f32.mrf.mxu2 }
 0x1c2   :  { %v657_v32 = vpop.f32.mrf.mxu1 }
 0x1c3   :  { %v658_v33 = vadd.f32 %v3847_v28, %v657_v32  ;;  %v3073_v32 = vld [vmem:[#allocation10 + $0x10] sm:$0xff] }
 0x1c4   :  { %924 = vmatpush.bf16.msra.mxu3 %v3073_v32 }
 0x1c5   :  { %v687_v34 = vadd.f32 %v686_v31, %v658_v33 }
 0x1c7   :  { %v706_v35 = vmax.f32 %v687_v34, 0.0 }
 0x1c9   :  { %715 = vst.msk [vmem:[#allocation4] sm:$0xff] %vm714_vm15, %v706_v35 }
 0x1ca   :  { %v659_v36 = vpop.f32.mrf.mxu1 }
 0x1cb   :  { %v660_v30 = vadd.f32 %v3847_v28, %v659_v36 }
 0x1cd   :  { %v689_v38 = vadd.f32 %v688_v37, %v660_v30  ;;  %v3072_v37 = vld [vmem:[#allocation10 + $0x8] sm:$0xff] }
 0x1ce   :  { %925 = vmatpush.bf16.msra.mxu3 %v3072_v37 }
 0x1cf   :  { %v707_v39 = vmax.f32 %v689_v38, 0.0  ;;  %v3071_v38 = vld [vmem:[#allocation10] sm:$0xff] }
 0x1d1   :  { %716 = vst.msk [vmem:[#allocation4 + $0x8] sm:$0xff] %vm714_vm15, %v707_v39  ;;  %v3082_v39 = vld [vmem:[#allocation10 + $0x58] sm:$0xff] }
 0x1d2   :  { %926 = vmatpush.bf16.msra.mxu3 %v3071_v38  ;;  %v2901_v38 = vld [vmem:[#allocation13 + $0x28] sm:$0xf0] }
 0x1d6   :  { %942 = vmatpush.bf16.msrb.mxu3 %v3082_v39 }
 0x1d8   :  { %v723_v29 = vld [vmem:[#allocation4] ss:$2 sm:$0xff]  ;;  %v731_v40 = vld [vmem:[#allocation4 + $0x1] ss:$2 sm:$0xff] }
 0x1d9   :  { %v738_v41 = vmax.f32 %v723_v29, %v731_v40 }
 0x1db   :  { %769 = vrot.lane.b32.xlu0 %v738_v41, %s3507_s18  ;;  %v754_v42 = vrot.slane %v738_v41, 7  ;;  %v786_v56 = vrot.slane %v738_v41, 1 }
 0x1dd   :  { %765 = vst.msk [vmem:[#allocation5] sm:$0xfe] %vm764_vm0, %v754_v42 }
 0x1e8   :  { %v662_v44 = vpop.f32.mrf.mxu1 }
 0x1e9   :  { %v663_v45 = vadd.f32 %v3847_v28, %v662_v44  ;;  %v3081_v44 = vld [vmem:[#allocation10 + $0x50] sm:$0xff] }
 0x1ea   :  { %943 = vmatpush.bf16.msrb.mxu3 %v3081_v44 }
 0x1eb   :  { %v692_v46 = vadd.f32 %v691_v43, %v663_v45  ;;  %v3080_v45 = vld [vmem:[#allocation10 + $0x48] sm:$0xff] }
 0x1ed   :  { %v708_v47 = vmax.f32 %v692_v46, 0.0  ;;  %v3079_v46 = vld [vmem:[#allocation10 + $0x40] sm:$0xff] }
 0x1ee   :  { %944 = vmatpush.bf16.msrb.mxu3 %v3080_v45  ;;  %v2893_v45 = vld [vmem:[#allocation13 + $0x18] sm:$0xf0] }
 0x1ef   :  { %717 = vst.msk [vmem:[#allocation4 + $0x10] sm:$0xff] %vm714_vm15, %v708_v47 }
 0x1f0   :  { %v664_v48 = vpop.f32.mrf.mxu1 }
 0x1f1   :  { %v665_v49 = vadd.f32 %v3847_v28, %v664_v48 }
 0x1f2   :  { %945 = vmatpush.bf16.msrb.mxu3 %v3079_v46  ;;  %v2819_v46 = vld [vmem:[#allocation12] sm:$0xf] }
 0x1f3   :  { %v694_v51 = vadd.f32 %v693_v50, %v665_v49 }
 0x1f5   :  { %v709_v52 = vmax.f32 %v694_v51, 0.0 }
 0x1f7   :  { %718 = vst.msk [vmem:[#allocation4 + $0x18] sm:$0xff] %vm714_vm15, %v709_v52 }
 0x1fe   :  { %v725_v53 = vld [vmem:[#allocation4 + $0x10] ss:$2 sm:$0xff]  ;;  %v733_v54 = vld [vmem:[#allocation4 + $0x11] ss:$2 sm:$0xff] }
 0x1ff   :  { %v739_v55 = vmax.f32 %v725_v53, %v733_v54 }
 0x201   :  { %771 = vrot.lane.b32.xlu1 %v739_v55, %s3507_s18  ;;  %v755_v57 = vrot.slane %v739_v55, 7  ;;  %v787_v58 = vrot.slane %v739_v55, 1 }
 0x203   :  { %v788_v59 = vsel %vm447_vm6, %v786_v56, %v787_v58  ;;  %798 = vst.msk [vmem:[#allocation5 + $0x18] sm:$0x7f] %vm797_vm1, %v787_v58  ;;  %v756_v60 = vsel %vm365_vm7, %v754_v42, %v755_v57  ;;  %v2875_v57 = vld [vmem:[#allocation12 + $0x70] sm:$0xf]  ;;  %v3098_v58 = vld [vmem:[#allocation12 + $0x74] sm:$0xf0] }
 0x204   :  { %796 = vst.msk [vmem:[#allocation5 + $0x8] sm:$0xff] %vm714_vm15, %v788_v59  ;;  %v2876_v59 = vor.u32 %v3098_v58, %v2875_v57 }
 0x205   :  { %766 = vst.msk [vmem:[#allocation5 + $0x10] sm:$0xff] %vm714_vm15, %v756_v60  ;;  %v2867_v60 = vld [vmem:[#allocation12 + $0x60] sm:$0xf] }
 0x206   :  { %1084 = vmatpush.bf16.msrb.mxu2 %v2876_v59  ;;  %v3083_v59 = vld [vmem:[#allocation12 + $0x4] sm:$0xf] }
 0x208   :  { %v667_v62 = vpop.f32.mrf.mxu1 }
 0x209   :  { %v668_v63 = vadd.f32 %v3847_v28, %v667_v62 }
 0x20a   :  { %v804_v52 = vld [vmem:[#allocation5 + $0x18] sm:$0xff] }
 0x20b   :  { %v697_v0 = vadd.f32 %v696_v61, %v668_v63  ;;  %v802_v51 = vld [vmem:[#allocation5 + $0x8] sm:$0xff]  ;;  %v3096_v61 = vld [vmem:[#allocation12 + $0x64] sm:$0xf0]  ;;  %v2859_v63 = vld [vmem:[#allocation12 + $0x50] sm:$0xf] }
 0x20c   :  { %v810_v53 = vpack.c.bf16 %v804_v52, %v802_v51  ;;  %v2868_v62 = vor.u32 %v3096_v61, %v2867_v60  ;;  %v3085_v51 = vld [vmem:[#allocation12 + $0x14] sm:$0xf]  ;;  %v2829_v52 = vld [vmem:[#allocation12 + $0x18] sm:$0xf0]  ;;  %v2821_v60 = vld [vmem:[#allocation12 + $0x8] sm:$0xf0] }
 0x20d   :  { %v710_v1 = vmax.f32 %v697_v0, 0.0  ;;  %v3094_v0 = vld [vmem:[#allocation12 + $0x54] sm:$0xf0]  ;;  %v2832_v57 = vor.u32 %v3085_v51, %v2829_v52 }
 0x20e   :  { %1085 = vmatpush.bf16.msrb.mxu2 %v2868_v62  ;;  %v2824_v62 = vor.u32 %v3083_v59, %v2821_v60 }
 0x20f   :  { %719 = vst.msk [vmem:[#allocation4 + $0x20] sm:$0xff] %vm714_vm15, %v710_v1  ;;  %v2860_v1 = vor.u32 %v3094_v0, %v2859_v63 }
 0x210   :  { %v669_v2 = vpop.f32.mrf.mxu1 }
 0x211   :  { %v670_v3 = vadd.f32 %v3847_v28, %v669_v2 }
 0x212   :  { %1086 = vmatpush.bf16.msrb.mxu2 %v2860_v1 }
 0x213   :  { %v699_v5 = vadd.f32 %v698_v4, %v670_v3  ;;  %v2851_v3 = vld [vmem:[#allocation12 + $0x40] sm:$0xf]  ;;  %v3092_v4 = vld [vmem:[#allocation12 + $0x44] sm:$0xf0] }
 0x215   :  { %v711_v6 = vmax.f32 %v699_v5, 0.0  ;;  %v2852_v5 = vor.u32 %v3092_v4, %v2851_v3  ;;  %v2907_v3 = vld [vmem:[#allocation13 + $0x30] sm:$0xf]  ;;  %v3106_v4 = vld [vmem:[#allocation13 + $0x34] sm:$0xf0] }
 0x217   :  { %720 = vst.msk [vmem:[#allocation4 + $0x28] sm:$0xff] %vm714_vm15, %v711_v6  ;;  %1087 = vmatpush.bf16.msrb.mxu2 %v2852_v5  ;;  %v3915_v5 = vor.u32 %v3106_v4, %v2907_v3 }
 0x219   :  { %1784 = vmatpush.bf16.msrb.mxu0 %v3915_v5 }
 0x21e   :  { %v727_v7 = vld [vmem:[#allocation4 + $0x20] ss:$2 sm:$0xff]  ;;  %v735_v8 = vld [vmem:[#allocation4 + $0x21] ss:$2 sm:$0xff] }
 0x21f   :  { %v740_v9 = vmax.f32 %v727_v7, %v735_v8  ;;  %v3097_v7 = vld [vmem:[#allocation12 + $0x74] sm:$0xf]  ;;  %v2877_v8 = vld [vmem:[#allocation12 + $0x78] sm:$0xf0] }
 0x221   :  { %773 = vrot.lane.b32.xlu2 %v740_v9, %s3507_s18  ;;  %v757_v10 = vrot.slane %v740_v9, 7  ;;  %v789_v33 = vrot.slane %v740_v9, 1  ;;  %v2843_v9 = vld [vmem:[#allocation12 + $0x30] sm:$0xf] }
 0x223   :  { %767 = vst.msk [vmem:[#allocation5 + $0x20] sm:$0xfe] %vm764_vm0, %v757_v10 }
 0x228   :  { %v672_v12 = vpop.f32.mrf.mxu1 }
 0x229   :  { %v673_v13 = vadd.f32 %v3847_v28, %v672_v12 }
 0x22b   :  { %v702_v14 = vadd.f32 %v701_v11, %v673_v13  ;;  %v2880_v11 = vor.u32 %v3097_v7, %v2877_v8  ;;  %v2899_v7 = vld [vmem:[#allocation13 + $0x20] sm:$0xf] }
 0x22d   :  { %v712_v15 = vmax.f32 %v702_v14, 0.0  ;;  %1098 = vmatpush.bf16.msrb.mxu1 %v2880_v11  ;;  %v3095_v14 = vld [vmem:[#allocation12 + $0x64] sm:$0xf]  ;;  %v2891_v11 = vld [vmem:[#allocation13 + $0x10] sm:$0xf] }
 0x22f   :  { %721 = vst.msk [vmem:[#allocation4 + $0x30] sm:$0xff] %vm714_vm15, %v712_v15  ;;  %v2869_v15 = vld [vmem:[#allocation12 + $0x68] sm:$0xf0] }
 0x230   :  { %v674_v17 = vpop.f32.mrf.mxu1  ;;  %v2872_v16 = vor.u32 %v3095_v14, %v2869_v15 }
 0x231   :  { %v675_v19 = vadd.f32 %v3847_v28, %v674_v17  ;;  %v3093_v17 = vld [vmem:[#allocation12 + $0x54] sm:$0xf] }
 0x232   :  { %1099 = vmatpush.bf16.msrb.mxu1 %v2872_v16 }
 0x233   :  { %v704_v21 = vadd.f32 %v703_v20, %v675_v19  ;;  %v2835_v19 = vld [vmem:[#allocation12 + $0x20] sm:$0xf]  ;;  %v3088_v20 = vld [vmem:[#allocation12 + $0x24] sm:$0xf0] }
 0x234   :  { %v2836_v22 = vor.u32 %v3088_v20, %v2835_v19 }
 0x235   :  { %v713_v23 = vmax.f32 %v704_v21, 0.0  ;;  %v2864_v21 = vor.u32 %v3093_v17, %v2861_v18  ;;  %v3100_v17 = vld [vmem:[#allocation13 + $0x4] sm:$0xf0] }
 0x237   :  { %722 = vst.msk [vmem:[#allocation4 + $0x38] sm:$0xff] %vm714_vm15, %v713_v23  ;;  %1100 = vmatpush.bf16.msrb.mxu1 %v2864_v21 }
 0x23e   :  { %v729_v26 = vld [vmem:[#allocation4 + $0x30] ss:$2 sm:$0xff]  ;;  %v737_v27 = vld [vmem:[#allocation4 + $0x31] ss:$2 sm:$0xff] }
 0x23f   :  { %v741_v31 = vmax.f32 %v729_v26, %v737_v27  ;;  %v3105_v26 = vld [vmem:[#allocation13 + $0x34] sm:$0xf]  ;;  %v2856_v27 = vor.u32 %v3091_v24, %v2853_v25 }
 0x241   :  { %v758_v34 = vrot.slane %v741_v31, 7  ;;  %v790_v35 = vrot.slane %v741_v31, 1  ;;  %775 = vrot.lane.b32.xlu0 %v741_v31, %s3507_s18  ;;  %v2909_v31 = vld [vmem:[#allocation13 + $0x38] sm:$0xf0]  ;;  %1101 = vmatpush.bf16.msrb.mxu1 %v2856_v27 }
 0x242   :  { %v3893_v32 = vor.u32 %v3105_v26, %v2909_v31 }
 0x243   :  { %v791_v28 = vsel %vm447_vm6, %v789_v33, %v790_v35  ;;  %800 = vst.msk [vmem:[#allocation5 + $0x38] sm:$0x7f] %vm797_vm1, %v790_v35  ;;  %v759_v36 = vsel %vm365_vm7, %v757_v10, %v758_v34  ;;  %v3090_v10 = vld [vmem:[#allocation12 + $0x34] sm:$0xf0]  ;;  %v3898_v33 = vld [vmem:[%s4300_s6] ss:$0 sm:$0xff] }
 0x244   :  { %799 = vst.msk [vmem:[#allocation5 + $0x28] sm:$0xff] %vm714_vm15, %v791_v28  ;;  %v2844_v12 = vor.u32 %v3090_v10, %v2843_v9  ;;  %v3089_v34 = vld [vmem:[#allocation12 + $0x34] sm:$0xf]  ;;  %v2845_v35 = vld [vmem:[#allocation12 + $0x38] sm:$0xf0] }
 0x245   :  { %768 = vst.msk [vmem:[#allocation5 + $0x30] sm:$0xff] %vm714_vm15, %v759_v36  ;;  %v3103_v28 = vld [vmem:[#allocation13 + $0x24] sm:$0xf]  ;;  %v2827_v36 = vld [vmem:[#allocation12 + $0x10] sm:$0xf]  ;;  %v2848_v37 = vor.u32 %v3089_v34, %v2845_v35 }
 0x246   :  { %1088 = vmatpush.bf16.msrb.mxu2 %v2844_v12  ;;  %v3102_v12 = vld [vmem:[#allocation13 + $0x14] sm:$0xf0] }
 0x247   :  { %1102 = vmatpush.bf16.msrb.mxu1 %v2848_v37  ;;  %v3926_v16 = vor.u32 %v3102_v12, %v2891_v11 }
 0x24a   :  { %v808_v55 = vld [vmem:[#allocation5 + $0x38] sm:$0xff]  ;;  %1089 = vmatpush.bf16.msrb.mxu2 %v2836_v22 }
 0x24b   :  { %v806_v54 = vld [vmem:[#allocation5 + $0x28] sm:$0xff] }
 0x24c   :  { %v812_v56 = vpack.c.bf16 %v808_v55, %v806_v54  ;;  %v3099_v54 = vld [vmem:[#allocation13 + $0x4] sm:$0xf]  ;;  %v2885_v55 = vld [vmem:[#allocation13 + $0x8] sm:$0xf0] }
 0x24d   :  { %v770_v30 = vpop.permute.xlu0 %769  ;;  %v3908_v58 = vor.u32 %v3099_v54, %v2885_v55 }
 0x24e   :  { %782 = vst.msk [vmem:[#allocation5] sm:$0xff] %vm781_vm2, %v770_v30  ;;  %v3086_v30 = vld [vmem:[#allocation12 + $0x14] sm:$0xf0] }
 0x24f   :  { %v2828_v39 = vor.u32 %v3086_v30, %v2827_v36 }
 0x251   :  { %1090 = vmatpush.bf16.msrb.mxu2 %v2828_v39 }
 0x255   :  { %v801_v41 = vld [vmem:[#allocation5] sm:$0xff] }
 0x273   :  { %v772_v29 = vpop.permute.xlu1 %771 }
 0x274   :  { %783 = vst.msk [vmem:[#allocation5 + $0x10] sm:$0xff] %vm781_vm2, %v772_v29  ;;  %v3901_v29 = vor.u32 %v3103_v28, %v2901_v38 }
 0x27b   :  { %v774_v40 = vpop.permute.xlu2 %773  ;;  %v803_v42 = vld [vmem:[#allocation5 + $0x10] sm:$0xff] }
 0x27c   :  { %784 = vst.msk [vmem:[#allocation5 + $0x20] sm:$0xff] %vm781_vm2, %v774_v40  ;;  %v809_v43 = vpack.c.bf16 %v803_v42, %v801_v41  ;;  %v3087_v40 = vld [vmem:[#allocation12 + $0x24] sm:$0xf]  ;;  %v2837_v41 = vld [vmem:[#allocation12 + $0x28] sm:$0xf0] }
 0x27d   :  { %v3101_v42 = vld [vmem:[#allocation13 + $0x14] sm:$0xf]  ;;  %v2840_v44 = vor.u32 %v3087_v40, %v2837_v41 }
 0x27e   :  { %927 = vmatmul.bf16.vlgmr.msra.gmra.mxu3 %v809_v43 }
 0x27f   :  { %1180 = vmatpush.bf16.msra.mxu3 %v3893_v32  ;;  %1103 = vmatpush.bf16.msrb.mxu1 %v2840_v44 }
 0x283   :  { %v805_v48 = vld [vmem:[#allocation5 + $0x20] sm:$0xff]  ;;  %1181 = vmatpush.bf16.msra.mxu3 %v3901_v29  ;;  %1104 = vmatpush.bf16.msrb.mxu1 %v2832_v57 }
 0x287   :  { %1105 = vmatpush.bf16.msrb.mxu1 %v2824_v62 }
 0x28b   :  { %1329 = vmatpush.bf16.msra.mxu1 %v3893_v32 }
 0x28f   :  { %1330 = vmatpush.bf16.msra.mxu1 %v3901_v29 }
 0x2b3   :  { %v776_v47 = vpop.permute.xlu0 %775 }
 0x2b4   :  { %785 = vst.msk [vmem:[#allocation5 + $0x30] sm:$0xff] %vm781_vm2, %v776_v47  ;;  %v3084_v47 = vld [vmem:[#allocation12 + $0x4] sm:$0xf0] }
 0x2bb   :  { %v807_v49 = vld [vmem:[#allocation5 + $0x30] sm:$0xff] }
 0x2bc   :  { %v811_v50 = vpack.c.bf16 %v807_v49, %v805_v48  ;;  %v3905_v49 = vor.u32 %v3101_v42, %v2893_v45  ;;  %v992_v45 = vld [vmem:[%s4303_s9] sm:$0x3] }
 0x2bd   :  { %v995_v60 = vperm.slane %v992_v45, 1 }
 0x2be   :  { %932 = vmatmul.bf16.gmra.mxu3 %v811_v50  ;;  %v2820_v50 = vor.u32 %v3084_v47, %v2819_v46  ;;  %1331 = vmatpush.bf16.msra.mxu1 %v3905_v49  ;;  %v994_v46 = vperm.slane %v992_v45, 0 }
 0x2bf   :  { %1182 = vmatpush.bf16.msra.mxu3 %v3905_v49 }
 0x2c0   :  { %1091 = vmatpush.bf16.msrb.mxu2 %v2820_v50 }
 0x2c2   :  { %1332 = vmatpush.bf16.msra.mxu1 %v3908_v58 }
 0x2c3   :  { %1183 = vmatpush.bf16.msra.mxu3 %v3908_v58 }
 0x2c4   :  { %1167 = vmatpush.bf16.msra.mxu2 %v3915_v5 }
 0x2ce   :  { %2815 = vmatmul.msk.bf16.vlgmr.msrb.gmra.mxu3 %vm714_vm15, %v810_v53 }
 0x2cf   :  { %1470 = vmatpush.bf16.msrb.mxu3 %v3915_v5 }
 0x2de   :  { %2816 = vmatmul.msk.bf16.gmra.mxu3 %vm714_vm15, %v812_v56 }
 0x301   :  { %v928_v2 = vpop.f32.mrf.mxu3 }
 0x302   :  { %v929_v43 = vadd.f32 %v3898_v33, %v928_v2  ;;  %v3519_v2 = vmov 0  }
 0x303   :  { %1184 = vmatmul.bf16.vlgmr.msra.gmra.mxu3 %v3519_v2 }
 0x309   :  { %v3887_v6 = vpop.f32.mrf.mxu3 }
 0x30a   :  { %v931_v61 = vadd.f32 %v3898_v33, %v3887_v6  ;;  %v3104_v6 = vld [vmem:[#allocation13 + $0x24] sm:$0xf0] }
 0x30b   :  { %v3920_v9 = vor.u32 %v3104_v6, %v2899_v7 }
 0x30d   :  { %1168 = vmatpush.bf16.msra.mxu2 %v3920_v9  ;;  %1471 = vmatpush.bf16.msrb.mxu3 %v3920_v9 }
 0x30e   :  { %1785 = vmatpush.bf16.msrb.mxu0 %v3920_v9 }
 0x311   :  { %1169 = vmatpush.bf16.msra.mxu2 %v3926_v16  ;;  %1472 = vmatpush.bf16.msrb.mxu3 %v3926_v16 }
 0x312   :  { %1786 = vmatpush.bf16.msrb.mxu0 %v3926_v16 }
 0x341   :  { %v3889_v13 = vpop.f32.mrf.mxu3 }
 0x342   :  { %v934_v8 = vadd.f32 %v3898_v33, %v3889_v13  ;;  %v2883_v13 = vld [vmem:[#allocation13] sm:$0xf] }
 0x343   :  { %v3934_v19 = vor.u32 %v3100_v17, %v2883_v13 }
 0x345   :  { %1170 = vmatpush.bf16.msra.mxu2 %v3934_v19  ;;  %1473 = vmatpush.bf16.msrb.mxu3 %v3934_v19 }
 0x346   :  { %1787 = vmatpush.bf16.msrb.mxu0 %v3934_v19 }
 0x349   :  { %v3891_v23 = vpop.f32.mrf.mxu3  ;;  %1640 = vmatpush.bf16.msra.mxu3 %v3893_v32 }
 0x34a   :  { %v936_v18 = vadd.f32 %v3898_v33, %v3891_v23  ;;  %2098 = vmatpush.bf16.msra.mxu0 %v3915_v5 }
 0x34d   :  { %1641 = vmatpush.bf16.msra.mxu3 %v3901_v29 }
 0x34e   :  { %2099 = vmatpush.bf16.msra.mxu0 %v3920_v9 }
 0x351   :  { %v947_v48 = vpop.f32.mrf.mxu3  ;;  %1642 = vmatpush.bf16.msra.mxu3 %v3905_v49 }
 0x352   :  { %v948_v53 = vadd.f32 %v947_v48, %v929_v43  ;;  %2100 = vmatpush.bf16.msra.mxu0 %v3926_v16 }
 0x354   :  { %v957_v56 = vmax.f32 %v948_v53, 0.0 }
 0x355   :  { %1643 = vmatpush.bf16.msra.mxu3 %v3908_v58 }
 0x356   :  { %961 = vst [vmem:[#allocation6] sm:$0xff] %v957_v56  ;;  %2101 = vmatpush.bf16.msra.mxu0 %v3934_v19 }
 0x359   :  { %v949_v63 = vpop.f32.mrf.mxu3 }
 0x35a   :  { %v950_v0 = vadd.f32 %v949_v63, %v931_v61 }
 0x35c   :  { %v958_v1 = vmax.f32 %v950_v0, 0.0 }
 0x35e   :  { %962 = vst [vmem:[#allocation6 + $0x8] sm:$0xff] %v958_v1 }
 0x361   :  { %v952_v10 = vpop.f32.mrf.mxu3 }
 0x362   :  { %v953_v14 = vadd.f32 %v952_v10, %v934_v8 }
 0x364   :  { %v959_v15 = vmax.f32 %v953_v14, 0.0 }
 0x365   :  { %v965_v22 = vld [vmem:[#allocation6] ss:$2 sm:$0xff]  ;;  %v969_v24 = vld [vmem:[#allocation6 + $0x1] ss:$2 sm:$0xff] }
 0x366   :  { %963 = vst [vmem:[#allocation6 + $0x10] sm:$0xff] %v959_v15  ;;  %v972_v23 = vmax.f32 %v965_v22, %v969_v24 }
 0x368   :  { %v974_v26 = vpack.c.bf16 %v972_v23, %v972_v23 }
 0x369   :  { %v954_v20 = vpop.f32.mrf.mxu3 }
 0x36a   :  { %v955_v21 = vadd.f32 %v954_v20, %v936_v18  ;;  %v1000_v34 = vunpack.c.l.b16 %v974_v26 }
 0x36c   :  { %v960_v25 = vmax.f32 %v955_v21, 0.0  ;;  %v2959_v36 = vunpack.i.l.s16 %v1000_v34 }
 0x36e   :  { %964 = vst [vmem:[#allocation6 + $0x18] sm:$0xff] %v960_v25  ;;  %v2419_v38 = vrot.slane %v2959_v36, 7 }
 0x375   :  { %v967_v27 = vld [vmem:[#allocation6 + $0x10] ss:$2 sm:$0xff]  ;;  %v971_v31 = vld [vmem:[#allocation6 + $0x11] ss:$2 sm:$0xff] }
 0x376   :  { %v973_v33 = vmax.f32 %v967_v27, %v971_v31 }
 0x378   :  { %v975_v35 = vpack.c.bf16 %v973_v33, %v973_v33 }
 0x37a   :  { %v1001_v28 = vunpack.c.l.b16 %v975_v35 }
 0x37c   :  { %v1002_v30 = vpack.c.b16 %v1001_v28, %v1000_v34  ;;  %v2960_v37 = vunpack.i.l.s16 %v1001_v28 }
 0x37e   :  { %1092 = vmatmul.bf16.vlgmr.msrb.gmra.mxu2 %v1002_v30  ;;  %v2420_v39 = vrot.slane %v2960_v37, 6  ;;  %1106 = vmatmul.bf16.vlgmr.msrb.gmra.mxu1 %v1002_v30 }
 0x37f   :  { %1316 = vmatpush.bf16.msrb.mxu2 %v3915_v5  ;;  %1627 = vmatpush.bf16.msrb.mxu1 %v3915_v5 }
 0x380   :  { %v3953_v40 = vsel %vm1304_vm3, %v2420_v39, %v2419_v38 }
 0x383   :  { %1317 = vmatpush.bf16.msrb.mxu2 %v3920_v9  ;;  %1628 = vmatpush.bf16.msrb.mxu1 %v3920_v9 }
 0x386   :  { %v1185_v41 = vpop.f32.mrf.mxu3 }
 0x387   :  { %1318 = vmatpush.bf16.msrb.mxu2 %v3926_v16  ;;  %1629 = vmatpush.bf16.msrb.mxu1 %v3926_v16 }
 0x38b   :  { %1319 = vmatpush.bf16.msrb.mxu2 %v3934_v19  ;;  %1630 = vmatpush.bf16.msrb.mxu1 %v3934_v19 }
 0x38e   :  { %1171 = vmatmul.bf16.vlgmr.msra.gmra.mxu2 %v3519_v2  ;;  %v1187_v42 = vpop.f32.mrf.mxu3  ;;  %v1192_v2 = vrot.slane %v1185_v41, 1 }
 0x38f   :  { %1483 = vmatpush.bf16.msra.mxu2 %v3893_v32 }
 0x393   :  { %1484 = vmatpush.bf16.msra.mxu2 %v3901_v29 }
 0x397   :  { %1485 = vmatpush.bf16.msra.mxu2 %v3905_v49 }
 0x39b   :  { %1486 = vmatpush.bf16.msra.mxu2 %v3908_v58 }
 0x3fb   :  { %v1107_v55 = vpop.f32.mrf.mxu1 }
 0x3fc   :  { %v3975_v1 = vadd.f32 %v1107_v55, %v995_v60 }
 0x3fe   :  { %v1198_v7 = vadd.f32 %v1185_v41, %v3975_v1 }
 0x400   :  { %v2915_v30 = vmul.f32 -1.442695, %v1198_v7 }
 0x401   :  { %v1093_v43 = vpop.f32.mrf.mxu2 }
 0x402   :  { %v3969_v47 = vadd.f32 %v1093_v43, %v994_v46 }
 0x403   :  { %v1109_v0 = vpop.f32.mrf.mxu1 }
 0x404   :  { %v3977_v3 = vadd.f32 %v1109_v0, %v995_v60 }
 0x406   :  { %v1200_v10 = vadd.f32 %v1192_v2, %v3977_v3 }
 0x408   :  { %v2916_v42 = vmul.f32 -1.442695, %v1200_v10 }
 0x409   :  { %v1095_v44 = vpop.f32.mrf.mxu2 }
 0x40a   :  { %v3971_v50 = vadd.f32 %v1095_v44, %v994_v46 }
 0x411   :  { %v1172_v48 = vpop.f32.mrf.mxu2 }
 0x412   :  { %v1191_v51 = vrot.slane %v1172_v48, 1  ;;  %v1197_v52 = vadd.f32 %v1172_v48, %v3969_v47 }
 0x414   :  { %v1199_v53 = vadd.f32 %v1191_v51, %v3971_v50  ;;  %v2913_v54 = vmul.f32 -1.442695, %v1197_v52 }
 0x416   :  { %3150 = vpow2.f32 %v2913_v54  ;;  %v2914_v56 = vmul.f32 -1.442695, %v1199_v53 }
 0x418   :  { %3152 = vpow2.f32 %v2914_v56 }
 0x419   :  { %v1174_v57 = vpop.f32.mrf.mxu2 }
 0x41c   :  { %v3151_v59 = vpop.eup %3150 }
 0x41d   :  { %v1207_v61 = vadd.f32 1.0, %v3151_v59 }
 0x41e   :  { %v3153_v62 = vpop.eup %3152 }
 0x41f   :  { %v1208_v63 = vadd.f32 1.0, %v3153_v62  ;;  %3154 = vrcp.f32 %v1207_v61  ;;  %v1220_v14 = vand.u32 2147483648, %v1207_v61  ;;  %v1218_v13 = vand.u32 2147483647, %v1207_v61 }
 0x420   :  { %vm1214_vm5 = vweird.f32 %v1207_v61 }
 0x421   :  { %3156 = vrcp.f32 %v1208_v63  ;;  %v1235_v18 = vand.u32 2147483648, %v1208_v63  ;;  %v1233_v22 = vand.u32 2147483647, %v1208_v63  ;;  %v1221_v24 = vor.u32 1.1754944e-38, %v1220_v14 }
 0x422   :  { %3158 = vtanh.f32 %v1198_v7  ;;  %vm1219_vm8 = vcmp.eq.f32.partialorder %v1218_v13, 8.507059e+37  ;;  %vm1229_vm9 = vweird.f32 %v1208_v63 }
 0x423   :  { %3160 = vtanh.f32 %v1200_v10  ;;  %v1236_v31 = vor.u32 1.1754944e-38, %v1235_v18  ;;  %vm1234_vm11 = vcmp.eq.f32.partialorder %v1233_v22, 8.507059e+37 }
 0x424   :  { %3162 = vpow2.f32 %v2915_v30 }
 0x425   :  { %v3155_v4 = vpop.eup %3154 }
 0x426   :  { %v1210_v6 = vmul.f32 %v3155_v4, %v1207_v61  ;;  %vm1215_vm4 = vweird.f32 %v3155_v4 }
 0x427   :  { %v3157_v8 = vpop.eup %3156  ;;  %vm1216_vm7 = vmor %vm1214_vm5, %vm1215_vm4 }
 0x428   :  { %v1211_v11 = vsub.f32 1.0, %v1210_v6  ;;  %v1225_v12 = vmul.f32 %v3157_v8, %v1208_v63  ;;  %vm1230_vm6 = vweird.f32 %v3157_v8  ;;  %v3159_v26 = vpop.eup %3158 }
 0x429   :  { %vm1231_vm10 = vmor %vm1229_vm9, %vm1230_vm6  ;;  %v3161_v35 = vpop.eup %3160 }
 0x42a   :  { %v1212_v15 = vmul.f32 %v3155_v4, %v1211_v11  ;;  %v1226_v17 = vsub.f32 1.0, %v1225_v12  ;;  %v3163_v37 = vpop.eup %3162 }
 0x42b   :  { %v1247_v38 = vadd.f32 1.0, %v3163_v37 }
 0x42c   :  { %v1213_v20 = vadd.f32 %v3155_v4, %v1212_v15  ;;  %v1227_v21 = vmul.f32 %v3157_v8, %v1226_v17 }
 0x42d   :  { %3164 = vrcp.f32 %v1247_v38  ;;  %v1260_v54 = vand.u32 2147483648, %v1247_v38  ;;  %vm1254_vm13 = vweird.f32 %v1247_v38  ;;  %v1258_v55 = vand.u32 2147483647, %v1247_v38 }
 0x42e   :  { %v1217_v25 = vsel %vm1216_vm7, %v3155_v4, %v1213_v20  ;;  %v1228_v23 = vadd.f32 %v3157_v8, %v1227_v21  ;;  %3166 = vpow2.f32 %v2916_v42 }
 0x42f   :  { %v1222_v27 = vsel %vm1219_vm8, %v1221_v24, %v1217_v25  ;;  %v1261_v57 = vor.u32 1.1754944e-38, %v1260_v54  ;;  %vm1259_vm0 = vcmp.eq.f32.partialorder %v1258_v55, 8.507059e+37 }
 0x430   :  { %v1281_v33 = vmul.f32 %v3159_v26, %v1222_v27  ;;  %v1232_v34 = vsel %vm1231_vm10, %v3157_v8, %v1228_v23  ;;  %v1279_v45 = vmul.f32 0.0, %v1222_v27 }
 0x431   :  { %v1237_v28 = vsel %vm1234_vm11, %v1236_v31, %v1232_v34 }
 0x432   :  { %1285 = vrot.lane.b32.xlu2 %v1281_v33, %s3507_s18  ;;  %v1282_v36 = vmul.f32 %v3161_v35, %v1237_v28  ;;  %v1280_v4 = vmul.f32 0.0, %v1237_v28 }
 0x433   :  { %v3165_v39 = vpop.eup %3164 }
 0x434   :  { %1287 = vrot.lane.b32.xlu1 %v1282_v36, %s3507_s18  ;;  %v1250_v41 = vmul.f32 %v3165_v39, %v1247_v38  ;;  %v3167_v46 = vpop.eup %3166  ;;  %vm1255_vm12 = vweird.f32 %v3165_v39 }
 0x435   :  { %v1248_v53 = vadd.f32 1.0, %v3167_v46  ;;  %vm1256_vm14 = vmor %vm1254_vm13, %vm1255_vm12 }
 0x436   :  { %v1251_v43 = vsub.f32 1.0, %v1250_v41 }
 0x437   :  { %v1275_v10 = vand.u32 2147483648, %v1248_v53  ;;  %vm1269_vm2 = vweird.f32 %v1248_v53  ;;  %v1273_v11 = vand.u32 2147483647, %v1248_v53 }
 0x438   :  { %v1252_v44 = vmul.f32 %v3165_v39, %v1251_v43 }
 0x439   :  { %v1276_v14 = vor.u32 1.1754944e-38, %v1275_v10  ;;  %vm1274_vm5 = vcmp.eq.f32.partialorder %v1273_v11, 8.507059e+37 }
 0x43a   :  { %v1253_v52 = vadd.f32 %v3165_v39, %v1252_v44 }
 0x43c   :  { %v1257_v56 = vsel %vm1256_vm14, %v3165_v39, %v1253_v52 }
 0x43d   :  { %v1262_v60 = vsel %vm1259_vm0, %v1261_v57, %v1257_v56 }
 0x48c   :  { %v1286_v48 = vpop.permute.xlu2 %1285 }
 0x48d   :  { %v3983_v51 = vadd.f32 %v1286_v48, %v1279_v45 }
 0x48f   :  { %3168 = vtanh.f32 %v3983_v51  ;;  %v1430_v10 = vrot.slane %v3983_v51, 7 }
 0x490   :  { %3170 = vrcp.f32 %v1248_v53 }
 0x495   :  { %v3169_v59 = vpop.eup %3168 }
 0x496   :  { %v1295_v61 = vmul.f32 %v3169_v59, %v1262_v60  ;;  %v3171_v62 = vpop.eup %3170 }
 0x497   :  { %v1265_v63 = vmul.f32 %v3171_v62, %v1248_v53  ;;  %vm1270_vm1 = vweird.f32 %v3171_v62 }
 0x498   :  { %vm1271_vm4 = vmor %vm1269_vm2, %vm1270_vm1  ;;  %v1297_v18 = vpack.c.bf16 %v1295_v61, %v1295_v61 }
 0x499   :  { %v1266_v0 = vsub.f32 1.0, %v1265_v63 }
 0x49a   :  { %v1301_v22 = vunpack.c.l.b16 %v1297_v18 }
 0x49b   :  { %v1267_v2 = vmul.f32 %v3171_v62, %v1266_v0 }
 0x49d   :  { %v1268_v8 = vadd.f32 %v3171_v62, %v1267_v2 }
 0x49f   :  { %v1272_v12 = vsel %vm1271_vm4, %v3171_v62, %v1268_v8 }
 0x4a0   :  { %v1277_v13 = vsel %vm1274_vm5, %v1276_v14, %v1272_v12 }
 0x4a6   :  { %v1288_v7 = vpop.permute.xlu1 %1287 }
 0x4a7   :  { %v3986_v6 = vadd.f32 %v1288_v7, %v1280_v4 }
 0x4a9   :  { %3172 = vtanh.f32 %v3986_v6  ;;  %v1431_v0 = vrot.slane %v3986_v6, 7 }
 0x4af   :  { %v3173_v15 = vpop.eup %3172 }
 0x4b0   :  { %v1296_v17 = vmul.f32 %v3173_v15, %v1277_v13 }
 0x4b2   :  { %v1298_v20 = vpack.c.bf16 %v1296_v17, %v1296_v17 }
 0x4b4   :  { %v1302_v21 = vunpack.c.l.b16 %v1298_v20 }
 0x4b6   :  { %v1303_v24 = vrot.slane %v1302_v21, 7 }
 0x4b8   :  { %v1305_v25 = vsel %vm1304_vm3, %v1303_v24, %v1301_v22 }
 0x4b9   :  { %v1306_v23 = vpack.c.b16 %v1305_v25, %v1305_v25 }
 0x4bb   :  { %1307 = vrot.lane.b32.xlu0 %v1306_v23, %s3507_s18 }
 0x52d   :  { %v1308_v26 = vpop.permute.xlu0 %1307 }
 0x52e   :  { %2917 = vmatmul.msk.bf16.vlgmr.msrb.gmra.mxu2 %vm714_vm15, %v1308_v26  ;;  %2918 = vmatmul.msk.bf16.vlgmr.msra.gmra.mxu1 %vm714_vm15, %v1308_v26 }
 0x52f   :  { %1797 = vmatpush.bf16.msrb.mxu2 %v3893_v32  ;;  %1941 = vmatpush.bf16.msra.mxu1 %v3915_v5 }
 0x533   :  { %1798 = vmatpush.bf16.msrb.mxu2 %v3901_v29  ;;  %1942 = vmatpush.bf16.msra.mxu1 %v3920_v9 }
 0x537   :  { %1799 = vmatpush.bf16.msrb.mxu2 %v3905_v49  ;;  %1943 = vmatpush.bf16.msra.mxu1 %v3926_v16 }
 0x53b   :  { %1800 = vmatpush.bf16.msrb.mxu2 %v3908_v58  ;;  %1944 = vmatpush.bf16.msra.mxu1 %v3934_v19 }
 0x5ab   :  { %v1334_v27 = vpop.f32.mrf.mxu1 }
 0x5ac   :  { %v1341_v43 = vrot.slane %v1334_v27, 7  ;;  %v1349_v45 = vadd.f32 %v1334_v27, %v3977_v3 }
 0x5ae   :  { %v1347_v52 = vadd.f32 %v1341_v43, %v3975_v1  ;;  %v2922_v21 = vmul.f32 -1.442695, %v1349_v45 }
 0x5b0   :  { %v2921_v25 = vmul.f32 -1.442695, %v1347_v52 }
 0x5b1   :  { %v1321_v31 = vpop.f32.mrf.mxu2 }
 0x5b2   :  { %v1340_v33 = vrot.slane %v1321_v31, 7  ;;  %v1348_v34 = vadd.f32 %v1321_v31, %v3971_v50 }
 0x5b3   :  { %v1336_v35 = vpop.f32.mrf.mxu1 }
 0x5b4   :  { %v1346_v28 = vadd.f32 %v1340_v33, %v3969_v47  ;;  %v2920_v36 = vmul.f32 -1.442695, %v1348_v34 }
 0x5b6   :  { %v2919_v30 = vmul.f32 -1.442695, %v1346_v28  ;;  %3174 = vpow2.f32 %v2920_v36 }
 0x5b8   :  { %3176 = vpow2.f32 %v2919_v30 }
 0x5b9   :  { %v1323_v37 = vpop.f32.mrf.mxu2 }
 0x5bc   :  { %v3175_v38 = vpop.eup %3174 }
 0x5bd   :  { %v1357_v39 = vadd.f32 1.0, %v3175_v38 }
 0x5be   :  { %v3177_v41 = vpop.eup %3176 }
 0x5bf   :  { %v1356_v42 = vadd.f32 1.0, %v3177_v41  ;;  %3178 = vrcp.f32 %v1357_v39  ;;  %v1384_v55 = vand.u32 2147483648, %v1357_v39  ;;  %v1382_v57 = vand.u32 2147483647, %v1357_v39 }
 0x5c0   :  { %vm1378_vm7 = vweird.f32 %v1357_v39 }
 0x5c1   :  { %3180 = vrcp.f32 %v1356_v42  ;;  %v1369_v60 = vand.u32 2147483648, %v1356_v42  ;;  %v1367_v63 = vand.u32 2147483647, %v1356_v42  ;;  %v1385_v2 = vor.u32 1.1754944e-38, %v1384_v55 }
 0x5c2   :  { %3182 = vtanh.f32 %v1349_v45  ;;  %vm1383_vm10 = vcmp.eq.f32.partialorder %v1382_v57, 8.507059e+37  ;;  %vm1363_vm11 = vweird.f32 %v1356_v42 }
 0x5c3   :  { %3184 = vtanh.f32 %v1347_v52  ;;  %v1370_v12 = vor.u32 1.1754944e-38, %v1369_v60  ;;  %vm1368_vm13 = vcmp.eq.f32.partialorder %v1367_v63, 8.507059e+37 }
 0x5c4   :  { %3186 = vpow2.f32 %v2922_v21 }
 0x5c5   :  { %v3179_v44 = vpop.eup %3178 }
 0x5c6   :  { %v1374_v46 = vmul.f32 %v3179_v44, %v1357_v39  ;;  %vm1379_vm6 = vweird.f32 %v3179_v44 }
 0x5c7   :  { %v3181_v48 = vpop.eup %3180  ;;  %vm1380_vm9 = vmor %vm1378_vm7, %vm1379_vm6 }
 0x5c8   :  { %v1375_v53 = vsub.f32 1.0, %v1374_v46  ;;  %v1359_v54 = vmul.f32 %v3181_v48, %v1356_v42  ;;  %vm1364_vm8 = vweird.f32 %v3181_v48  ;;  %v3183_v8 = vpop.eup %3182 }
 0x5c9   :  { %vm1365_vm12 = vmor %vm1363_vm11, %vm1364_vm8  ;;  %v3185_v17 = vpop.eup %3184 }
 0x5ca   :  { %v1376_v56 = vmul.f32 %v3179_v44, %v1375_v53  ;;  %v1360_v59 = vsub.f32 1.0, %v1359_v54  ;;  %v3187_v22 = vpop.eup %3186 }
 0x5cb   :  { %v1397_v24 = vadd.f32 1.0, %v3187_v22 }
 0x5cc   :  { %v1377_v61 = vadd.f32 %v3179_v44, %v1376_v56  ;;  %v1361_v62 = vmul.f32 %v3181_v48, %v1360_v59 }
 0x5cd   :  { %3188 = vrcp.f32 %v1397_v24  ;;  %v1424_v36 = vand.u32 2147483648, %v1397_v24  ;;  %vm1418_vm0 = vweird.f32 %v1397_v24  ;;  %v1422_v30 = vand.u32 2147483647, %v1397_v24 }
 0x5ce   :  { %v1381_v4 = vsel %vm1380_vm9, %v3179_v44, %v1377_v61  ;;  %v1362_v7 = vadd.f32 %v3181_v48, %v1361_v62  ;;  %3190 = vpow2.f32 %v2921_v25 }
 0x5cf   :  { %v1386_v11 = vsel %vm1383_vm10, %v1385_v2, %v1381_v4  ;;  %v1425_v38 = vor.u32 1.1754944e-38, %v1424_v36  ;;  %vm1423_vm2 = vcmp.eq.f32.partialorder %v1422_v30, 8.507059e+37 }
 0x5d0   :  { %v1437_v14 = vmul.f32 %v3183_v8, %v1386_v11  ;;  %v1366_v15 = vsel %vm1365_vm12, %v3181_v48, %v1362_v7  ;;  %v1435_v13 = vmul.f32 %v1431_v0, %v1386_v11 }
 0x5d1   :  { %v1371_v18 = vsel %vm1368_vm13, %v1370_v12, %v1366_v15 }
 0x5d2   :  { %1442 = vrot.lane.b32.xlu2 %v1437_v14, %s3507_s18  ;;  %v1436_v6 = vmul.f32 %v3185_v17, %v1371_v18  ;;  %v1434_v20 = vmul.f32 %v1430_v10, %v1371_v18 }
 0x5d3   :  { %v3189_v51 = vpop.eup %3188 }
 0x5d4   :  { %1440 = vrot.lane.b32.xlu1 %v1436_v6, %s3507_s18  ;;  %v1414_v23 = vmul.f32 %v3189_v51, %v1397_v24  ;;  %v3191_v31 = vpop.eup %3190  ;;  %vm1419_vm14 = vweird.f32 %v3189_v51 }
 0x5d5   :  { %v1396_v28 = vadd.f32 1.0, %v3191_v31  ;;  %vm1420_vm1 = vmor %vm1418_vm0, %vm1419_vm14 }
 0x5d6   :  { %v1415_v26 = vsub.f32 1.0, %v1414_v23 }
 0x5d7   :  { %v1409_v54 = vand.u32 2147483648, %v1396_v28  ;;  %vm1403_vm5 = vweird.f32 %v1396_v28  ;;  %v1407_v55 = vand.u32 2147483647, %v1396_v28 }
 0x5d8   :  { %v1416_v27 = vmul.f32 %v3189_v51, %v1415_v26 }
 0x5d9   :  { %v1410_v57 = vor.u32 1.1754944e-38, %v1409_v54  ;;  %vm1408_vm7 = vcmp.eq.f32.partialorder %v1407_v55, 8.507059e+37 }
 0x5da   :  { %v1417_v35 = vadd.f32 %v3189_v51, %v1416_v27 }
 0x5dc   :  { %v1421_v37 = vsel %vm1420_vm1, %v3189_v51, %v1417_v35 }
 0x5dd   :  { %v1426_v41 = vsel %vm1423_vm2, %v1425_v38, %v1421_v37 }
 0x62c   :  { %v1443_v33 = vpop.permute.xlu2 %1442 }
 0x62d   :  { %v4009_v34 = vadd.f32 %v1443_v33, %v1435_v13 }
 0x62f   :  { %3192 = vtanh.f32 %v4009_v34 }
 0x630   :  { %3194 = vrcp.f32 %v1396_v28 }
 0x635   :  { %v3193_v39 = vpop.eup %3192 }
 0x636   :  { %v1451_v42 = vmul.f32 %v3193_v39, %v1426_v41  ;;  %v3195_v43 = vpop.eup %3194 }
 0x637   :  { %v1399_v44 = vmul.f32 %v3195_v43, %v1396_v28  ;;  %vm1404_vm4 = vweird.f32 %v3195_v43 }
 0x638   :  { %vm1405_vm6 = vmor %vm1403_vm5, %vm1404_vm4  ;;  %v1453_v63 = vpack.c.bf16 %v1451_v42, %v1451_v42 }
 0x639   :  { %v1400_v45 = vsub.f32 1.0, %v1399_v44 }
 0x63a   :  { %v1457_v2 = vunpack.c.l.b16 %v1453_v63 }
 0x63b   :  { %v1401_v46 = vmul.f32 %v3195_v43, %v1400_v45 }
 0x63d   :  { %v1402_v53 = vadd.f32 %v3195_v43, %v1401_v46 }
 0x63f   :  { %v1406_v56 = vsel %vm1405_vm6, %v3195_v43, %v1402_v53 }
 0x640   :  { %v1411_v60 = vsel %vm1408_vm7, %v1410_v57, %v1406_v56 }
 0x646   :  { %v1441_v48 = vpop.permute.xlu1 %1440 }
 0x647   :  { %v4012_v52 = vadd.f32 %v1441_v48, %v1434_v20 }
 0x649   :  { %3196 = vtanh.f32 %v4012_v52  ;;  %v1586_v54 = vrot.slane %v4012_v52, 7 }
 0x64f   :  { %v3197_v59 = vpop.eup %3196 }
 0x650   :  { %v1450_v61 = vmul.f32 %v3197_v59, %v1411_v60  ;;  %v1587_v59 = vrot.slane %v4009_v34, 7 }
 0x652   :  { %v1452_v62 = vpack.c.bf16 %v1450_v61, %v1450_v61 }
 0x654   :  { %v1456_v0 = vunpack.c.l.b16 %v1452_v62 }
 0x656   :  { %v1458_v4 = vrot.slane %v1456_v0, 1 }
 0x658   :  { %v1459_v7 = vsel %vm1304_vm3, %v1457_v2, %v1458_v4 }
 0x659   :  { %v1460_v8 = vpack.c.b16 %v1459_v7, %v1459_v7 }
 0x65b   :  { %1461 = vrot.lane.b32.xlu0 %v1460_v8, %s3507_s18 }
 0x6cd   :  { %v1462_v10 = vpop.permute.xlu0 %1461 }
 0x6ce   :  { %2923 = vmatmul.msk.bf16.vlgmr.msrb.gmra.mxu3 %vm714_vm15, %v1462_v10  ;;  %2924 = vmatmul.msk.bf16.vlgmr.msra.gmra.mxu2 %vm714_vm15, %v1462_v10 }
 0x6cf   :  { %1954 = vmatpush.bf16.msrb.mxu3 %v3893_v32  ;;  %2111 = vmatpush.bf16.msra.mxu2 %v3893_v32 }
 0x6d3   :  { %1955 = vmatpush.bf16.msrb.mxu3 %v3901_v29  ;;  %2112 = vmatpush.bf16.msra.mxu2 %v3901_v29 }
 0x6d7   :  { %1956 = vmatpush.bf16.msrb.mxu3 %v3905_v49  ;;  %2113 = vmatpush.bf16.msra.mxu2 %v3905_v49 }
 0x6db   :  { %1957 = vmatpush.bf16.msrb.mxu3 %v3908_v58  ;;  %2114 = vmatpush.bf16.msra.mxu2 %v3908_v58 }
 0x751   :  { %v1475_v11 = vpop.f32.mrf.mxu3  ;;  %v1488_v12 = vpop.f32.mrf.mxu2 }
 0x752   :  { %v1494_v14 = vrot.slane %v1475_v11, 6  ;;  %v1496_v15 = vrot.slane %v1475_v11, 7  ;;  %v1495_v23 = vrot.slane %v1488_v12, 6  ;;  %v1497_v26 = vrot.slane %v1488_v12, 7 }
 0x754   :  { %v1502_v13 = vadd.f32 %v1494_v14, %v3969_v47  ;;  %v1504_v17 = vadd.f32 %v1496_v15, %v3971_v50  ;;  %v1503_v27 = vadd.f32 %v1495_v23, %v3975_v1  ;;  %v1505_v33 = vadd.f32 %v1497_v26, %v3977_v3 }
 0x756   :  { %v2925_v18 = vmul.f32 -1.442695, %v1502_v13  ;;  %v2926_v6 = vmul.f32 -1.442695, %v1504_v17  ;;  %v2928_v52 = vmul.f32 -1.442695, %v1505_v33 }
 0x757   :  { %v2927_v11 = vmul.f32 -1.442695, %v1503_v27 }
 0x758   :  { %3198 = vpow2.f32 %v2925_v18 }
 0x759   :  { %3200 = vpow2.f32 %v2926_v6  ;;  %v1477_v20 = vpop.f32.mrf.mxu3  ;;  %v1490_v21 = vpop.f32.mrf.mxu2 }
 0x75e   :  { %v3199_v22 = vpop.eup %3198 }
 0x75f   :  { %v3201_v24 = vpop.eup %3200  ;;  %v1512_v51 = vadd.f32 1.0, %v3199_v22 }
 0x760   :  { %v1513_v25 = vadd.f32 1.0, %v3201_v24 }
 0x761   :  { %3202 = vrcp.f32 %v1512_v51  ;;  %v1525_v38 = vand.u32 2147483648, %v1512_v51  ;;  %v1523_v42 = vand.u32 2147483647, %v1512_v51  ;;  %vm1519_vm10 = vweird.f32 %v1512_v51 }
 0x762   :  { %3204 = vrcp.f32 %v1513_v25  ;;  %v1540_v39 = vand.u32 2147483648, %v1513_v25  ;;  %v1538_v44 = vand.u32 2147483647, %v1513_v25  ;;  %vm1534_vm11 = vweird.f32 %v1513_v25 }
 0x763   :  { %3206 = vtanh.f32 %v1503_v27  ;;  %v1526_v48 = vor.u32 1.1754944e-38, %v1525_v38  ;;  %vm1524_vm14 = vcmp.eq.f32.partialorder %v1523_v42, 8.507059e+37 }
 0x764   :  { %3208 = vtanh.f32 %v1505_v33  ;;  %v1541_v55 = vor.u32 1.1754944e-38, %v1540_v39  ;;  %vm1539_vm0 = vcmp.eq.f32.partialorder %v1538_v44, 8.507059e+37 }
 0x765   :  { %3210 = vpow2.f32 %v2928_v52 }
 0x767   :  { %v3203_v31 = vpop.eup %3202 }
 0x768   :  { %v3205_v35 = vpop.eup %3204  ;;  %v1515_v28 = vmul.f32 %v3203_v31, %v1512_v51  ;;  %vm1520_vm8 = vweird.f32 %v3203_v31 }
 0x769   :  { %v1530_v36 = vmul.f32 %v3205_v35, %v1513_v25  ;;  %vm1535_vm9 = vweird.f32 %v3205_v35  ;;  %vm1521_vm12 = vmor %vm1519_vm10, %vm1520_vm8  ;;  %v3207_v53 = vpop.eup %3206 }
 0x76a   :  { %v1516_v30 = vsub.f32 1.0, %v1515_v28  ;;  %vm1536_vm13 = vmor %vm1534_vm11, %vm1535_vm9  ;;  %v3209_v57 = vpop.eup %3208 }
 0x76b   :  { %v1531_v37 = vsub.f32 1.0, %v1530_v36  ;;  %v3211_v7 = vpop.eup %3210 }
 0x76c   :  { %v1517_v41 = vmul.f32 %v3203_v31, %v1516_v30  ;;  %v1553_v8 = vadd.f32 1.0, %v3211_v7 }
 0x76d   :  { %v1532_v43 = vmul.f32 %v3205_v35, %v1531_v37 }
 0x76e   :  { %v1518_v45 = vadd.f32 %v3203_v31, %v1517_v41  ;;  %3212 = vrcp.f32 %v1553_v8  ;;  %v1580_v20 = vand.u32 2147483648, %v1553_v8  ;;  %vm1574_vm2 = vweird.f32 %v1553_v8 }
 0x76f   :  { %v1533_v46 = vadd.f32 %v3205_v35, %v1532_v43  ;;  %3214 = vpow2.f32 %v2927_v11  ;;  %v1578_v21 = vand.u32 2147483647, %v1553_v8 }
 0x770   :  { %v1522_v56 = vsel %vm1521_vm12, %v3203_v31, %v1518_v45  ;;  %v1581_v24 = vor.u32 1.1754944e-38, %v1580_v20 }
 0x771   :  { %v1537_v60 = vsel %vm1536_vm13, %v3205_v35, %v1533_v46  ;;  %v1527_v61 = vsel %vm1524_vm14, %v1526_v48, %v1522_v56  ;;  %vm1579_vm5 = vcmp.eq.f32.partialorder %v1578_v21, 8.507059e+37 }
 0x772   :  { %v1542_v62 = vsel %vm1539_vm0, %v1541_v55, %v1537_v60  ;;  %v1592_v63 = vmul.f32 %v3207_v53, %v1527_v61  ;;  %v1590_v0 = vmul.f32 %v1586_v54, %v1527_v61 }
 0x773   :  { %v1593_v2 = vmul.f32 %v3209_v57, %v1542_v62  ;;  %v1591_v4 = vmul.f32 %v1587_v59, %v1542_v62 }
 0x774   :  { %1596 = vrot.lane.b32.xlu1 %v1592_v63, %s3507_s18  ;;  %v3213_v10 = vpop.eup %3212 }
 0x775   :  { %1598 = vrot.lane.b32.xlu2 %v1593_v2, %s3507_s18  ;;  %v1570_v34 = vmul.f32 %v3213_v10, %v1553_v8  ;;  %v3215_v14 = vpop.eup %3214  ;;  %vm1575_vm1 = vweird.f32 %v3213_v10 }
 0x776   :  { %v1552_v13 = vadd.f32 1.0, %v3215_v14  ;;  %vm1576_vm4 = vmor %vm1574_vm2, %vm1575_vm1 }
 0x777   :  { %v1571_v12 = vsub.f32 1.0, %v1570_v34 }
 0x778   :  { %v1565_v30 = vand.u32 2147483648, %v1552_v13  ;;  %vm1559_vm7 = vweird.f32 %v1552_v13  ;;  %v1563_v37 = vand.u32 2147483647, %v1552_v13 }
 0x779   :  { %v1572_v15 = vmul.f32 %v3213_v10, %v1571_v12 }
 0x77a   :  { %v1566_v39 = vor.u32 1.1754944e-38, %v1565_v30  ;;  %vm1564_vm9 = vcmp.eq.f32.partialorder %v1563_v37, 8.507059e+37 }
 0x77b   :  { %v1573_v6 = vadd.f32 %v3213_v10, %v1572_v15 }
 0x77d   :  { %v1577_v22 = vsel %vm1576_vm4, %v3213_v10, %v1573_v6 }
 0x77e   :  { %v1582_v25 = vsel %vm1579_vm5, %v1581_v24, %v1577_v22 }
 0x7cf   :  { %v1599_v17 = vpop.permute.xlu2 %1598 }
 0x7d0   :  { %v4035_v18 = vadd.f32 %v1599_v17, %v1591_v4 }
 0x7d2   :  { %3216 = vtanh.f32 %v4035_v18 }
 0x7d3   :  { %3218 = vrcp.f32 %v1552_v13 }
 0x7d8   :  { %v3217_v51 = vpop.eup %3216 }
 0x7d9   :  { %v3219_v23 = vpop.eup %3218  ;;  %v1607_v26 = vmul.f32 %v3217_v51, %v1582_v25 }
 0x7da   :  { %v1555_v27 = vmul.f32 %v3219_v23, %v1552_v13  ;;  %vm1560_vm6 = vweird.f32 %v3219_v23 }
 0x7db   :  { %vm1561_vm8 = vmor %vm1559_vm7, %vm1560_vm6  ;;  %v1609_v41 = vpack.c.bf16 %v1607_v26, %v1607_v26 }
 0x7dc   :  { %v1556_v31 = vsub.f32 1.0, %v1555_v27 }
 0x7dd   :  { %v1613_v46 = vunpack.c.l.b16 %v1609_v41 }
 0x7de   :  { %v1557_v33 = vmul.f32 %v3219_v23, %v1556_v31 }
 0x7df   :  { %v1615_v54 = vrot.slane %v1613_v46, 1 }
 0x7e0   :  { %v1558_v36 = vadd.f32 %v3219_v23, %v1557_v33  ;;  %v1744_v33 = vrot.slane %v4035_v18, 7 }
 0x7e2   :  { %v1562_v38 = vsel %vm1561_vm8, %v3219_v23, %v1558_v36 }
 0x7e3   :  { %v1567_v43 = vsel %vm1564_vm9, %v1566_v39, %v1562_v38 }
 0x7e6   :  { %v1597_v35 = vpop.permute.xlu1 %1596 }
 0x7e7   :  { %v4038_v28 = vadd.f32 %v1597_v35, %v1590_v0 }
 0x7e9   :  { %3220 = vtanh.f32 %v4038_v28  ;;  %v1743_v23 = vrot.slane %v4038_v28, 7 }
 0x7ef   :  { %v3221_v42 = vpop.eup %3220 }
 0x7f0   :  { %v1606_v44 = vmul.f32 %v3221_v42, %v1567_v43 }
 0x7f2   :  { %v1608_v45 = vpack.c.bf16 %v1606_v44, %v1606_v44 }
 0x7f4   :  { %v1612_v48 = vunpack.c.l.b16 %v1608_v45 }
 0x7f6   :  { %v1614_v53 = vrot.slane %v1612_v48, 2 }
 0x7f8   :  { %v1616_v55 = vsel %vm1304_vm3, %v1615_v54, %v1614_v53 }
 0x7f9   :  { %v1617_v56 = vpack.c.b16 %v1616_v55, %v1616_v55 }
 0x7fb   :  { %1618 = vrot.lane.b32.xlu0 %v1617_v56, %s3507_s18 }
 0x86d   :  { %v1619_v57 = vpop.permute.xlu0 %1618 }
 0x86e   :  { %2929 = vmatmul.msk.bf16.vlgmr.msrb.gmra.mxu1 %vm714_vm15, %v1619_v57  ;;  %2930 = vmatmul.msk.bf16.vlgmr.msra.gmra.mxu3 %vm714_vm15, %v1619_v57 }
 0x86f   :  { %2255 = vmatpush.bf16.msrb.mxu1 %v3915_v5  ;;  %2268 = vmatpush.bf16.msra.mxu3 %v3893_v32 }
 0x873   :  { %2256 = vmatpush.bf16.msrb.mxu1 %v3920_v9  ;;  %2269 = vmatpush.bf16.msra.mxu3 %v3901_v29 }
 0x877   :  { %2257 = vmatpush.bf16.msrb.mxu1 %v3926_v16  ;;  %2270 = vmatpush.bf16.msra.mxu3 %v3905_v49 }
 0x87b   :  { %2258 = vmatpush.bf16.msrb.mxu1 %v3934_v19  ;;  %2271 = vmatpush.bf16.msra.mxu3 %v3908_v58 }
 0x8eb   :  { %v1632_v59 = vpop.f32.mrf.mxu1 }
 0x8ec   :  { %v1651_v60 = vrot.slane %v1632_v59, 5  ;;  %v1653_v61 = vrot.slane %v1632_v59, 6 }
 0x8ee   :  { %v1659_v62 = vadd.f32 %v1651_v60, %v3969_v47  ;;  %v1661_v5 = vadd.f32 %v1653_v61, %v3971_v50 }
 0x8f0   :  { %v2931_v32 = vmul.f32 -1.442695, %v1659_v62  ;;  %v2932_v63 = vmul.f32 -1.442695, %v1661_v5 }
 0x8f1   :  { %v1645_v9 = vpop.f32.mrf.mxu3 }
 0x8f2   :  { %3222 = vpow2.f32 %v2931_v32  ;;  %v1652_v58 = vrot.slane %v1645_v9, 5  ;;  %v1654_v4 = vrot.slane %v1645_v9, 6 }
 0x8f3   :  { %3224 = vpow2.f32 %v2932_v63  ;;  %v1634_v29 = vpop.f32.mrf.mxu1 }
 0x8f4   :  { %v1660_v52 = vadd.f32 %v1652_v58, %v3975_v1  ;;  %v1662_v8 = vadd.f32 %v1654_v4, %v3977_v3 }
 0x8f6   :  { %v2934_v28 = vmul.f32 -1.442695, %v1662_v8  ;;  %v2933_v45 = vmul.f32 -1.442695, %v1660_v52 }
 0x8f8   :  { %v3223_v16 = vpop.eup %3222 }
 0x8f9   :  { %v3225_v0 = vpop.eup %3224  ;;  %v1669_v49 = vadd.f32 1.0, %v3223_v16  ;;  %v1647_v2 = vpop.f32.mrf.mxu3 }
 0x8fa   :  { %v1670_v19 = vadd.f32 1.0, %v3225_v0 }
 0x8fb   :  { %3226 = vrcp.f32 %v1669_v49  ;;  %v1682_v15 = vand.u32 2147483648, %v1669_v49  ;;  %v1680_v6 = vand.u32 2147483647, %v1669_v49  ;;  %vm1676_vm12 = vweird.f32 %v1669_v49 }
 0x8fc   :  { %3228 = vrcp.f32 %v1670_v19  ;;  %v1697_v13 = vand.u32 2147483648, %v1670_v19  ;;  %v1695_v21 = vand.u32 2147483647, %v1670_v19  ;;  %vm1691_vm13 = vweird.f32 %v1670_v19 }
 0x8fd   :  { %3230 = vtanh.f32 %v1660_v52  ;;  %v1683_v51 = vor.u32 1.1754944e-38, %v1682_v15  ;;  %vm1681_vm1 = vcmp.eq.f32.partialorder %v1680_v6, 8.507059e+37 }
 0x8fe   :  { %3232 = vtanh.f32 %v1662_v8  ;;  %v1698_v26 = vor.u32 1.1754944e-38, %v1697_v13  ;;  %vm1696_vm2 = vcmp.eq.f32.partialorder %v1695_v21, 8.507059e+37 }
 0x8ff   :  { %3234 = vpow2.f32 %v2934_v28 }
 0x901   :  { %v3227_v7 = vpop.eup %3226 }
 0x902   :  { %v3229_v10 = vpop.eup %3228  ;;  %v1672_v11 = vmul.f32 %v3227_v7, %v1669_v49  ;;  %vm1677_vm10 = vweird.f32 %v3227_v7 }
 0x903   :  { %v1687_v34 = vmul.f32 %v3229_v10, %v1670_v19  ;;  %vm1692_vm11 = vweird.f32 %v3229_v10  ;;  %vm1678_vm14 = vmor %vm1676_vm12, %vm1677_vm10  ;;  %v3231_v25 = vpop.eup %3230 }
 0x904   :  { %v1673_v12 = vsub.f32 1.0, %v1672_v11  ;;  %vm1693_vm0 = vmor %vm1691_vm13, %vm1692_vm11  ;;  %v3233_v31 = vpop.eup %3232 }
 0x905   :  { %v1688_v14 = vsub.f32 1.0, %v1687_v34  ;;  %v3235_v42 = vpop.eup %3234 }
 0x906   :  { %v1674_v17 = vmul.f32 %v3227_v7, %v1673_v12  ;;  %v1710_v43 = vadd.f32 1.0, %v3235_v42 }
 0x907   :  { %v1689_v20 = vmul.f32 %v3229_v10, %v1688_v14 }
 0x908   :  { %v1675_v22 = vadd.f32 %v3227_v7, %v1674_v17  ;;  %3236 = vrcp.f32 %v1710_v43  ;;  %v1737_v59 = vand.u32 2147483648, %v1710_v43  ;;  %vm1731_vm5 = vweird.f32 %v1710_v43 }
 0x909   :  { %v1690_v24 = vadd.f32 %v3229_v10, %v1689_v20  ;;  %3238 = vpow2.f32 %v2933_v45  ;;  %v1735_v60 = vand.u32 2147483647, %v1710_v43 }
 0x90a   :  { %v1679_v27 = vsel %vm1678_vm14, %v3227_v7, %v1675_v22  ;;  %v1738_v62 = vor.u32 1.1754944e-38, %v1737_v59 }
 0x90b   :  { %v1694_v35 = vsel %vm1693_vm0, %v3229_v10, %v1690_v24  ;;  %v1684_v36 = vsel %vm1681_vm1, %v1683_v51, %v1679_v27  ;;  %vm1736_vm7 = vcmp.eq.f32.partialorder %v1735_v60, 8.507059e+37 }
 0x90c   :  { %v1699_v30 = vsel %vm1696_vm2, %v1698_v26, %v1694_v35  ;;  %v1749_v37 = vmul.f32 %v3231_v25, %v1684_v36  ;;  %v1747_v38 = vmul.f32 %v1743_v23, %v1684_v36 }
 0x90d   :  { %v1750_v39 = vmul.f32 %v3233_v31, %v1699_v30  ;;  %v1748_v41 = vmul.f32 %v1744_v33, %v1699_v30 }
 0x90e   :  { %1753 = vrot.lane.b32.xlu1 %v1749_v37, %s3507_s18  ;;  %v3237_v44 = vpop.eup %3236 }
 0x90f   :  { %1755 = vrot.lane.b32.xlu2 %v1750_v39, %s3507_s18  ;;  %v1727_v18 = vmul.f32 %v3237_v44, %v1710_v43  ;;  %v3239_v48 = vpop.eup %3238  ;;  %vm1732_vm4 = vweird.f32 %v3237_v44 }
 0x910   :  { %v1709_v54 = vadd.f32 1.0, %v3239_v48  ;;  %vm1733_vm6 = vmor %vm1731_vm5, %vm1732_vm4 }
 0x911   :  { %v1728_v46 = vsub.f32 1.0, %v1727_v18 }
 0x912   :  { %v1722_v58 = vand.u32 2147483648, %v1709_v54  ;;  %vm1716_vm9 = vweird.f32 %v1709_v54  ;;  %v1720_v4 = vand.u32 2147483647, %v1709_v54 }
 0x913   :  { %v1729_v53 = vmul.f32 %v3237_v44, %v1728_v46 }
 0x914   :  { %v1723_v7 = vor.u32 1.1754944e-38, %v1722_v58  ;;  %vm1721_vm11 = vcmp.eq.f32.partialorder %v1720_v4, 8.507059e+37 }
 0x915   :  { %v1730_v57 = vadd.f32 %v3237_v44, %v1729_v53 }
 0x917   :  { %v1734_v61 = vsel %vm1733_vm6, %v3237_v44, %v1730_v57 }
 0x918   :  { %v1739_v32 = vsel %vm1736_vm7, %v1738_v62, %v1734_v61 }
 0x969   :  { %v1756_v55 = vpop.permute.xlu2 %1755 }
 0x96a   :  { %v4061_v56 = vadd.f32 %v1756_v55, %v1748_v41 }
 0x96c   :  { %3240 = vtanh.f32 %v4061_v56 }
 0x96d   :  { %3242 = vrcp.f32 %v1709_v54 }
 0x972   :  { %v3241_v5 = vpop.eup %3240 }
 0x973   :  { %v3243_v63 = vpop.eup %3242  ;;  %v1764_v9 = vmul.f32 %v3241_v5, %v1739_v32 }
 0x974   :  { %v1712_v29 = vmul.f32 %v3243_v63, %v1709_v54  ;;  %vm1717_vm8 = vweird.f32 %v3243_v63 }
 0x975   :  { %vm1718_vm10 = vmor %vm1716_vm9, %vm1717_vm8  ;;  %v1766_v8 = vpack.c.bf16 %v1764_v9, %v1764_v9 }
 0x976   :  { %v1713_v16 = vsub.f32 1.0, %v1712_v29 }
 0x977   :  { %v1770_v14 = vunpack.c.l.b16 %v1766_v8 }
 0x978   :  { %v1714_v0 = vmul.f32 %v3243_v63, %v1713_v16 }
 0x979   :  { %v1772_v17 = vrot.slane %v1770_v14, 2 }
 0x97a   :  { %v1715_v19 = vadd.f32 %v3243_v63, %v1714_v0  ;;  %v1901_v0 = vrot.slane %v4061_v56, 7 }
 0x97c   :  { %v1719_v52 = vsel %vm1718_vm10, %v3243_v63, %v1715_v19 }
 0x97d   :  { %v1724_v11 = vsel %vm1721_vm11, %v1723_v7, %v1719_v52 }
 0x980   :  { %v1754_v49 = vpop.permute.xlu1 %1753 }
 0x981   :  { %v4064_v2 = vadd.f32 %v1754_v49, %v1747_v38 }
 0x983   :  { %3244 = vtanh.f32 %v4064_v2  ;;  %v1900_v63 = vrot.slane %v4064_v2, 7 }
 0x989   :  { %v3245_v10 = vpop.eup %3244 }
 0x98a   :  { %v1763_v34 = vmul.f32 %v3245_v10, %v1724_v11 }
 0x98c   :  { %v1765_v12 = vpack.c.bf16 %v1763_v34, %v1763_v34 }
 0x98e   :  { %v1769_v15 = vunpack.c.l.b16 %v1765_v12 }
 0x990   :  { %v1771_v13 = vrot.slane %v1769_v15, 3 }
 0x992   :  { %v1773_v6 = vsel %vm1304_vm3, %v1772_v17, %v1771_v13 }
 0x993   :  { %v1774_v20 = vpack.c.b16 %v1773_v6, %v1773_v6 }
 0x995   :  { %1775 = vrot.lane.b32.xlu0 %v1774_v20, %s3507_s18 }
 0xa07   :  { %v1776_v21 = vpop.permute.xlu0 %1775 }
 0xa08   :  { %2935 = vmatmul.msk.bf16.vlgmr.msrb.gmra.mxu0 %vm714_vm15, %v1776_v21  ;;  %2936 = vmatmul.msk.bf16.vlgmr.msrb.gmra.mxu2 %vm714_vm15, %v1776_v21 }
 0xa85   :  { %v1789_v22 = vpop.f32.mrf.mxu0 }
 0xa86   :  { %v1808_v24 = vrot.slane %v1789_v22, 4  ;;  %v1810_v51 = vrot.slane %v1789_v22, 5 }
 0xa88   :  { %v1816_v25 = vadd.f32 %v1808_v24, %v3969_v47  ;;  %v1818_v23 = vadd.f32 %v1810_v51, %v3971_v50 }
 0xa8a   :  { %v2937_v26 = vmul.f32 -1.442695, %v1816_v25  ;;  %v2938_v27 = vmul.f32 -1.442695, %v1818_v23 }
 0xa8b   :  { %v1802_v31 = vpop.f32.mrf.mxu2 }
 0xa8c   :  { %3246 = vpow2.f32 %v2937_v26  ;;  %v1809_v39 = vrot.slane %v1802_v31, 4  ;;  %v1811_v41 = vrot.slane %v1802_v31, 5 }
 0xa8d   :  { %3248 = vpow2.f32 %v2938_v27  ;;  %v1791_v33 = vpop.f32.mrf.mxu0 }
 0xa8e   :  { %v1817_v28 = vadd.f32 %v1809_v39, %v3975_v1  ;;  %v1819_v43 = vadd.f32 %v1811_v41, %v3977_v3 }
 0xa90   :  { %v2940_v2 = vmul.f32 -1.442695, %v1819_v43  ;;  %v2939_v12 = vmul.f32 -1.442695, %v1817_v28 }
 0xa92   :  { %v3247_v35 = vpop.eup %3246 }
 0xa93   :  { %v3249_v36 = vpop.eup %3248  ;;  %v1826_v30 = vadd.f32 1.0, %v3247_v35  ;;  %v1804_v37 = vpop.f32.mrf.mxu2 }
 0xa94   :  { %v1827_v38 = vadd.f32 1.0, %v3249_v36 }
 0xa95   :  { %3250 = vrcp.f32 %v1826_v30  ;;  %v1839_v53 = vand.u32 2147483648, %v1826_v30  ;;  %v1837_v57 = vand.u32 2147483647, %v1826_v30  ;;  %vm1833_vm14 = vweird.f32 %v1826_v30 }
 0xa96   :  { %3252 = vrcp.f32 %v1827_v38  ;;  %v1854_v54 = vand.u32 2147483648, %v1827_v38  ;;  %v1852_v60 = vand.u32 2147483647, %v1827_v38  ;;  %vm1848_vm0 = vweird.f32 %v1827_v38 }
 0xa97   :  { %3254 = vtanh.f32 %v1817_v28  ;;  %v1840_v5 = vor.u32 1.1754944e-38, %v1839_v53  ;;  %vm1838_vm4 = vcmp.eq.f32.partialorder %v1837_v57, 8.507059e+37 }
 0xa98   :  { %3256 = vtanh.f32 %v1819_v43  ;;  %v1855_v9 = vor.u32 1.1754944e-38, %v1854_v54  ;;  %vm1853_vm5 = vcmp.eq.f32.partialorder %v1852_v60, 8.507059e+37 }
 0xa99   :  { %3258 = vpow2.f32 %v2940_v2 }
 0xa9b   :  { %v3251_v42 = vpop.eup %3250 }
 0xa9c   :  { %v3253_v44 = vpop.eup %3252  ;;  %v1829_v45 = vmul.f32 %v3251_v42, %v1826_v30  ;;  %vm1834_vm12 = vweird.f32 %v3251_v42 }
 0xa9d   :  { %v1844_v18 = vmul.f32 %v3253_v44, %v1827_v38  ;;  %vm1849_vm13 = vweird.f32 %v3253_v44  ;;  %vm1835_vm1 = vmor %vm1833_vm14, %vm1834_vm12  ;;  %v3255_v32 = vpop.eup %3254 }
 0xa9e   :  { %v1830_v46 = vsub.f32 1.0, %v1829_v45  ;;  %vm1850_vm2 = vmor %vm1848_vm0, %vm1849_vm13  ;;  %v3257_v16 = vpop.eup %3256 }
 0xa9f   :  { %v1845_v48 = vsub.f32 1.0, %v1844_v18  ;;  %v3259_v10 = vpop.eup %3258 }
 0xaa0   :  { %v1831_v55 = vmul.f32 %v3251_v42, %v1830_v46  ;;  %v1867_v11 = vadd.f32 1.0, %v3259_v10 }
 0xaa1   :  { %v1846_v59 = vmul.f32 %v3253_v44, %v1845_v48 }
 0xaa2   :  { %v1832_v61 = vadd.f32 %v3251_v42, %v1831_v55  ;;  %3260 = vrcp.f32 %v1867_v11  ;;  %v1894_v22 = vand.u32 2147483648, %v1867_v11  ;;  %vm1888_vm7 = vweird.f32 %v1867_v11 }
 0xaa3   :  { %v1847_v62 = vadd.f32 %v3253_v44, %v1846_v59  ;;  %3262 = vpow2.f32 %v2939_v12  ;;  %v1892_v24 = vand.u32 2147483647, %v1867_v11 }
 0xaa4   :  { %v1836_v29 = vsel %vm1835_vm1, %v3251_v42, %v1832_v61  ;;  %v1895_v25 = vor.u32 1.1754944e-38, %v1894_v22 }
 0xaa5   :  { %v1851_v49 = vsel %vm1850_vm2, %v3253_v44, %v1847_v62  ;;  %v1841_v19 = vsel %vm1838_vm4, %v1840_v5, %v1836_v29  ;;  %vm1893_vm9 = vcmp.eq.f32.partialorder %v1892_v24, 8.507059e+37 }
 0xaa6   :  { %v1856_v58 = vsel %vm1853_vm5, %v1855_v9, %v1851_v49  ;;  %v1906_v4 = vmul.f32 %v3255_v32, %v1841_v19  ;;  %v1904_v52 = vmul.f32 %v1900_v63, %v1841_v19 }
 0xaa7   :  { %v1907_v7 = vmul.f32 %v3257_v16, %v1856_v58  ;;  %v1905_v8 = vmul.f32 %v1901_v0, %v1856_v58 }
 0xaa8   :  { %1910 = vrot.lane.b32.xlu1 %v1906_v4, %s3507_s18  ;;  %v3261_v34 = vpop.eup %3260 }
 0xaa9   :  { %1912 = vrot.lane.b32.xlu2 %v1907_v7, %s3507_s18  ;;  %v1884_v56 = vmul.f32 %v3261_v34, %v1867_v11  ;;  %v3263_v15 = vpop.eup %3262  ;;  %vm1889_vm6 = vweird.f32 %v3261_v34 }
 0xaaa   :  { %v1866_v17 = vadd.f32 1.0, %v3263_v15  ;;  %vm1890_vm8 = vmor %vm1888_vm7, %vm1889_vm6 }
 0xaab   :  { %v1885_v14 = vsub.f32 1.0, %v1884_v56 }
 0xaac   :  { %v1879_v39 = vand.u32 2147483648, %v1866_v17  ;;  %vm1873_vm11 = vweird.f32 %v1866_v17  ;;  %v1877_v41 = vand.u32 2147483647, %v1866_v17 }
 0xaad   :  { %v1886_v13 = vmul.f32 %v3261_v34, %v1885_v14 }
 0xaae   :  { %v1880_v42 = vor.u32 1.1754944e-38, %v1879_v39  ;;  %vm1878_vm13 = vcmp.eq.f32.partialorder %v1877_v41, 8.507059e+37 }
 0xaaf   :  { %v1887_v21 = vadd.f32 %v3261_v34, %v1886_v13 }
 0xab1   :  { %v1891_v51 = vsel %vm1890_vm8, %v3261_v34, %v1887_v21 }
 0xab2   :  { %v1896_v26 = vsel %vm1893_vm9, %v1895_v25, %v1891_v51 }
 0xb03   :  { %v1913_v6 = vpop.permute.xlu2 %1912 }
 0xb04   :  { %v4079_v20 = vadd.f32 %v1913_v6, %v1905_v8 }
 0xb06   :  { %3264 = vtanh.f32 %v4079_v20 }
 0xb07   :  { %3266 = vrcp.f32 %v1866_v17 }
 0xb0c   :  { %v3265_v23 = vpop.eup %3264 }
 0xb0d   :  { %v3267_v27 = vpop.eup %3266  ;;  %v1921_v31 = vmul.f32 %v3265_v23, %v1896_v26 }
 0xb0e   :  { %v1869_v33 = vmul.f32 %v3267_v27, %v1866_v17  ;;  %vm1874_vm10 = vweird.f32 %v3267_v27 }
 0xb0f   :  { %vm1875_vm12 = vmor %vm1873_vm11, %vm1874_vm10  ;;  %v1923_v43 = vpack.c.bf16 %v1921_v31, %v1921_v31 }
 0xb10   :  { %v1870_v35 = vsub.f32 1.0, %v1869_v33 }
 0xb11   :  { %v1927_v48 = vunpack.c.l.b16 %v1923_v43 }
 0xb12   :  { %v1871_v36 = vmul.f32 %v3267_v27, %v1870_v35 }
 0xb13   :  { %v1929_v55 = vrot.slane %v1927_v48, 3 }
 0xb14   :  { %v1872_v38 = vadd.f32 %v3267_v27, %v1871_v36  ;;  %v2058_v36 = vrot.slane %v4079_v20, 7 }
 0xb16   :  { %v1876_v28 = vsel %vm1875_vm12, %v3267_v27, %v1872_v38 }
 0xb17   :  { %v1881_v45 = vsel %vm1878_vm13, %v1880_v42, %v1876_v28 }
 0xb1a   :  { %v1911_v30 = vpop.permute.xlu1 %1910 }
 0xb1b   :  { %v4082_v37 = vadd.f32 %v1911_v30, %v1904_v52 }
 0xb1d   :  { %3268 = vtanh.f32 %v4082_v37  ;;  %v2057_v27 = vrot.slane %v4082_v37, 7 }
 0xb23   :  { %v3269_v44 = vpop.eup %3268 }
 0xb24   :  { %v1920_v18 = vmul.f32 %v3269_v44, %v1881_v45 }
 0xb26   :  { %v1922_v46 = vpack.c.bf16 %v1920_v18, %v1920_v18 }
 0xb28   :  { %v1926_v53 = vunpack.c.l.b16 %v1922_v46 }
 0xb2a   :  { %v1928_v54 = vrot.slane %v1926_v53, 4 }
 0xb2c   :  { %v1930_v57 = vsel %vm1304_vm3, %v1929_v55, %v1928_v54 }
 0xb2d   :  { %v1931_v59 = vpack.c.b16 %v1930_v57, %v1930_v57 }
 0xb2f   :  { %1932 = vrot.lane.b32.xlu0 %v1931_v59, %s3507_s18 }
 0xba1   :  { %v1933_v60 = vpop.permute.xlu0 %1932 }
 0xba2   :  { %2941 = vmatmul.msk.bf16.vlgmr.msra.gmra.mxu1 %vm714_vm15, %v1933_v60  ;;  %2942 = vmatmul.msk.bf16.vlgmr.msrb.gmra.mxu3 %vm714_vm15, %v1933_v60 }
 0xc1f   :  { %v1946_v61 = vpop.f32.mrf.mxu1 }
 0xc20   :  { %v1965_v62 = vrot.slane %v1946_v61, 3  ;;  %v1967_v5 = vrot.slane %v1946_v61, 4 }
 0xc22   :  { %v1973_v32 = vadd.f32 %v1965_v62, %v3969_v47  ;;  %v1975_v63 = vadd.f32 %v1967_v5, %v3971_v50 }
 0xc24   :  { %v2943_v9 = vmul.f32 -1.442695, %v1973_v32  ;;  %v2944_v29 = vmul.f32 -1.442695, %v1975_v63 }
 0xc25   :  { %v1959_v16 = vpop.f32.mrf.mxu3 }
 0xc26   :  { %3270 = vpow2.f32 %v2943_v9  ;;  %v1966_v7 = vrot.slane %v1959_v16, 3  ;;  %v1968_v8 = vrot.slane %v1959_v16, 4 }
 0xc27   :  { %3272 = vpow2.f32 %v2944_v29  ;;  %v1948_v0 = vpop.f32.mrf.mxu1 }
 0xc28   :  { %v1974_v2 = vadd.f32 %v1966_v7, %v3975_v1  ;;  %v1976_v11 = vadd.f32 %v1968_v8, %v3977_v3  ;;  %v3019_v0 = vld [vmem:[%s4304_s10 + $0x70] sm:$0xf]  ;;  %v3011_v7 = vld [vmem:[%s4304_s10 + $0x60] sm:$0xf]  ;;  %v3120_v8 = vld [vmem:[%s4304_s10 + $0x64] sm:$0xf0] }
 0xc2a   :  { %v2946_v37 = vmul.f32 -1.442695, %v1976_v11  ;;  %v2945_v20 = vmul.f32 -1.442695, %v1974_v2 }
 0xc2c   :  { %v3271_v49 = vpop.eup %3270 }
 0xc2d   :  { %v3273_v19 = vpop.eup %3272  ;;  %v1983_v58 = vadd.f32 1.0, %v3271_v49  ;;  %v1961_v4 = vpop.f32.mrf.mxu3  ;;  %v3122_v49 = vld [vmem:[%s4304_s10 + $0x74] sm:$0xf0] }
 0xc2e   :  { %v1984_v52 = vadd.f32 1.0, %v3273_v19  ;;  %v3121_v19 = vld [vmem:[%s4304_s10 + $0x74] sm:$0xf]  ;;  %v3020_v4 = vor.u32 %v3122_v49, %v3019_v0  ;;  %v3110_v0 = vld [vmem:[%s4304_s10 + $0x14] sm:$0xf0] }
 0xc2f   :  { %3274 = vrcp.f32 %v1983_v58  ;;  %v1996_v13 = vand.u32 2147483648, %v1983_v58  ;;  %v1994_v21 = vand.u32 2147483647, %v1983_v58  ;;  %vm1990_vm1 = vweird.f32 %v1983_v58  ;;  %v3109_v49 = vld [vmem:[%s4304_s10 + $0x14] sm:$0xf] }
 0xc30   :  { %3276 = vrcp.f32 %v1984_v52  ;;  %v2011_v17 = vand.u32 2147483648, %v1984_v52  ;;  %v2009_v24 = vand.u32 2147483647, %v1984_v52  ;;  %vm2005_vm2 = vweird.f32 %v1984_v52  ;;  %2504 = vmatpush.bf16.msrb.mxu0 %v3020_v4 }
 0xc31   :  { %3278 = vtanh.f32 %v1974_v2  ;;  %v1997_v23 = vor.u32 1.1754944e-38, %v1996_v13  ;;  %vm1995_vm6 = vcmp.eq.f32.partialorder %v1994_v21, 8.507059e+37  ;;  %v3117_v13 = vld [vmem:[%s4304_s10 + $0x54] sm:$0xf] }
 0xc32   :  { %3280 = vtanh.f32 %v1976_v11  ;;  %v2012_v31 = vor.u32 1.1754944e-38, %v2011_v17  ;;  %vm2010_vm7 = vcmp.eq.f32.partialorder %v2009_v24, 8.507059e+37  ;;  %v3013_v11 = vld [vmem:[%s4304_s10 + $0x68] sm:$0xf0]  ;;  %v3005_v17 = vld [vmem:[%s4304_s10 + $0x58] sm:$0xf0] }
 0xc33   :  { %3282 = vpow2.f32 %v2946_v37  ;;  %v3008_v21 = vor.u32 %v3117_v13, %v3005_v17  ;;  %v3116_v24 = vld [vmem:[%s4304_s10 + $0x44] sm:$0xf0] }
 0xc35   :  { %v3275_v10 = vpop.eup %3274 }
 0xc36   :  { %v3277_v34 = vpop.eup %3276  ;;  %v1986_v12 = vmul.f32 %v3275_v10, %v1983_v58  ;;  %vm1991_vm14 = vweird.f32 %v3275_v10 }
 0xc37   :  { %v2001_v56 = vmul.f32 %v3277_v34, %v1984_v52  ;;  %vm2006_vm0 = vweird.f32 %v3277_v34  ;;  %vm1992_vm4 = vmor %vm1990_vm1, %vm1991_vm14  ;;  %v3279_v26 = vpop.eup %3278  ;;  %v3021_v52 = vld [vmem:[%s4304_s10 + $0x78] sm:$0xf0] }
 0xc38   :  { %v1987_v14 = vsub.f32 1.0, %v1986_v12  ;;  %vm2007_vm5 = vmor %vm2005_vm2, %vm2006_vm0  ;;  %v3281_v35 = vpop.eup %3280  ;;  %v3024_v2 = vor.u32 %v3121_v19, %v3021_v52  ;;  %v2973_v19 = vld [vmem:[%s4304_s10 + $0x18] sm:$0xf0]  ;;  %v2963_v52 = vld [vmem:[%s4304_s10] sm:$0xf] }
 0xc39   :  { %v2002_v15 = vsub.f32 1.0, %v2001_v56  ;;  %v3283_v44 = vpop.eup %3282  ;;  %v3003_v56 = vld [vmem:[%s4304_s10 + $0x50] sm:$0xf]  ;;  %v2976_v4 = vor.u32 %v3109_v49, %v2973_v19 }
 0xc3a   :  { %v1988_v6 = vmul.f32 %v3275_v10, %v1987_v14  ;;  %v2024_v45 = vadd.f32 1.0, %v3283_v44  ;;  %2517 = vmatpush.bf16.msrb.mxu2 %v3024_v2  ;;  %v3118_v14 = vld [vmem:[%s4304_s10 + $0x54] sm:$0xf0]  ;;  %v2965_v2 = vld [vmem:[%s4304_s10 + $0x8] sm:$0xf0] }
 0xc3b   :  { %v2003_v22 = vmul.f32 %v3277_v34, %v2002_v15 }
 0xc3c   :  { %v1989_v51 = vadd.f32 %v3275_v10, %v1988_v6  ;;  %3284 = vrcp.f32 %v2024_v45  ;;  %v2051_v61 = vand.u32 2147483648, %v2024_v45  ;;  %vm2045_vm9 = vweird.f32 %v2024_v45 }
 0xc3d   :  { %v2004_v25 = vadd.f32 %v3277_v34, %v2003_v22  ;;  %3286 = vpow2.f32 %v2945_v20  ;;  %v2049_v62 = vand.u32 2147483647, %v2024_v45  ;;  %v3004_v6 = vor.u32 %v3118_v14, %v3003_v56  ;;  %v2995_v22 = vld [vmem:[%s4304_s10 + $0x40] sm:$0xf] }
 0xc3e   :  { %v1993_v33 = vsel %vm1992_vm4, %v3275_v10, %v1989_v51  ;;  %v2052_v32 = vor.u32 1.1754944e-38, %v2051_v61  ;;  %v3119_v10 = vld [vmem:[%s4304_s10 + $0x64] sm:$0xf]  ;;  %v2979_v61 = vld [vmem:[%s4304_s10 + $0x20] sm:$0xf] }
 0xc3f   :  { %v2008_v30 = vsel %vm2007_vm5, %v3277_v34, %v2004_v25  ;;  %v1998_v38 = vsel %vm1995_vm6, %v1997_v23, %v1993_v33  ;;  %vm2050_vm11 = vcmp.eq.f32.partialorder %v2049_v62, 8.507059e+37  ;;  %v3012_v34 = vor.u32 %v3120_v8, %v3011_v7  ;;  %v3115_v25 = vld [vmem:[%s4304_s10 + $0x44] sm:$0xf]  ;;  %v2997_v23 = vld [vmem:[%s4304_s10 + $0x48] sm:$0xf0] }
 0xc40   :  { %v2013_v39 = vsel %vm2010_vm7, %v2012_v31, %v2008_v30  ;;  %v2063_v41 = vmul.f32 %v3279_v26, %v1998_v38  ;;  %v4095_v28 = vmul.f32 %v2057_v27, %v1998_v38  ;;  %v3016_v12 = vor.u32 %v3119_v10, %v3013_v11  ;;  %v3112_v62 = vld [vmem:[%s4304_s10 + $0x24] sm:$0xf0]  ;;  %v3107_v8 = vld [vmem:[%s4304_s10 + $0x4] sm:$0xf] }
 0xc41   :  { %v2064_v42 = vmul.f32 %v3281_v35, %v2013_v39  ;;  %v2062_v43 = vmul.f32 %v2058_v36, %v2013_v39  ;;  %2505 = vmatpush.bf16.msrb.mxu0 %v3012_v34  ;;  %v2996_v27 = vor.u32 %v3116_v24, %v2995_v22  ;;  %v3000_v33 = vor.u32 %v3115_v25, %v2997_v23  ;;  %v3108_v7 = vld [vmem:[%s4304_s10 + $0x4] sm:$0xf0] }
 0xc42   :  { %2067 = vrot.lane.b32.xlu1 %v2063_v41, %s3507_s18  ;;  %v3285_v18 = vpop.eup %3284  ;;  %2518 = vmatpush.bf16.msrb.mxu2 %v3016_v12  ;;  %v2964_v10 = vor.u32 %v3108_v7, %v2963_v52  ;;  %v2968_v11 = vor.u32 %v3107_v8, %v2965_v2  ;;  %v2422_v12 = vpack.c.b16 %v3953_v40, %v3953_v40 }
 0xc43   :  { %2069 = vrot.lane.b32.xlu2 %v2064_v42, %s3507_s18  ;;  %v2041_v46 = vmul.f32 %v3285_v18, %v2024_v45  ;;  %v3287_v53 = vpop.eup %3286  ;;  %vm2046_vm8 = vweird.f32 %v3285_v18 }
 0xc44   :  { %v4099_v55 = vadd.f32 1.0, %v3287_v53  ;;  %vm2047_vm10 = vmor %vm2045_vm9, %vm2046_vm8  ;;  %v2987_v53 = vld [vmem:[%s4304_s10 + $0x30] sm:$0xf] }
 0xc45   :  { %v2042_v48 = vsub.f32 1.0, %v2041_v46  ;;  %2506 = vmatpush.bf16.msrb.mxu0 %v3004_v6 }
 0xc46   :  { %2519 = vmatpush.bf16.msrb.mxu2 %v3008_v21  ;;  %v2036_v36 = vand.u32 2147483648, %v4099_v55  ;;  %vm2030_vm13 = vweird.f32 %v4099_v55  ;;  %v2034_v30 = vand.u32 2147483647, %v4099_v55 }
 0xc47   :  { %v2043_v54 = vmul.f32 %v3285_v18, %v2042_v48 }
 0xc48   :  { %v2037_v39 = vor.u32 1.1754944e-38, %v2036_v36  ;;  %vm2035_vm0 = vcmp.eq.f32.partialorder %v2034_v30, 8.507059e+37 }
 0xc49   :  { %v2044_v60 = vadd.f32 %v3285_v18, %v2043_v54  ;;  %2507 = vmatpush.bf16.msrb.mxu0 %v2996_v27  ;;  %v3114_v54 = vld [vmem:[%s4304_s10 + $0x34] sm:$0xf0] }
 0xc4a   :  { %2520 = vmatpush.bf16.msrb.mxu2 %v3000_v33 }
 0xc4b   :  { %v2048_v5 = vsel %vm2047_vm10, %v3285_v18, %v2044_v60  ;;  %v2989_v60 = vld [vmem:[%s4304_s10 + $0x38] sm:$0xf0] }
 0xc4c   :  { %v2053_v9 = vsel %vm2050_vm11, %v2052_v32, %v2048_v5  ;;  %v3111_v32 = vld [vmem:[%s4304_s10 + $0x24] sm:$0xf] }
 0xc9d   :  { %v2070_v57 = vpop.permute.xlu2 %2069 }
 0xc9e   :  { %v4101_v59 = vadd.f32 %v2070_v57, %v2062_v43  ;;  %v2988_v57 = vor.u32 %v3114_v54, %v2987_v53 }
 0xca0   :  { %3288 = vtanh.f32 %v4101_v59  ;;  %2508 = vmatpush.bf16.msrb.mxu0 %v2988_v57 }
 0xca1   :  { %3290 = vrcp.f32 %v4099_v55 }
 0xca6   :  { %v3289_v63 = vpop.eup %3288 }
 0xca7   :  { %v3291_v29 = vpop.eup %3290  ;;  %v2078_v16 = vmul.f32 %v3289_v63, %v2053_v9  ;;  %v2981_v63 = vld [vmem:[%s4304_s10 + $0x28] sm:$0xf0]  ;;  %v2980_v9 = vor.u32 %v3112_v62, %v2979_v61 }
 0xca8   :  { %v2026_v58 = vmul.f32 %v3291_v29, %v4099_v55  ;;  %vm2031_vm12 = vweird.f32 %v3291_v29  ;;  %v3113_v55 = vld [vmem:[%s4304_s10 + $0x34] sm:$0xf] }
 0xca9   :  { %vm2032_vm14 = vmor %vm2030_vm13, %vm2031_vm12  ;;  %v2080_v41 = vpack.c.bf16 %v2078_v16, %v2078_v16  ;;  %v2992_v5 = vor.u32 %v3113_v55, %v2989_v60  ;;  %v2971_v16 = vld [vmem:[%s4304_s10 + $0x10] sm:$0xf]  ;;  %2509 = vmatpush.bf16.msrb.mxu0 %v2980_v9 }
 0xcaa   :  { %v2027_v15 = vsub.f32 1.0, %v2026_v58  ;;  %v2972_v58 = vor.u32 %v3110_v0, %v2971_v16 }
 0xcab   :  { %v2084_v44 = vunpack.c.l.b16 %v2080_v41  ;;  %2521 = vmatpush.bf16.msrb.mxu2 %v2992_v5  ;;  %v2215_v5 = vrot.slane %v4101_v59, 7 }
 0xcac   :  { %v2028_v51 = vmul.f32 %v3291_v29, %v2027_v15 }
 0xcad   :  { %v2086_v20 = vrot.slane %v2084_v44, 4  ;;  %2510 = vmatpush.bf16.msrb.mxu0 %v2972_v58 }
 0xcae   :  { %v2029_v35 = vadd.f32 %v3291_v29, %v2028_v51  ;;  %v4220_v51 = vld [vmem:[%s4305_s11] sm:$0x3] }
 0xcaf   :  { %v2411_v25 = vperm.slane %v4220_v51, 0 }
 0xcb0   :  { %v2033_v38 = vsel %vm2032_vm14, %v3291_v29, %v2029_v35  ;;  %v2984_v29 = vor.u32 %v3111_v32, %v2981_v63 }
 0xcb1   :  { %v2038_v42 = vsel %vm2035_vm0, %v2037_v39, %v2033_v38  ;;  %2511 = vmatpush.bf16.msrb.mxu0 %v2964_v10 }
 0xcb2   :  { %2522 = vmatpush.bf16.msrb.mxu2 %v2984_v29 }
 0xcb4   :  { %v2068_v26 = vpop.permute.xlu1 %2067 }
 0xcb5   :  { %v4155_v31 = vadd.f32 %v2068_v26, %v4095_v28 }
 0xcb6   :  { %2523 = vmatpush.bf16.msrb.mxu2 %v2976_v4  ;;  %v2412_v4 = vperm.slane %v4220_v51, 1 }
 0xcb7   :  { %3292 = vtanh.f32 %v4155_v31  ;;  %v2214_v0 = vrot.slane %v4155_v31, 7 }
 0xcba   :  { %2524 = vmatpush.bf16.msrb.mxu2 %v2968_v11 }
 0xcbd   :  { %v3293_v28 = vpop.eup %3292 }
 0xcbe   :  { %v2077_v43 = vmul.f32 %v3293_v28, %v2038_v42 }
 0xcc0   :  { %v2079_v37 = vpack.c.bf16 %v2077_v43, %v2077_v43 }
 0xcc2   :  { %v2083_v45 = vunpack.c.l.b16 %v2079_v37 }
 0xcc4   :  { %v2085_v18 = vrot.slane %v2083_v45, 5 }
 0xcc6   :  { %v2087_v46 = vsel %vm1304_vm3, %v2086_v20, %v2085_v18 }
 0xcc7   :  { %v2088_v48 = vpack.c.b16 %v2087_v46, %v2087_v46 }
 0xcc9   :  { %2089 = vrot.lane.b32.xlu0 %v2088_v48, %s3507_s18 }
 0xd3b   :  { %v2090_v34 = vpop.permute.xlu0 %2089 }
 0xd3c   :  { %2947 = vmatmul.msk.bf16.vlgmr.msra.gmra.mxu0 %vm714_vm15, %v2090_v34  ;;  %2948 = vmatmul.msk.bf16.vlgmr.msra.gmra.mxu2 %vm714_vm15, %v2090_v34 }
 0xd4c   :  { %2512 = vmatmul.bf16.vlgmr.msrb.gmra.mxu0 %v2422_v12  ;;  %2525 = vmatmul.bf16.vlgmr.msrb.gmra.mxu2 %v2422_v12 }
 0xdb9   :  { %v2103_v56 = vpop.f32.mrf.mxu0 }
 0xdba   :  { %v2122_v14 = vrot.slane %v2103_v56, 2  ;;  %v2124_v15 = vrot.slane %v2103_v56, 3 }
 0xdbc   :  { %v2130_v13 = vadd.f32 %v2122_v14, %v3969_v47  ;;  %v2132_v17 = vadd.f32 %v2124_v15, %v3971_v50 }
 0xdbe   :  { %v2949_v6 = vmul.f32 -1.442695, %v2130_v13  ;;  %v2950_v21 = vmul.f32 -1.442695, %v2132_v17 }
 0xdbf   :  { %v2116_v22 = vpop.f32.mrf.mxu2 }
 0xdc0   :  { %3294 = vpow2.f32 %v2949_v6  ;;  %v2123_v36 = vrot.slane %v2116_v22, 2  ;;  %v2125_v38 = vrot.slane %v2116_v22, 3 }
 0xdc1   :  { %3296 = vpow2.f32 %v2950_v21  ;;  %v2105_v24 = vpop.f32.mrf.mxu0 }
 0xdc2   :  { %v4224_v41 = vadd.f32 %v2123_v36, %v3975_v1  ;;  %v4227_v42 = vadd.f32 %v2125_v38, %v3977_v3 }
 0xdc6   :  { %v3295_v40 = vpop.eup %3294 }
 0xdc7   :  { %v3297_v23 = vpop.eup %3296  ;;  %v2140_v26 = vadd.f32 1.0, %v3295_v40  ;;  %v2118_v27 = vpop.f32.mrf.mxu2  ;;  %v2952_v40 = vmul.f32 -1.442695, %v4227_v42 }
 0xdc8   :  { %v2141_v33 = vadd.f32 1.0, %v3297_v23  ;;  %v2951_v27 = vmul.f32 -1.442695, %v4224_v41 }
 0xdc9   :  { %3298 = vrcp.f32 %v2140_v26  ;;  %v2513_v35 = vpop.f32.mrf.mxu0  ;;  %v2153_v48 = vand.u32 2147483648, %v2140_v26  ;;  %v2151_v57 = vand.u32 2147483647, %v2140_v26  ;;  %vm2147_vm4 = vweird.f32 %v2140_v26 }
 0xdca   :  { %3300 = vrcp.f32 %v2141_v33  ;;  %v2514_v30 = vadd.f32 %v2513_v35, %v2411_v25  ;;  %v2168_v54 = vand.u32 2147483648, %v2141_v33  ;;  %v2166_v62 = vand.u32 2147483647, %v2141_v33 }
 0xdcb   :  { %vm2162_vm5 = vweird.f32 %v2141_v33  ;;  %v2154_v29 = vor.u32 1.1754944e-38, %v2153_v48  ;;  %vm2152_vm8 = vcmp.eq.f32.partialorder %v2151_v57, 8.507059e+37 }
 0xdcc   :  { %v3025_v39 = vmul.f32 -1.442695, %v2514_v30  ;;  %v2169_v49 = vor.u32 1.1754944e-38, %v2168_v54  ;;  %vm2167_vm9 = vcmp.eq.f32.partialorder %v2166_v62, 8.507059e+37 }
 0xdce   :  { %3302 = vpow2.f32 %v3025_v39 }
 0xdcf   :  { %v3299_v28 = vpop.eup %3298  ;;  %v2526_v43 = vpop.f32.mrf.mxu2  ;;  %3304 = vtanh.f32 %v4224_v41 }
 0xdd0   :  { %v3301_v37 = vpop.eup %3300  ;;  %v2143_v44 = vmul.f32 %v3299_v28, %v2140_v26  ;;  %3306 = vtanh.f32 %v4227_v42  ;;  %vm2148_vm1 = vweird.f32 %v3299_v28  ;;  %v4235_v12 = vadd.f32 %v2526_v43, %v2412_v4 }
 0xdd1   :  { %v2515_v45 = vpop.f32.mrf.mxu0  ;;  %v2158_v18 = vmul.f32 %v3301_v37, %v2141_v33  ;;  %vm2163_vm2 = vweird.f32 %v3301_v37  ;;  %vm2149_vm6 = vmor %vm2147_vm4, %vm2148_vm1 }
 0xdd2   :  { %v2144_v20 = vsub.f32 1.0, %v2143_v44  ;;  %vm2164_vm7 = vmor %vm2162_vm5, %vm2163_vm2 }
 0xdd3   :  { %v2159_v46 = vsub.f32 1.0, %v2158_v18 }
 0xdd4   :  { %v3303_v53 = vpop.eup %3302  ;;  %v2145_v55 = vmul.f32 %v3299_v28, %v2144_v20 }
 0xdd5   :  { %v2533_v60 = vadd.f32 1.0, %v3303_v53  ;;  %v2160_v61 = vmul.f32 %v3301_v37, %v2159_v46  ;;  %v3305_v16 = vpop.eup %3304 }
 0xdd6   :  { %v2146_v32 = vadd.f32 %v3299_v28, %v2145_v55  ;;  %v3307_v58 = vpop.eup %3306 }
 0xdd7   :  { %3308 = vrcp.f32 %v2533_v60  ;;  %v2528_v63 = vpop.f32.mrf.mxu2  ;;  %v2161_v9 = vadd.f32 %v3301_v37, %v2160_v61  ;;  %v2545_v14 = vand.u32 2147483648, %v2533_v60  ;;  %v2543_v13 = vand.u32 2147483647, %v2533_v60 }
 0xdd8   :  { %v2150_v19 = vsel %vm2149_vm6, %v3299_v28, %v2146_v32  ;;  %3310 = vtanh.f32 %v4235_v12  ;;  %vm2539_vm11 = vweird.f32 %v2533_v60 }
 0xdd9   :  { %v2165_v52 = vsel %vm2164_vm7, %v3301_v37, %v2161_v9  ;;  %v2155_v59 = vsel %vm2152_vm8, %v2154_v29, %v2150_v19  ;;  %v2546_v6 = vor.u32 1.1754944e-38, %v2545_v14  ;;  %vm2544_vm13 = vcmp.eq.f32.partialorder %v2543_v13, 8.507059e+37 }
 0xdda   :  { %v2170_v7 = vsel %vm2167_vm9, %v2169_v49, %v2165_v52  ;;  %v2220_v8 = vmul.f32 %v3305_v16, %v2155_v59  ;;  %v2218_v2 = vmul.f32 %v2214_v0, %v2155_v59  ;;  %3312 = vpow2.f32 %v2952_v40 }
 0xddb   :  { %v2221_v10 = vmul.f32 %v3307_v58, %v2170_v7  ;;  %v2219_v11 = vmul.f32 %v2215_v5, %v2170_v7 }
 0xddc   :  { %2224 = vrot.lane.b32.xlu1 %v2220_v8, %s3507_s18 }
 0xddd   :  { %v3309_v34 = vpop.eup %3308  ;;  %2226 = vrot.lane.b32.xlu2 %v2221_v10, %s3507_s18 }
 0xdde   :  { %v2535_v31 = vmul.f32 %v3309_v34, %v2533_v60  ;;  %vm2540_vm10 = vweird.f32 %v3309_v34  ;;  %v3311_v22 = vpop.eup %3310 }
 0xddf   :  { %vm2541_vm12 = vmor %vm2539_vm11, %vm2540_vm10 }
 0xde0   :  { %v2536_v56 = vsub.f32 1.0, %v2535_v31  ;;  %v3313_v25 = vpop.eup %3312 }
 0xde1   :  { %v2181_v23 = vadd.f32 1.0, %v3313_v25  ;;  %v3129_v25 = vld [vmem:[#allocation15 + $0x30] sm:$0xff] }
 0xde2   :  { %v2537_v15 = vmul.f32 %v3309_v34, %v2536_v56 }
 0xde3   :  { %3314 = vrcp.f32 %v2181_v23  ;;  %v2208_v42 = vand.u32 2147483648, %v2181_v23  ;;  %vm2202_vm0 = vweird.f32 %v2181_v23  ;;  %v2206_v37 = vand.u32 2147483647, %v2181_v23 }
 0xde4   :  { %v2538_v17 = vadd.f32 %v3309_v34, %v2537_v15  ;;  %3316 = vpow2.f32 %v2951_v27 }
 0xde5   :  { %v2209_v41 = vor.u32 1.1754944e-38, %v2208_v42  ;;  %vm2207_vm2 = vcmp.eq.f32.partialorder %v2206_v37, 8.507059e+37 }
 0xde6   :  { %v2542_v21 = vsel %vm2541_vm12, %v3309_v34, %v2538_v17 }
 0xde7   :  { %v2547_v24 = vsel %vm2544_vm13, %v2546_v6, %v2542_v21 }
 0xde8   :  { %v2569_v51 = vmul.f32 %v3311_v22, %v2547_v24 }
 0xde9   :  { %v3315_v26 = vpop.eup %3314 }
 0xdea   :  { %v2198_v33 = vmul.f32 %v3315_v26, %v2181_v23  ;;  %v3317_v36 = vpop.eup %3316  ;;  %vm2203_vm14 = vweird.f32 %v3315_v26 }
 0xdeb   :  { %v2180_v38 = vadd.f32 1.0, %v3317_v36  ;;  %vm2204_vm1 = vmor %vm2202_vm0, %vm2203_vm14 }
 0xdec   :  { %v2199_v35 = vsub.f32 1.0, %v2198_v33 }
 0xded   :  { %v2193_v61 = vand.u32 2147483648, %v2180_v38  ;;  %vm2187_vm5 = vweird.f32 %v2180_v38  ;;  %v2191_v62 = vand.u32 2147483647, %v2180_v38 }
 0xdee   :  { %v2200_v30 = vmul.f32 %v3315_v26, %v2199_v35 }
 0xdef   :  { %v2194_v32 = vor.u32 1.1754944e-38, %v2193_v61  ;;  %vm2192_vm7 = vcmp.eq.f32.partialorder %v2191_v62, 8.507059e+37 }
 0xdf0   :  { %v2201_v43 = vadd.f32 %v3315_v26, %v2200_v30 }
 0xdf2   :  { %v2205_v44 = vsel %vm2204_vm1, %v3315_v26, %v2201_v43 }
 0xdf3   :  { %v2210_v18 = vsel %vm2207_vm2, %v2209_v41, %v2205_v44 }
 0xe37   :  { %v2227_v39 = vpop.permute.xlu2 %2226 }
 0xe38   :  { %v4241_v28 = vadd.f32 %v2227_v39, %v2219_v11 }
 0xe3a   :  { %3318 = vtanh.f32 %v4241_v28 }
 0xe3b   :  { %3320 = vrcp.f32 %v2180_v38 }
 0xe40   :  { %v3319_v45 = vpop.eup %3318 }
 0xe41   :  { %v3321_v20 = vpop.eup %3320  ;;  %v2235_v46 = vmul.f32 %v3319_v45, %v2210_v18 }
 0xe42   :  { %v2183_v48 = vmul.f32 %v3321_v20, %v2180_v38  ;;  %vm2188_vm4 = vweird.f32 %v3321_v20 }
 0xe43   :  { %vm2189_vm6 = vmor %vm2187_vm5, %vm2188_vm4  ;;  %v2237_v63 = vpack.c.bf16 %v2235_v46, %v2235_v46 }
 0xe44   :  { %v2184_v53 = vsub.f32 1.0, %v2183_v48 }
 0xe45   :  { %v2241_v49 = vunpack.c.l.b16 %v2237_v63 }
 0xe46   :  { %v2185_v54 = vmul.f32 %v3321_v20, %v2184_v53 }
 0xe47   :  { %v2243_v4 = vrot.slane %v2241_v49, 5 }
 0xe48   :  { %v2186_v60 = vadd.f32 %v3321_v20, %v2185_v54 }
 0xe4a   :  { %v2190_v5 = vsel %vm2189_vm6, %v3321_v20, %v2186_v60 }
 0xe4b   :  { %v2195_v29 = vsel %vm2192_vm7, %v2194_v32, %v2190_v5 }
 0xe4e   :  { %v2225_v55 = vpop.permute.xlu1 %2224 }
 0xe4f   :  { %v4244_v57 = vadd.f32 %v2225_v55, %v2218_v2  ;;  %v3026_v2 = vmul.f32 -1.442695, %v4235_v12  ;;  %v3130_v12 = vld [vmem:[#allocation15 + $0x38] sm:$0xff] }
 0xe50   :  { %2629 = vmatpush.bf16.msra.mxu1 %v3130_v12 }
 0xe51   :  { %3322 = vtanh.f32 %v4244_v57  ;;  %v2371_v62 = vrot.slane %v4244_v57, 7 }
 0xe52   :  { %3324 = vtanh.f32 %v2569_v51 }
 0xe53   :  { %3326 = vpow2.f32 %v3026_v2 }
 0xe54   :  { %2630 = vmatpush.bf16.msra.mxu1 %v3129_v25 }
 0xe57   :  { %v3323_v9 = vpop.eup %3322 }
 0xe58   :  { %v2234_v16 = vmul.f32 %v3323_v9, %v2195_v29  ;;  %v3325_v7 = vpop.eup %3324  ;;  %v2372_v9 = vrot.slane %v4241_v28, 7 }
 0xe59   :  { %v3327_v31 = vpop.eup %3326 }
 0xe5a   :  { %v2236_v0 = vpack.c.bf16 %v2234_v16, %v2234_v16  ;;  %v4255_v15 = vadd.f32 1.0, %v3327_v31 }
 0xe5c   :  { %v2240_v19 = vunpack.c.l.b16 %v2236_v0  ;;  %vm2559_vm8 = vweird.f32 %v4255_v15  ;;  %v2563_v20 = vand.u32 2147483647, %v4255_v15  ;;  %v2565_v48 = vand.u32 2147483648, %v4255_v15 }
 0xe5e   :  { %v2242_v58 = vrot.slane %v2240_v19, 6  ;;  %vm2564_vm5 = vcmp.eq.f32.partialorder %v2563_v20, 8.507059e+37 }
 0xe60   :  { %v2244_v52 = vsel %vm1304_vm3, %v2243_v4, %v2242_v58 }
 0xe61   :  { %v2245_v59 = vpack.c.b16 %v2244_v52, %v2244_v52  ;;  %v2566_v52 = vor.u32 1.1754944e-38, %v2565_v48 }
 0xe63   :  { %2246 = vrot.lane.b32.xlu0 %v2245_v59, %s3507_s18 }
 0xe6b   :  { %2572 = vrot.lane.b32.xlu0 %v3325_v7, %s3507_s18 }
 0xed5   :  { %v2247_v8 = vpop.permute.xlu0 %2246 }
 0xed6   :  { %2953 = vmatmul.msk.bf16.vlgmr.msrb.gmra.mxu1 %vm714_vm15, %v2247_v8  ;;  %2954 = vmatmul.msk.bf16.vlgmr.msra.gmra.mxu3 %vm714_vm15, %v2247_v8 }
 0xedd   :  { %v2573_v59 = vpop.permute.xlu0 %2572 }
 0xf53   :  { %v2260_v10 = vpop.f32.mrf.mxu1 }
 0xf54   :  { %v2279_v11 = vrot.slane %v2260_v10, 1  ;;  %v2281_v34 = vrot.slane %v2260_v10, 2  ;;  %v3128_v10 = vld [vmem:[#allocation15 + $0x28] sm:$0xff] }
 0xf55   :  { %2631 = vmatpush.bf16.msra.mxu1 %v3128_v10 }
 0xf56   :  { %v2287_v56 = vadd.f32 %v2279_v11, %v3969_v47  ;;  %v2289_v14 = vadd.f32 %v2281_v34, %v3971_v50  ;;  %v3127_v11 = vld [vmem:[#allocation15 + $0x20] sm:$0xff] }
 0xf58   :  { %v2955_v13 = vmul.f32 -1.442695, %v2287_v56  ;;  %v2956_v17 = vmul.f32 -1.442695, %v2289_v14 }
 0xf59   :  { %v2273_v6 = vpop.f32.mrf.mxu3  ;;  %2632 = vmatpush.bf16.msra.mxu1 %v3127_v11 }
 0xf5a   :  { %3328 = vpow2.f32 %v2955_v13  ;;  %v2280_v23 = vrot.slane %v2273_v6, 1  ;;  %v2282_v27 = vrot.slane %v2273_v6, 2 }
 0xf5b   :  { %3330 = vpow2.f32 %v2956_v17  ;;  %v2262_v21 = vpop.f32.mrf.mxu1 }
 0xf5c   :  { %3332 = vrcp.f32 %v4255_v15  ;;  %v4263_v33 = vadd.f32 %v2280_v23, %v3975_v1  ;;  %v2290_v30 = vadd.f32 %v2282_v27, %v3977_v3 }
 0xf5e   :  { %v2958_v2 = vmul.f32 -1.442695, %v2290_v30  ;;  %v2957_v14 = vmul.f32 -1.442695, %v4263_v33 }
 0xf60   :  { %v3329_v22 = vpop.eup %3328 }
 0xf61   :  { %v3331_v24 = vpop.eup %3330  ;;  %v2297_v51 = vadd.f32 1.0, %v3329_v22  ;;  %v2275_v40 = vpop.f32.mrf.mxu3 }
 0xf62   :  { %v4258_v47 = vpop.eup %3332  ;;  %v2298_v50 = vadd.f32 1.0, %v3331_v24 }
 0xf63   :  { %3334 = vrcp.f32 %v2297_v51  ;;  %v2555_v26 = vmul.f32 %v4258_v47, %v4255_v15  ;;  %v2310_v41 = vand.u32 2147483648, %v2297_v51  ;;  %v2308_v18 = vand.u32 2147483647, %v2297_v51 }
 0xf64   :  { %3336 = vrcp.f32 %v2298_v50  ;;  %v2325_v45 = vand.u32 2147483648, %v2298_v50  ;;  %v2323_v46 = vand.u32 2147483647, %v2298_v50  ;;  %vm2560_vm11 = vweird.f32 %v4258_v47 }
 0xf65   :  { %v2556_v36 = vsub.f32 1.0, %v2555_v26  ;;  %3338 = vtanh.f32 %v4263_v33  ;;  %vm2304_vm12 = vweird.f32 %v2297_v51  ;;  %vm2319_vm13 = vweird.f32 %v2298_v50  ;;  %vm2561_vm4 = vmor %vm2559_vm8, %vm2560_vm11 }
 0xf66   :  { %3340 = vtanh.f32 %v2290_v30  ;;  %v2311_v60 = vor.u32 1.1754944e-38, %v2310_v41  ;;  %v2326_v5 = vor.u32 1.1754944e-38, %v2325_v45  ;;  %vm2309_vm1 = vcmp.eq.f32.partialorder %v2308_v18, 8.507059e+37 }
 0xf67   :  { %v2557_v37 = vmul.f32 %v4258_v47, %v2556_v36  ;;  %vm2324_vm2 = vcmp.eq.f32.partialorder %v2323_v46, 8.507059e+37  ;;  %3342 = vpow2.f32 %v2958_v2 }
 0xf69   :  { %v3335_v35 = vpop.eup %3334  ;;  %v2558_v54 = vadd.f32 %v4258_v47, %v2557_v37 }
 0xf6a   :  { %v3337_v38 = vpop.eup %3336  ;;  %v2300_v39 = vmul.f32 %v3335_v35, %v2297_v51  ;;  %vm2305_vm9 = vweird.f32 %v3335_v35 }
 0xf6b   :  { %v2315_v43 = vmul.f32 %v3337_v38, %v2298_v50  ;;  %vm2320_vm10 = vweird.f32 %v3337_v38  ;;  %vm2306_vm14 = vmor %vm2304_vm12, %vm2305_vm9  ;;  %v3339_v61 = vpop.eup %3338  ;;  %v2562_v57 = vsel %vm2561_vm4, %v4258_v47, %v2558_v54 }
 0xf6c   :  { %v2301_v42 = vsub.f32 1.0, %v2300_v39  ;;  %vm2321_vm0 = vmor %vm2319_vm13, %vm2320_vm10  ;;  %v3341_v63 = vpop.eup %3340  ;;  %v2567_v28 = vsel %vm2564_vm5, %v2566_v52, %v2562_v57 }
 0xf6d   :  { %v2316_v44 = vsub.f32 1.0, %v2315_v43  ;;  %v2575_v7 = vmul.f32 %v2573_v59, %v2567_v28  ;;  %v3343_v34 = vpop.eup %3342 }
 0xf6e   :  { %v2302_v1 = vmul.f32 %v3335_v35, %v2301_v42  ;;  %v2338_v31 = vadd.f32 1.0, %v3343_v34 }
 0xf6f   :  { %v2317_v3 = vmul.f32 %v3337_v38, %v2316_v44  ;;  %v2586_v8 = vpack.c.bf16 %v2575_v7, %v2575_v7 }
 0xf70   :  { %v2303_v53 = vadd.f32 %v3335_v35, %v2302_v1  ;;  %3344 = vrcp.f32 %v2338_v31  ;;  %v2365_v51 = vand.u32 2147483648, %v2338_v31  ;;  %vm2359_vm7 = vweird.f32 %v2338_v31 }
 0xf71   :  { %v2318_v55 = vadd.f32 %v3337_v38, %v2317_v3  ;;  %3346 = vpow2.f32 %v2957_v14  ;;  %v2363_v40 = vand.u32 2147483647, %v2338_v31 }
 0xf72   :  { %v2307_v32 = vsel %vm2306_vm14, %v3335_v35, %v2303_v53  ;;  %v2366_v47 = vor.u32 1.1754944e-38, %v2365_v51 }
 0xf73   :  { %v2322_v29 = vsel %vm2321_vm0, %v3337_v38, %v2318_v55  ;;  %v2312_v16 = vsel %vm2309_vm1, %v2311_v60, %v2307_v32  ;;  %vm2364_vm9 = vcmp.eq.f32.partialorder %v2363_v40, 8.507059e+37  ;;  %v3123_v32 = vld [vmem:[#allocation15] sm:$0xff] }
 0xf74   :  { %v2327_v0 = vsel %vm2324_vm2, %v2326_v5, %v2322_v29  ;;  %v2377_v49 = vmul.f32 %v3339_v61, %v2312_v16  ;;  %v2375_v19 = vmul.f32 %v2371_v62, %v2312_v16  ;;  %v3126_v61 = vld [vmem:[#allocation15 + $0x18] sm:$0xff]  ;;  %v3125_v62 = vld [vmem:[#allocation15 + $0x10] sm:$0xff]  ;;  %v3124_v5 = vld [vmem:[#allocation15 + $0x8] sm:$0xff] }
 0xf75   :  { %v2378_v58 = vmul.f32 %v3341_v63, %v2327_v0  ;;  %v2376_v4 = vmul.f32 %v2372_v9, %v2327_v0  ;;  %2679 = vmatpush.bf16.msrb.mxu3 %v3126_v61  ;;  %v3149_v16 = vld [vmem:[%s4307_s13] ss:$0 sm:$0xff] }
 0xf76   :  { %2381 = vrot.lane.b32.xlu1 %v2377_v49, %s3507_s18  ;;  %v3345_v56 = vpop.eup %3344 }
 0xf77   :  { %2383 = vrot.lane.b32.xlu2 %v2378_v58, %s3507_s18  ;;  %v2355_v15 = vmul.f32 %v3345_v56, %v2338_v31  ;;  %v3347_v17 = vpop.eup %3346  ;;  %vm2360_vm6 = vweird.f32 %v3345_v56 }
 0xf78   :  { %v2337_v21 = vadd.f32 1.0, %v3347_v17  ;;  %vm2361_vm8 = vmor %vm2359_vm7, %vm2360_vm6 }
 0xf79   :  { %v2356_v13 = vsub.f32 1.0, %v2355_v15  ;;  %2680 = vmatpush.bf16.msrb.mxu3 %v3125_v62 }
 0xf7a   :  { %v2350_v42 = vand.u32 2147483648, %v2337_v21  ;;  %vm2344_vm11 = vweird.f32 %v2337_v21  ;;  %v2348_v37 = vand.u32 2147483647, %v2337_v21 }
 0xf7b   :  { %v2357_v6 = vmul.f32 %v3345_v56, %v2356_v13 }
 0xf7c   :  { %v2351_v41 = vor.u32 1.1754944e-38, %v2350_v42  ;;  %vm2349_vm13 = vcmp.eq.f32.partialorder %v2348_v37, 8.507059e+37 }
 0xf7d   :  { %v2358_v24 = vadd.f32 %v3345_v56, %v2357_v6  ;;  %2681 = vmatpush.bf16.msrb.mxu3 %v3124_v5 }
 0xf7f   :  { %2596 = vrot.lane.b32.xlu2 %v2586_v8, %s3507_s18  ;;  %v2362_v25 = vsel %vm2361_vm8, %v3345_v56, %v2358_v24 }
 0xf80   :  { %v2367_v26 = vsel %vm2364_vm9, %v2366_v47, %v2362_v25 }
 0xf81   :  { %2682 = vmatpush.bf16.msrb.mxu3 %v3123_v32 }
 0xfd1   :  { %v2384_v12 = vpop.permute.xlu2 %2383 }
 0xfd2   :  { %v2388_v22 = vadd.f32 %v2384_v12, %v2376_v4 }
 0xfd4   :  { %3348 = vtanh.f32 %v2388_v22 }
 0xfd5   :  { %3350 = vrcp.f32 %v2337_v21 }
 0xfd9   :  { %v2597_v50 = vpop.permute.xlu2 %2596 }
 0xfda   :  { %v3349_v23 = vpop.eup %3348  ;;  %3043 = vmatmul.msk.bf16.vlgmr.msra.gmra.mxu1 %vm714_vm15, %v2597_v50 }
 0xfdb   :  { %v3351_v27 = vpop.eup %3350  ;;  %v2392_v33 = vmul.f32 %v3349_v23, %v2367_v26 }
 0xfdc   :  { %v2340_v35 = vmul.f32 %v3351_v27, %v2337_v21  ;;  %vm2345_vm10 = vweird.f32 %v3351_v27 }
 0xfdd   :  { %vm2346_vm12 = vmor %vm2344_vm11, %vm2345_vm10  ;;  %v2577_v45 = vpack.c.bf16 %v2392_v33, %v2392_v33 }
 0xfde   :  { %v2341_v36 = vsub.f32 1.0, %v2340_v35 }
 0xfdf   :  { %v2641_v46 = vunpack.c.l.b16 %v2577_v45 }
 0xfe0   :  { %v2342_v30 = vmul.f32 %v3351_v27, %v2341_v36 }
 0xfe1   :  { %v2643_v54 = vrot.slane %v2641_v46, 6 }
 0xfe2   :  { %v2343_v43 = vadd.f32 %v3351_v27, %v2342_v30 }
 0xfe4   :  { %v2347_v44 = vsel %vm2346_vm12, %v3351_v27, %v2343_v43 }
 0xfe5   :  { %v2352_v18 = vsel %vm2349_vm13, %v2351_v41, %v2347_v44 }
 0xfe8   :  { %v2382_v38 = vpop.permute.xlu1 %2381 }
 0xfe9   :  { %v2387_v39 = vadd.f32 %v2382_v38, %v2375_v19 }
 0xfeb   :  { %3352 = vtanh.f32 %v2387_v39 }
 0xff1   :  { %v3353_v1 = vpop.eup %3352 }
 0xff2   :  { %v2391_v20 = vmul.f32 %v3353_v1, %v2352_v18 }
 0xff4   :  { %v2576_v3 = vpack.c.bf16 %v2391_v20, %v2391_v20 }
 0xff6   :  { %v2640_v48 = vunpack.c.l.b16 %v2576_v3 }
 0xff8   :  { %v2642_v53 = vrot.slane %v2640_v48, 7 }
 0xffa   :  { %v2644_v55 = vsel %vm1304_vm3, %v2643_v54, %v2642_v53  ;;  %vm2694_vm3 = vcmask 517120  }
 0xffb   :  { %v2645_v60 = vpack.c.b16 %v2644_v55, %v2644_v55 }
 0xffd   :  { %2646 = vrot.lane.b32.xlu1 %v2645_v60, %s3507_s18  ;;  %s3520_s18 = smov [#allocation16]  }
 0xffe   :  { %s2701_s15 = sshll.u32 %s3520_s18, 4  ;;  %s2702_s15 = int_to_ptr.vmem [resolvable:$true] %s2701_s15 }
0x1057   :  { %v2634_v63 = vpop.f32.mrf.mxu1 }
0x105f   :  { %v2636_v9 = vpop.f32.mrf.mxu1 }
0x106f   :  { %v2647_v29 = vpop.permute.xlu1 %2646 }
0x1070   :  { %3060 = vmatmul.msk.bf16.vlgmr.msrb.gmra.mxu3 %vm714_vm15, %v2647_v29 }
0x10f3   :  { %v2684_v0 = vpop.f32.mrf.mxu3 }
0x10f4   :  { %v2685_v49 = vadd.f32 %v2684_v0, %v2634_v63 }
0x10f6   :  { %v2692_v19 = vadd.f32 %v3149_v16, %v2685_v49 }
0x10f8   :  { %v2693_v57 = vmax.f32 %v2692_v19, 0.0 }
0x10fa   :  { %2695 = vst.msk [vmem:[#allocation16] sm:$0x3] %vm2694_vm3, %v2693_v57 }
0x10fb   :  { %v2686_v58 = vpop.f32.mrf.mxu3  ;;  %2706 = dma.vmem_to_hbm [thread:$0]  %s2702_s15, 32, %s2704_s8, [#allocation9]  }
0x10fc   :  { %3504 = dma.done.wait [#allocation9], 32  }
0x10fd   :  { %3505 = vsyncadd [#allocation9], 4294967264 }
0x10fe   :  { %2711 = vsyncpa [#allocation8], 1 }
0x10ff   :  { %2712 = vsyncpa [#allocation11], 1 }
0x1100   :  { %2713 = vsyncpa [#allocation14], 1 }
0x1101   :  { %2714 = vsyncpa [#allocation9], 1 }

</bundles_post_ra>
